<compile_context>
chip_gen: v7x
topology: tpu7x:2x2x1
jax: 0.10.0
libtpu: 0.0.40
codegen_flags: <defaults>
</compile_context>

<pallas_src>
import math

import jax
import jax.numpy as jnp
import numpy as np
from jax import lax
from jax.experimental import pallas as pl
from jax.experimental.pallas import tpu as pltpu  # noqa: F401

# ---------------- static (small) config consistent with the module ----------------
B = 2                      # batch
L = 8                      # max_length
WORD_DIM = 16              # word_embedding_dim
POS_DIM = 4                # pos_embedding_dim
FEAT = WORD_DIM + 2 * POS_DIM   # 24
H = 32                     # hidden_size (== final_feat_dim here)
D = 2 * H                  # bi-GRU output dim
HEADS = 2
DH = D // HEADS
VOCAB = 20

G3 = 3 * H                 # 96  gate width per direction
GB = 128                   # backward-direction column offset (lane-tile aligned)
GW = 256                   # packed gate width (fwd 0:96, bwd 128:224, rest zero-pad)
LB = L * B

F32 = jnp.float32
# exact multi-pass precision: used only for 0/1 one-hot lookups and the tiny serial
# recurrent matmul; all other compute matmuls use default single-pass bf16 MXU.
EXACT = jax.lax.Precision.HIGHEST


# ------------------------------ fused Pallas kernel --------------------------------
def att_cnn_fused_kernel(
        wid_ref, p1id_ref, p2id_ref,           # (LB, 1) int32, seq-major rows t*B+b
        aw_ref, ap1_ref, ap2_ref,               # pre-multiplied tables (rows, GW)
        gib_ref, bhn_ref, wh_ref,               # (1,GW), (1,GW), (2H,GW)
        wqkv_ref, bqkv_ref, wo_ref, wl_ref, bl_ref,
        wconv_ref,                              # (3, H, H) conv taps
        out_ref):                               # (B, H)
    f32 = jnp.float32

    # ---- GRU gate pre-activations for BOTH directions in one shot:
    #      one-hot @ (table @ Wi)  (tables pre-multiplied outside, exact f32)
    def lookup(id_ref, tab_ref):
        rows = tab_ref.shape[0]
        onehot = (lax.broadcasted_iota(jnp.int32, (LB, rows), 1)
                  == id_ref[...]).astype(f32)
        return jnp.dot(onehot, tab_ref[...], preferred_element_type=f32,
                       precision=EXACT)

    gi = (lookup(wid_ref, aw_ref) + lookup(p1id_ref, ap1_ref)
          + lookup(p2id_ref, ap2_ref) + gib_ref[...])          # (LB, GW)
    # gi layout: cols 0:96 = fwd [r|z|n] (input bias + folded r/z recurrent bias),
    #            cols 128:224 = bwd [r|z|n].

    wh = wh_ref[...]                                            # (2H, GW) block-diag
    bhn = jnp.broadcast_to(bhn_ref[...], (B, GW))               # hoisted broadcast

    def gru_cell(gi_t, gh_t, h_prev):          # gate layout [r | z | n]
        r = jax.nn.sigmoid(gi_t[:, 0:H] + gh_t[:, 0:H])
        z = jax.nn.sigmoid(gi_t[:, H:2 * H] + gh_t[:, H:2 * H])
        n = jnp.tanh(gi_t[:, 2 * H:G3] + r * gh_t[:, 2 * H:G3])
        return (1.0 - z) * n + z * h_prev

    h = jnp.zeros((B, 2 * H), f32)             # [h_fwd | h_bwd]
    hf_seq = [None] * L
    hb_seq = [None] * L
    # fully unrolled recurrence; ONE block-diagonal matmul drives both directions
    for i in range(L):
        tf, tb = i, L - 1 - i
        gh = jnp.dot(h, wh, preferred_element_type=f32, precision=EXACT) + bhn
        hf = gru_cell(gi[tf * B:(tf + 1) * B, 0:G3],       gh[:, 0:G3],       h[:, 0:H])
        hb = gru_cell(gi[tb * B:(tb + 1) * B, GB:GB + G3], gh[:, GB:GB + G3], h[:, H:2 * H])
        h = jnp.concatenate([hf, hb], axis=1)
        hf_seq[tf] = hf
        hb_seq[tb] = hb

    feat_f = jnp.concatenate(hf_seq, axis=0)   # (LB, H), seq-major rows t*B + b
    feat_b = jnp.concatenate(hb_seq, axis=0)   # (LB, H)

    # ---- batch-fused multi-head self-attention (f32; torch uses f64 - no f64 on TPU)
    wqkv = wqkv_ref[...]; bqkv = bqkv_ref[...]
    wo = wo_ref[...]; wl = wl_ref[...]; bl = bl_ref[...]
    scale = 1.0 / math.sqrt(DH)

    # q/k/v for every (t, b) row and all heads in one wide projection
    qkv = (jnp.dot(feat_f, wqkv[0:H, :], preferred_element_type=f32)
           + jnp.dot(feat_b, wqkv[H:2 * H, :], preferred_element_type=f32)
           + bqkv)                                               # (LB, 3D)

    # block-diagonal cross-batch mask (rows/cols are t*B + b); B is a power of two,
    # so "same batch" == low bits of (row ^ col) are zero.  Large finite negative,
    # not -inf, so exp() after the row-max subtraction stays NaN-free.
    r_idx = lax.broadcasted_iota(jnp.int32, (LB, LB), 0)
    c_idx = lax.broadcasted_iota(jnp.int32, (LB, LB), 1)
    same_b = ((r_idx ^ c_idx) & (B - 1)) == 0
    neg_mask = jnp.where(same_b, 0.0, -1e30).astype(f32)

    o = jnp.zeros((LB, D), f32)
    for hd in range(HEADS):
        qh = qkv[:, hd * DH:(hd + 1) * DH]
        kh = qkv[:, D + hd * DH:D + (hd + 1) * DH]
        vh = qkv[:, 2 * D + hd * DH:2 * D + (hd + 1) * DH]
        s = lax.dot_general(qh, kh, (((1,), (1,)), ((), ())),
                            preferred_element_type=f32) * scale + neg_mask   # (LB, LB)
        e = jnp.exp(s - jnp.max(s, axis=-1, keepdims=True))
        prob = e * pl.reciprocal(jnp.sum(e, axis=-1, keepdims=True), approx=True)
        head = jnp.dot(prob, vh, preferred_element_type=f32)                 # (LB, DH)
        # concat(heads) @ Wo == sum_h head_h @ Wo[h*DH:(h+1)*DH, :]
        o = o + jnp.dot(head, wo[hd * DH:(hd + 1) * DH, :],
                        preferred_element_type=f32)

    y = jnp.dot(o, wl, preferred_element_type=f32) + bl          # (LB, H); bo folded in bl

    # ---- Conv2d(1, H, (3, H), pad (1,0), no bias) == three H x H taps applied to the
    #      [t-1 / t / t+1] rows; time shift = zero-pad + sublane slice/concat (XLU).
    wc0 = wconv_ref[0]; wc1 = wconv_ref[1]; wc2 = wconv_ref[2]
    zb = jnp.zeros((B, H), f32)
    y_prev = jnp.concatenate([zb, y[0:LB - B, :]], axis=0)       # row t <- t-1 (t=0 -> 0)
    y_next = jnp.concatenate([y[B:LB, :], zb], axis=0)           # row t <- t+1 (t=L-1 -> 0)
    conv = (jnp.dot(y_prev, wc0, preferred_element_type=f32)
            + jnp.dot(y, wc1, preferred_element_type=f32)
            + jnp.dot(y_next, wc2, preferred_element_type=f32))  # (LB, H)

    # ReLU + max-pool over time: log2(L) halvings of the (time,batch)-interleaved rows
    m = jnp.maximum(conv, 0.0)
    n_rows = LB
    while n_rows > B:
        half = n_rows // 2
        m = jnp.maximum(m[0:half, :], m[half:n_rows, :])
        n_rows = half
    out_ref[...] = m                                             # (B, H)


# ------------------------------ wrappers (glue) -------------------------------------
def pack_params(p):
    """One-time repack (outside jit): fold embeddings through the GRU input weights,
    block-diagonalize the recurrent weights (128-lane aligned per direction), and fold
    constant biases.  Products use HIGHEST precision so the packed values are exact."""
    mm = lambda a, b: jnp.dot(a, b, precision=EXACT)

    def premul(tab, r0, r1):
        a = jnp.zeros((tab.shape[0], GW), F32)
        a = a.at[:, 0:G3].set(mm(tab, p["wif"][r0:r1, :]))
        a = a.at[:, GB:GB + G3].set(mm(tab, p["wib"][r0:r1, :]))
        return a

    a_word = premul(p["word_emb"], 0, WORD_DIM)
    a_pos1 = premul(p["pos1_emb"], WORD_DIM, WORD_DIM + POS_DIM)
    a_pos2 = premul(p["pos2_emb"], WORD_DIM + POS_DIM, FEAT)

    # fold r/z recurrent biases into the input bias; keep only the n-gate bias for gh
    gi_bias = jnp.zeros((1, GW), F32)
    gi_bias = gi_bias.at[:, 0:2 * H].set(p["bif"][:, 0:2 * H] + p["bhf"][:, 0:2 * H])
    gi_bias = gi_bias.at[:, 2 * H:G3].set(p["bif"][:, 2 * H:G3])
    gi_bias = gi_bias.at[:, GB:GB + 2 * H].set(p["bib"][:, 0:2 * H] + p["bhb"][:, 0:2 * H])
    gi_bias = gi_bias.at[:, GB + 2 * H:GB + G3].set(p["bib"][:, 2 * H:G3])

    bh_n = jnp.zeros((1, GW), F32)
    bh_n = bh_n.at[:, 2 * H:G3].set(p["bhf"][:, 2 * H:G3])
    bh_n = bh_n.at[:, GB + 2 * H:GB + G3].set(p["bhb"][:, 2 * H:G3])

    wh_blk = jnp.zeros((2 * H, GW), F32)
    wh_blk = wh_blk.at[0:H, 0:G3].set(p["whf"])
    wh_blk = wh_blk.at[H:2 * H, GB:GB + G3].set(p["whb"])

    return dict(
        a_word=a_word, a_pos1=a_pos1, a_pos2=a_pos2,
        gi_bias=gi_bias, bh_n=bh_n, wh_blk=wh_blk,
        wqkv=jnp.concatenate([p["wq"], p["wk"], p["wv"]], axis=1),   # (D, 3D)
        bqkv=jnp.concatenate([p["bq"], p["bk"], p["bv"]], axis=1),   # (1, 3D)
        wo=p["wo"], wl=p["wl"],
        bl=mm(p["bo"], p["wl"]) + p["bl"],                           # bo folded into bl
        wconv=p["wconv"],                                            # (3, H_in, H_out)
    )


def att_cnn_encoder_forward(word_ids, pos1_ids, pos2_ids, q):
    # seq-major flattening (row = t*B + b) so all stages share one interleaved layout
    to_sm = lambda ids: ids.astype(jnp.int32).T.reshape(L * B, 1)
    return pl.pallas_call(
        att_cnn_fused_kernel,
        out_shape=jax.ShapeDtypeStruct((B, H), F32),
        # gridless / no BlockSpecs: single program, every (tiny) operand whole in VMEM
    )(to_sm(word_ids), to_sm(pos1_ids), to_sm(pos2_ids),
      q["a_word"], q["a_pos1"], q["a_pos2"],
      q["gi_bias"], q["bh_n"], q["wh_blk"],
      q["wqkv"], q["bqkv"], q["wo"], q["wl"], q["bl"],
      q["wconv"])


def reference_forward(word_ids, pos1_ids, pos2_ids, p):
    """Pure-JAX reference with the original module's math (correctness check)."""
    x_emb = jnp.concatenate([p["word_emb"][word_ids],
                             p["pos1_emb"][pos1_ids],
                             p["pos2_emb"][pos2_ids]], axis=-1)
    x = jnp.transpose(x_emb, (1, 0, 2))                                    # (L, B, FEAT)

    def gru_scan(wi, wh, bi, bh, reverse):
        def step(h, x_t):
            gi = x_t @ wi + bi
            gh = h @ wh + bh
            r = jax.nn.sigmoid(gi[:, :H] + gh[:, :H])
            z = jax.nn.sigmoid(gi[:, H:2 * H] + gh[:, H:2 * H])
            n = jnp.tanh(gi[:, 2 * H:] + r * gh[:, 2 * H:])
            h_new = (1.0 - z) * n + z * h
            return h_new, h_new
        _, ys = lax.scan(step, jnp.zeros((B, H), F32), x, reverse=reverse)
        return ys

    fwd = gru_scan(p["wif"], p["whf"], p["bif"], p["bhf"], False)
    bwd = gru_scan(p["wib"], p["whb"], p["bib"], p["bhb"], True)
    x2 = jnp.transpose(jnp.concatenate([fwd, bwd], -1), (1, 0, 2))         # (B, L, D)

    q = x2 @ p["wq"] + p["bq"]
    k = x2 @ p["wk"] + p["bk"]
    v = x2 @ p["wv"] + p["bv"]
    split = lambda t: t.reshape(B, L, HEADS, DH).transpose(0, 2, 1, 3)
    qh, kh, vh = split(q), split(k), split(v)
    scores = jnp.einsum("bhqd,bhkd->bhqk", qh, kh) / math.sqrt(DH)
    prob = jax.nn.softmax(scores, axis=-1)
    o = jnp.einsum("bhqk,bhkd->bhqd", prob, vh).transpose(0, 2, 1, 3).reshape(B, L, D)
    o = o @ p["wo"] + p["bo"]
    y = o @ p["wl"] + p["bl"]                                              # (B, L, H)

    y_prev = jnp.pad(y, ((0, 0), (1, 0), (0, 0)))[:, :L]
    y_next = jnp.pad(y, ((0, 0), (0, 1), (0, 0)))[:, 1:]
    conv = y_prev @ p["wconv"][0] + y @ p["wconv"][1] + y_next @ p["wconv"][2]
    return jnp.max(jnp.maximum(conv, 0.0), axis=1)                          # (B, H)


def init_params(key):
    keys = jax.random.split(key, 16)
    rnd = lambda k, shape, s=0.1: s * jax.random.normal(k, shape, dtype=F32)
    p = {}
    # GRU weights, stored pre-transposed so kernels do x @ W (+ 2-D biases)
    p["wif"] = rnd(keys[0], (FEAT, 3 * H)); p["whf"] = rnd(keys[1], (H, 3 * H))
    p["bif"] = rnd(keys[2], (1, 3 * H));    p["bhf"] = rnd(keys[3], (1, 3 * H))
    p["wib"] = rnd(keys[4], (FEAT, 3 * H)); p["whb"] = rnd(keys[5], (H, 3 * H))
    p["bib"] = rnd(keys[6], (1, 3 * H));    p["bhb"] = rnd(keys[7], (1, 3 * H))
    # attention: single (2H, 8H) weight / (8H,) bias as in __init__, split into q/k/v/o
    w_att = rnd(keys[8], (D, 4 * D))
    b_att = rnd(keys[9], (1, 4 * D))
    p["wq"], p["wk"], p["wv"], p["wo"] = [w_att[:, i * D:(i + 1) * D] for i in range(4)]
    p["bq"], p["bk"], p["bv"], p["bo"] = [b_att[:, i * D:(i + 1) * D] for i in range(4)]
    # att_linear (hidden*2 -> hidden), applied as x @ W + b
    p["wl"] = rnd(keys[10], (D, H)); p["bl"] = rnd(keys[11], (1, H))
    # conv weight: torch layout (H_out, 1, 3, H_in) -> (3, H_in, H_out)
    wconv_t = rnd(keys[12], (H, 1, 3, H))
    p["wconv"] = jnp.transpose(wconv_t[:, 0], (1, 2, 0))
    # embedding tables (word_vec_mat + UNK/BLANK rows, pos tables of size 2*max_length)
    p["word_emb"] = rnd(keys[13], (VOCAB + 2, WORD_DIM), 1.0)
    p["pos1_emb"] = rnd(keys[14], (2 * L, POS_DIM), 1.0)
    p["pos2_emb"] = rnd(keys[15], (2 * L, POS_DIM), 1.0)
    return p


if __name__ == "__main__":
    key = jax.random.PRNGKey(0)
    kp, kw, k1, k2 = jax.random.split(key, 4)
    params = init_params(kp)
    packed = pack_params(params)          # one-time repack, outside jit
    word_ids = jax.random.randint(kw, (B, L), 0, VOCAB + 2)
    pos1_ids = jax.random.randint(k1, (B, L), 0, 2 * L)
    pos2_ids = jax.random.randint(k2, (B, L), 0, 2 * L)

    out = jax.jit(att_cnn_encoder_forward)(word_ids, pos1_ids, pos2_ids, packed)
    out = jax.block_until_ready(out)
    assert out.shape == (B, H), out.shape

    ref = jax.jit(reference_forward)(word_ids, pos1_ids, pos2_ids, params)
    ref = jax.block_until_ready(ref)

    # Tail matmuls run at default (single-pass bf16) MXU precision in both the kernel
    # and the XLA reference -> tolerance sized for bf16.
    if not np.allclose(np.asarray(out), np.asarray(ref), rtol=2e-2, atol=2e-2):
        raise SystemExit("mismatch vs pure-JAX reference: "
                         f"max abs err {np.max(np.abs(np.asarray(out) - np.asarray(ref)))}")
    print("KERNEL_OK")
</pallas_src>

<mosaic_0001>
module attributes {stable_mosaic.version = 11 : i64} {
  func.func @att_cnn_fused_kernel(%arg0: memref<16x1xi32, #tpu.memory_space<vmem>>, %arg1: memref<16x1xi32, #tpu.memory_space<vmem>>, %arg2: memref<16x1xi32, #tpu.memory_space<vmem>>, %arg3: memref<22x256xf32, #tpu.memory_space<vmem>>, %arg4: memref<16x256xf32, #tpu.memory_space<vmem>>, %arg5: memref<16x256xf32, #tpu.memory_space<vmem>>, %arg6: memref<1x256xf32, #tpu.memory_space<vmem>>, %arg7: memref<1x256xf32, #tpu.memory_space<vmem>>, %arg8: memref<64x256xf32, #tpu.memory_space<vmem>>, %arg9: memref<64x192xf32, #tpu.memory_space<vmem>>, %arg10: memref<1x192xf32, #tpu.memory_space<vmem>>, %arg11: memref<64x64xf32, #tpu.memory_space<vmem>>, %arg12: memref<64x32xf32, #tpu.memory_space<vmem>>, %arg13: memref<1x32xf32, #tpu.memory_space<vmem>>, %arg14: memref<3x32x32xf32, #tpu.memory_space<vmem>>, %arg15: memref<2x32xf32, #tpu.memory_space<vmem>>) attributes {dimension_semantics = [], scalar_prefetch = 0 : i64, scratch_operands = 0 : i64, tpu.core_type = #tpu.core_type<tc>} {
    %0 = tpu.iota {dimensions = array<i32: 1>} : vector<16x22xi32>
    %c0 = arith.constant 0 : index
    %c0_0 = arith.constant 0 : index
    %1 = vector.load %arg0[%c0, %c0_0] : memref<16x1xi32, #tpu.memory_space<vmem>>, vector<16x1xi32>
    %2 = vector.broadcast %1 : vector<16x1xi32> to vector<16x22xi32>
    %3 = arith.cmpi eq, %0, %2 : vector<16x22xi32>
    %4 = arith.extui %3 : vector<16x22xi1> to vector<16x22xi32>
    %5 = arith.sitofp %4 : vector<16x22xi32> to vector<16x22xf32>
    %c0_1 = arith.constant 0 : index
    %c0_2 = arith.constant 0 : index
    %6 = vector.load %arg3[%c0_1, %c0_2] : memref<22x256xf32, #tpu.memory_space<vmem>>, vector<22x256xf32>
    %cst = arith.constant dense<0.000000e+00> : vector<16x256xf32>
    %7 = tpu.matmul %5, %6, %cst {dimension_numbers = #tpu.dot_dimension_numbers<[1], [0], [0], [1], [0, 0, 1, 1], [], []>, precision = #tpu.contract_precision<fp32>} : vector<16x22xf32>, vector<22x256xf32>, vector<16x256xf32> -> vector<16x256xf32>
    %8 = tpu.iota {dimensions = array<i32: 1>} : vector<16x16xi32>
    %c0_3 = arith.constant 0 : index
    %c0_4 = arith.constant 0 : index
    %9 = vector.load %arg1[%c0_3, %c0_4] : memref<16x1xi32, #tpu.memory_space<vmem>>, vector<16x1xi32>
    %10 = vector.broadcast %9 : vector<16x1xi32> to vector<16x16xi32>
    %11 = arith.cmpi eq, %8, %10 : vector<16x16xi32>
    %12 = arith.extui %11 : vector<16x16xi1> to vector<16x16xi32>
    %13 = arith.sitofp %12 : vector<16x16xi32> to vector<16x16xf32>
    %c0_5 = arith.constant 0 : index
    %c0_6 = arith.constant 0 : index
    %14 = vector.load %arg4[%c0_5, %c0_6] : memref<16x256xf32, #tpu.memory_space<vmem>>, vector<16x256xf32>
    %cst_7 = arith.constant dense<0.000000e+00> : vector<16x256xf32>
    %15 = tpu.matmul %13, %14, %cst_7 {dimension_numbers = #tpu.dot_dimension_numbers<[1], [0], [0], [1], [0, 0, 1, 1], [], []>, precision = #tpu.contract_precision<fp32>} : vector<16x16xf32>, vector<16x256xf32>, vector<16x256xf32> -> vector<16x256xf32>
    %16 = arith.addf %7, %15 : vector<16x256xf32>
    %17 = tpu.iota {dimensions = array<i32: 1>} : vector<16x16xi32>
    %c0_8 = arith.constant 0 : index
    %c0_9 = arith.constant 0 : index
    %18 = vector.load %arg2[%c0_8, %c0_9] : memref<16x1xi32, #tpu.memory_space<vmem>>, vector<16x1xi32>
    %19 = vector.broadcast %18 : vector<16x1xi32> to vector<16x16xi32>
    %20 = arith.cmpi eq, %17, %19 : vector<16x16xi32>
    %21 = arith.extui %20 : vector<16x16xi1> to vector<16x16xi32>
    %22 = arith.sitofp %21 : vector<16x16xi32> to vector<16x16xf32>
    %c0_10 = arith.constant 0 : index
    %c0_11 = arith.constant 0 : index
    %23 = vector.load %arg5[%c0_10, %c0_11] : memref<16x256xf32, #tpu.memory_space<vmem>>, vector<16x256xf32>
    %cst_12 = arith.constant dense<0.000000e+00> : vector<16x256xf32>
    %24 = tpu.matmul %22, %23, %cst_12 {dimension_numbers = #tpu.dot_dimension_numbers<[1], [0], [0], [1], [0, 0, 1, 1], [], []>, precision = #tpu.contract_precision<fp32>} : vector<16x16xf32>, vector<16x256xf32>, vector<16x256xf32> -> vector<16x256xf32>
    %25 = arith.addf %16, %24 : vector<16x256xf32>
    %c0_13 = arith.constant 0 : index
    %c0_14 = arith.constant 0 : index
    %26 = vector.load %arg6[%c0_13, %c0_14] : memref<1x256xf32, #tpu.memory_space<vmem>>, vector<1x256xf32>
    %27 = vector.broadcast %26 : vector<1x256xf32> to vector<16x256xf32>
    %28 = arith.addf %25, %27 : vector<16x256xf32>
    %c0_15 = arith.constant 0 : index
    %c0_16 = arith.constant 0 : index
    %29 = vector.load %arg8[%c0_15, %c0_16] : memref<64x256xf32, #tpu.memory_space<vmem>>, vector<64x256xf32>
    %c0_17 = arith.constant 0 : index
    %c0_18 = arith.constant 0 : index
    %30 = vector.load %arg7[%c0_17, %c0_18] : memref<1x256xf32, #tpu.memory_space<vmem>>, vector<1x256xf32>
    %31 = vector.shape_cast %30 : vector<1x256xf32> to vector<1x256xf32>
    %32 = vector.broadcast %31 : vector<1x256xf32> to vector<2x256xf32>
    %cst_19 = arith.constant 0.000000e+00 : f32
    %33 = vector.broadcast %cst_19 : f32 to vector<2x64xf32>
    %cst_20 = arith.constant dense<0.000000e+00> : vector<2x256xf32>
    %34 = tpu.matmul %33, %29, %cst_20 {dimension_numbers = #tpu.dot_dimension_numbers<[1], [0], [0], [1], [0, 0, 1, 1], [], []>, precision = #tpu.contract_precision<fp32>} : vector<2x64xf32>, vector<64x256xf32>, vector<2x256xf32> -> vector<2x256xf32>
    %35 = arith.addf %34, %32 : vector<2x256xf32>
    %36 = vector.extract_strided_slice %28 {offsets = [0, 0], sizes = [2, 96], strides = [1, 1]} : vector<16x256xf32> to vector<2x96xf32>
    %37 = vector.extract_strided_slice %35 {offsets = [0, 0], sizes = [2, 96], strides = [1, 1]} : vector<2x256xf32> to vector<2x96xf32>
    %38 = vector.extract_strided_slice %33 {offsets = [0, 0], sizes = [2, 32], strides = [1, 1]} : vector<2x64xf32> to vector<2x32xf32>
    %39 = vector.extract_strided_slice %36 {offsets = [0, 0], sizes = [2, 32], strides = [1, 1]} : vector<2x96xf32> to vector<2x32xf32>
    %40 = vector.extract_strided_slice %37 {offsets = [0, 0], sizes = [2, 32], strides = [1, 1]} : vector<2x96xf32> to vector<2x32xf32>
    %41 = arith.addf %39, %40 : vector<2x32xf32>
    %42 = arith.negf %41 : vector<2x32xf32>
    %43 = math.exp %42 : vector<2x32xf32>
    %cst_21 = arith.constant 1.000000e+00 : f32
    %44 = vector.broadcast %cst_21 : f32 to vector<2x32xf32>
    %45 = arith.addf %44, %43 : vector<2x32xf32>
    %46 = arith.divf %44, %45 : vector<2x32xf32>
    %47 = vector.extract_strided_slice %36 {offsets = [0, 32], sizes = [2, 32], strides = [1, 1]} : vector<2x96xf32> to vector<2x32xf32>
    %48 = vector.extract_strided_slice %37 {offsets = [0, 32], sizes = [2, 32], strides = [1, 1]} : vector<2x96xf32> to vector<2x32xf32>
    %49 = arith.addf %47, %48 : vector<2x32xf32>
    %50 = arith.negf %49 : vector<2x32xf32>
    %51 = math.exp %50 : vector<2x32xf32>
    %cst_22 = arith.constant 1.000000e+00 : f32
    %52 = vector.broadcast %cst_22 : f32 to vector<2x32xf32>
    %53 = arith.addf %52, %51 : vector<2x32xf32>
    %54 = arith.divf %52, %53 : vector<2x32xf32>
    %55 = vector.extract_strided_slice %36 {offsets = [0, 64], sizes = [2, 32], strides = [1, 1]} : vector<2x96xf32> to vector<2x32xf32>
    %56 = vector.extract_strided_slice %37 {offsets = [0, 64], sizes = [2, 32], strides = [1, 1]} : vector<2x96xf32> to vector<2x32xf32>
    %57 = arith.mulf %46, %56 : vector<2x32xf32>
    %58 = arith.addf %55, %57 : vector<2x32xf32>
    %59 = math.tanh %58 : vector<2x32xf32>
    %cst_23 = arith.constant 1.000000e+00 : f32
    %60 = vector.broadcast %cst_23 : f32 to vector<2x32xf32>
    %61 = arith.subf %60, %54 : vector<2x32xf32>
    %62 = arith.mulf %61, %59 : vector<2x32xf32>
    %63 = arith.mulf %54, %38 : vector<2x32xf32>
    %64 = arith.addf %62, %63 : vector<2x32xf32>
    %65 = vector.extract_strided_slice %28 {offsets = [14, 128], sizes = [2, 96], strides = [1, 1]} : vector<16x256xf32> to vector<2x96xf32>
    %66 = vector.extract_strided_slice %35 {offsets = [0, 128], sizes = [2, 96], strides = [1, 1]} : vector<2x256xf32> to vector<2x96xf32>
    %67 = vector.extract_strided_slice %33 {offsets = [0, 32], sizes = [2, 32], strides = [1, 1]} : vector<2x64xf32> to vector<2x32xf32>
    %68 = vector.extract_strided_slice %65 {offsets = [0, 0], sizes = [2, 32], strides = [1, 1]} : vector<2x96xf32> to vector<2x32xf32>
    %69 = vector.extract_strided_slice %66 {offsets = [0, 0], sizes = [2, 32], strides = [1, 1]} : vector<2x96xf32> to vector<2x32xf32>
    %70 = arith.addf %68, %69 : vector<2x32xf32>
    %71 = arith.negf %70 : vector<2x32xf32>
    %72 = math.exp %71 : vector<2x32xf32>
    %cst_24 = arith.constant 1.000000e+00 : f32
    %73 = vector.broadcast %cst_24 : f32 to vector<2x32xf32>
    %74 = arith.addf %73, %72 : vector<2x32xf32>
    %75 = arith.divf %73, %74 : vector<2x32xf32>
    %76 = vector.extract_strided_slice %65 {offsets = [0, 32], sizes = [2, 32], strides = [1, 1]} : vector<2x96xf32> to vector<2x32xf32>
    %77 = vector.extract_strided_slice %66 {offsets = [0, 32], sizes = [2, 32], strides = [1, 1]} : vector<2x96xf32> to vector<2x32xf32>
    %78 = arith.addf %76, %77 : vector<2x32xf32>
    %79 = arith.negf %78 : vector<2x32xf32>
    %80 = math.exp %79 : vector<2x32xf32>
    %cst_25 = arith.constant 1.000000e+00 : f32
    %81 = vector.broadcast %cst_25 : f32 to vector<2x32xf32>
    %82 = arith.addf %81, %80 : vector<2x32xf32>
    %83 = arith.divf %81, %82 : vector<2x32xf32>
    %84 = vector.extract_strided_slice %65 {offsets = [0, 64], sizes = [2, 32], strides = [1, 1]} : vector<2x96xf32> to vector<2x32xf32>
    %85 = vector.extract_strided_slice %66 {offsets = [0, 64], sizes = [2, 32], strides = [1, 1]} : vector<2x96xf32> to vector<2x32xf32>
    %86 = arith.mulf %75, %85 : vector<2x32xf32>
    %87 = arith.addf %84, %86 : vector<2x32xf32>
    %88 = math.tanh %87 : vector<2x32xf32>
    %cst_26 = arith.constant 1.000000e+00 : f32
    %89 = vector.broadcast %cst_26 : f32 to vector<2x32xf32>
    %90 = arith.subf %89, %83 : vector<2x32xf32>
    %91 = arith.mulf %90, %88 : vector<2x32xf32>
    %92 = arith.mulf %83, %67 : vector<2x32xf32>
    %93 = arith.addf %91, %92 : vector<2x32xf32>
    %94 = tpu.concatenate %64, %93 in 1 : vector<2x32xf32>, vector<2x32xf32> -> vector<2x64xf32>
    %cst_27 = arith.constant dense<0.000000e+00> : vector<2x256xf32>
    %95 = tpu.matmul %94, %29, %cst_27 {dimension_numbers = #tpu.dot_dimension_numbers<[1], [0], [0], [1], [0, 0, 1, 1], [], []>, precision = #tpu.contract_precision<fp32>} : vector<2x64xf32>, vector<64x256xf32>, vector<2x256xf32> -> vector<2x256xf32>
    %96 = arith.addf %95, %32 : vector<2x256xf32>
    %97 = vector.extract_strided_slice %28 {offsets = [2, 0], sizes = [2, 96], strides = [1, 1]} : vector<16x256xf32> to vector<2x96xf32>
    %98 = vector.extract_strided_slice %96 {offsets = [0, 0], sizes = [2, 96], strides = [1, 1]} : vector<2x256xf32> to vector<2x96xf32>
    %99 = vector.extract_strided_slice %94 {offsets = [0, 0], sizes = [2, 32], strides = [1, 1]} : vector<2x64xf32> to vector<2x32xf32>
    %100 = vector.extract_strided_slice %97 {offsets = [0, 0], sizes = [2, 32], strides = [1, 1]} : vector<2x96xf32> to vector<2x32xf32>
    %101 = vector.extract_strided_slice %98 {offsets = [0, 0], sizes = [2, 32], strides = [1, 1]} : vector<2x96xf32> to vector<2x32xf32>
    %102 = arith.addf %100, %101 : vector<2x32xf32>
    %103 = arith.negf %102 : vector<2x32xf32>
    %104 = math.exp %103 : vector<2x32xf32>
    %cst_28 = arith.constant 1.000000e+00 : f32
    %105 = vector.broadcast %cst_28 : f32 to vector<2x32xf32>
    %106 = arith.addf %105, %104 : vector<2x32xf32>
    %107 = arith.divf %105, %106 : vector<2x32xf32>
    %108 = vector.extract_strided_slice %97 {offsets = [0, 32], sizes = [2, 32], strides = [1, 1]} : vector<2x96xf32> to vector<2x32xf32>
    %109 = vector.extract_strided_slice %98 {offsets = [0, 32], sizes = [2, 32], strides = [1, 1]} : vector<2x96xf32> to vector<2x32xf32>
    %110 = arith.addf %108, %109 : vector<2x32xf32>
    %111 = arith.negf %110 : vector<2x32xf32>
    %112 = math.exp %111 : vector<2x32xf32>
    %cst_29 = arith.constant 1.000000e+00 : f32
    %113 = vector.broadcast %cst_29 : f32 to vector<2x32xf32>
    %114 = arith.addf %113, %112 : vector<2x32xf32>
    %115 = arith.divf %113, %114 : vector<2x32xf32>
    %116 = vector.extract_strided_slice %97 {offsets = [0, 64], sizes = [2, 32], strides = [1, 1]} : vector<2x96xf32> to vector<2x32xf32>
    %117 = vector.extract_strided_slice %98 {offsets = [0, 64], sizes = [2, 32], strides = [1, 1]} : vector<2x96xf32> to vector<2x32xf32>
    %118 = arith.mulf %107, %117 : vector<2x32xf32>
    %119 = arith.addf %116, %118 : vector<2x32xf32>
    %120 = math.tanh %119 : vector<2x32xf32>
    %cst_30 = arith.constant 1.000000e+00 : f32
    %121 = vector.broadcast %cst_30 : f32 to vector<2x32xf32>
    %122 = arith.subf %121, %115 : vector<2x32xf32>
    %123 = arith.mulf %122, %120 : vector<2x32xf32>
    %124 = arith.mulf %115, %99 : vector<2x32xf32>
    %125 = arith.addf %123, %124 : vector<2x32xf32>
    %126 = vector.extract_strided_slice %28 {offsets = [12, 128], sizes = [2, 96], strides = [1, 1]} : vector<16x256xf32> to vector<2x96xf32>
    %127 = vector.extract_strided_slice %96 {offsets = [0, 128], sizes = [2, 96], strides = [1, 1]} : vector<2x256xf32> to vector<2x96xf32>
    %128 = vector.extract_strided_slice %94 {offsets = [0, 32], sizes = [2, 32], strides = [1, 1]} : vector<2x64xf32> to vector<2x32xf32>
    %129 = vector.extract_strided_slice %126 {offsets = [0, 0], sizes = [2, 32], strides = [1, 1]} : vector<2x96xf32> to vector<2x32xf32>
    %130 = vector.extract_strided_slice %127 {offsets = [0, 0], sizes = [2, 32], strides = [1, 1]} : vector<2x96xf32> to vector<2x32xf32>
    %131 = arith.addf %129, %130 : vector<2x32xf32>
    %132 = arith.negf %131 : vector<2x32xf32>
    %133 = math.exp %132 : vector<2x32xf32>
    %cst_31 = arith.constant 1.000000e+00 : f32
    %134 = vector.broadcast %cst_31 : f32 to vector<2x32xf32>
    %135 = arith.addf %134, %133 : vector<2x32xf32>
    %136 = arith.divf %134, %135 : vector<2x32xf32>
    %137 = vector.extract_strided_slice %126 {offsets = [0, 32], sizes = [2, 32], strides = [1, 1]} : vector<2x96xf32> to vector<2x32xf32>
    %138 = vector.extract_strided_slice %127 {offsets = [0, 32], sizes = [2, 32], strides = [1, 1]} : vector<2x96xf32> to vector<2x32xf32>
    %139 = arith.addf %137, %138 : vector<2x32xf32>
    %140 = arith.negf %139 : vector<2x32xf32>
    %141 = math.exp %140 : vector<2x32xf32>
    %cst_32 = arith.constant 1.000000e+00 : f32
    %142 = vector.broadcast %cst_32 : f32 to vector<2x32xf32>
    %143 = arith.addf %142, %141 : vector<2x32xf32>
    %144 = arith.divf %142, %143 : vector<2x32xf32>
    %145 = vector.extract_strided_slice %126 {offsets = [0, 64], sizes = [2, 32], strides = [1, 1]} : vector<2x96xf32> to vector<2x32xf32>
    %146 = vector.extract_strided_slice %127 {offsets = [0, 64], sizes = [2, 32], strides = [1, 1]} : vector<2x96xf32> to vector<2x32xf32>
    %147 = arith.mulf %136, %146 : vector<2x32xf32>
    %148 = arith.addf %145, %147 : vector<2x32xf32>
    %149 = math.tanh %148 : vector<2x32xf32>
    %cst_33 = arith.constant 1.000000e+00 : f32
    %150 = vector.broadcast %cst_33 : f32 to vector<2x32xf32>
    %151 = arith.subf %150, %144 : vector<2x32xf32>
    %152 = arith.mulf %151, %149 : vector<2x32xf32>
    %153 = arith.mulf %144, %128 : vector<2x32xf32>
    %154 = arith.addf %152, %153 : vector<2x32xf32>
    %155 = tpu.concatenate %125, %154 in 1 : vector<2x32xf32>, vector<2x32xf32> -> vector<2x64xf32>
    %cst_34 = arith.constant dense<0.000000e+00> : vector<2x256xf32>
    %156 = tpu.matmul %155, %29, %cst_34 {dimension_numbers = #tpu.dot_dimension_numbers<[1], [0], [0], [1], [0, 0, 1, 1], [], []>, precision = #tpu.contract_precision<fp32>} : vector<2x64xf32>, vector<64x256xf32>, vector<2x256xf32> -> vector<2x256xf32>
    %157 = arith.addf %156, %32 : vector<2x256xf32>
    %158 = vector.extract_strided_slice %28 {offsets = [4, 0], sizes = [2, 96], strides = [1, 1]} : vector<16x256xf32> to vector<2x96xf32>
    %159 = vector.extract_strided_slice %157 {offsets = [0, 0], sizes = [2, 96], strides = [1, 1]} : vector<2x256xf32> to vector<2x96xf32>
    %160 = vector.extract_strided_slice %155 {offsets = [0, 0], sizes = [2, 32], strides = [1, 1]} : vector<2x64xf32> to vector<2x32xf32>
    %161 = vector.extract_strided_slice %158 {offsets = [0, 0], sizes = [2, 32], strides = [1, 1]} : vector<2x96xf32> to vector<2x32xf32>
    %162 = vector.extract_strided_slice %159 {offsets = [0, 0], sizes = [2, 32], strides = [1, 1]} : vector<2x96xf32> to vector<2x32xf32>
    %163 = arith.addf %161, %162 : vector<2x32xf32>
    %164 = arith.negf %163 : vector<2x32xf32>
    %165 = math.exp %164 : vector<2x32xf32>
    %cst_35 = arith.constant 1.000000e+00 : f32
    %166 = vector.broadcast %cst_35 : f32 to vector<2x32xf32>
    %167 = arith.addf %166, %165 : vector<2x32xf32>
    %168 = arith.divf %166, %167 : vector<2x32xf32>
    %169 = vector.extract_strided_slice %158 {offsets = [0, 32], sizes = [2, 32], strides = [1, 1]} : vector<2x96xf32> to vector<2x32xf32>
    %170 = vector.extract_strided_slice %159 {offsets = [0, 32], sizes = [2, 32], strides = [1, 1]} : vector<2x96xf32> to vector<2x32xf32>
    %171 = arith.addf %169, %170 : vector<2x32xf32>
    %172 = arith.negf %171 : vector<2x32xf32>
    %173 = math.exp %172 : vector<2x32xf32>
    %cst_36 = arith.constant 1.000000e+00 : f32
    %174 = vector.broadcast %cst_36 : f32 to vector<2x32xf32>
    %175 = arith.addf %174, %173 : vector<2x32xf32>
    %176 = arith.divf %174, %175 : vector<2x32xf32>
    %177 = vector.extract_strided_slice %158 {offsets = [0, 64], sizes = [2, 32], strides = [1, 1]} : vector<2x96xf32> to vector<2x32xf32>
    %178 = vector.extract_strided_slice %159 {offsets = [0, 64], sizes = [2, 32], strides = [1, 1]} : vector<2x96xf32> to vector<2x32xf32>
    %179 = arith.mulf %168, %178 : vector<2x32xf32>
    %180 = arith.addf %177, %179 : vector<2x32xf32>
    %181 = math.tanh %180 : vector<2x32xf32>
    %cst_37 = arith.constant 1.000000e+00 : f32
    %182 = vector.broadcast %cst_37 : f32 to vector<2x32xf32>
    %183 = arith.subf %182, %176 : vector<2x32xf32>
    %184 = arith.mulf %183, %181 : vector<2x32xf32>
    %185 = arith.mulf %176, %160 : vector<2x32xf32>
    %186 = arith.addf %184, %185 : vector<2x32xf32>
    %187 = vector.extract_strided_slice %28 {offsets = [10, 128], sizes = [2, 96], strides = [1, 1]} : vector<16x256xf32> to vector<2x96xf32>
    %188 = vector.extract_strided_slice %157 {offsets = [0, 128], sizes = [2, 96], strides = [1, 1]} : vector<2x256xf32> to vector<2x96xf32>
    %189 = vector.extract_strided_slice %155 {offsets = [0, 32], sizes = [2, 32], strides = [1, 1]} : vector<2x64xf32> to vector<2x32xf32>
    %190 = vector.extract_strided_slice %187 {offsets = [0, 0], sizes = [2, 32], strides = [1, 1]} : vector<2x96xf32> to vector<2x32xf32>
    %191 = vector.extract_strided_slice %188 {offsets = [0, 0], sizes = [2, 32], strides = [1, 1]} : vector<2x96xf32> to vector<2x32xf32>
    %192 = arith.addf %190, %191 : vector<2x32xf32>
    %193 = arith.negf %192 : vector<2x32xf32>
    %194 = math.exp %193 : vector<2x32xf32>
    %cst_38 = arith.constant 1.000000e+00 : f32
    %195 = vector.broadcast %cst_38 : f32 to vector<2x32xf32>
    %196 = arith.addf %195, %194 : vector<2x32xf32>
    %197 = arith.divf %195, %196 : vector<2x32xf32>
    %198 = vector.extract_strided_slice %187 {offsets = [0, 32], sizes = [2, 32], strides = [1, 1]} : vector<2x96xf32> to vector<2x32xf32>
    %199 = vector.extract_strided_slice %188 {offsets = [0, 32], sizes = [2, 32], strides = [1, 1]} : vector<2x96xf32> to vector<2x32xf32>
    %200 = arith.addf %198, %199 : vector<2x32xf32>
    %201 = arith.negf %200 : vector<2x32xf32>
    %202 = math.exp %201 : vector<2x32xf32>
    %cst_39 = arith.constant 1.000000e+00 : f32
    %203 = vector.broadcast %cst_39 : f32 to vector<2x32xf32>
    %204 = arith.addf %203, %202 : vector<2x32xf32>
    %205 = arith.divf %203, %204 : vector<2x32xf32>
    %206 = vector.extract_strided_slice %187 {offsets = [0, 64], sizes = [2, 32], strides = [1, 1]} : vector<2x96xf32> to vector<2x32xf32>
    %207 = vector.extract_strided_slice %188 {offsets = [0, 64], sizes = [2, 32], strides = [1, 1]} : vector<2x96xf32> to vector<2x32xf32>
    %208 = arith.mulf %197, %207 : vector<2x32xf32>
    %209 = arith.addf %206, %208 : vector<2x32xf32>
    %210 = math.tanh %209 : vector<2x32xf32>
    %cst_40 = arith.constant 1.000000e+00 : f32
    %211 = vector.broadcast %cst_40 : f32 to vector<2x32xf32>
    %212 = arith.subf %211, %205 : vector<2x32xf32>
    %213 = arith.mulf %212, %210 : vector<2x32xf32>
    %214 = arith.mulf %205, %189 : vector<2x32xf32>
    %215 = arith.addf %213, %214 : vector<2x32xf32>
    %216 = tpu.concatenate %186, %215 in 1 : vector<2x32xf32>, vector<2x32xf32> -> vector<2x64xf32>
    %cst_41 = arith.constant dense<0.000000e+00> : vector<2x256xf32>
    %217 = tpu.matmul %216, %29, %cst_41 {dimension_numbers = #tpu.dot_dimension_numbers<[1], [0], [0], [1], [0, 0, 1, 1], [], []>, precision = #tpu.contract_precision<fp32>} : vector<2x64xf32>, vector<64x256xf32>, vector<2x256xf32> -> vector<2x256xf32>
    %218 = arith.addf %217, %32 : vector<2x256xf32>
    %219 = vector.extract_strided_slice %28 {offsets = [6, 0], sizes = [2, 96], strides = [1, 1]} : vector<16x256xf32> to vector<2x96xf32>
    %220 = vector.extract_strided_slice %218 {offsets = [0, 0], sizes = [2, 96], strides = [1, 1]} : vector<2x256xf32> to vector<2x96xf32>
    %221 = vector.extract_strided_slice %216 {offsets = [0, 0], sizes = [2, 32], strides = [1, 1]} : vector<2x64xf32> to vector<2x32xf32>
    %222 = vector.extract_strided_slice %219 {offsets = [0, 0], sizes = [2, 32], strides = [1, 1]} : vector<2x96xf32> to vector<2x32xf32>
    %223 = vector.extract_strided_slice %220 {offsets = [0, 0], sizes = [2, 32], strides = [1, 1]} : vector<2x96xf32> to vector<2x32xf32>
    %224 = arith.addf %222, %223 : vector<2x32xf32>
    %225 = arith.negf %224 : vector<2x32xf32>
    %226 = math.exp %225 : vector<2x32xf32>
    %cst_42 = arith.constant 1.000000e+00 : f32
    %227 = vector.broadcast %cst_42 : f32 to vector<2x32xf32>
    %228 = arith.addf %227, %226 : vector<2x32xf32>
    %229 = arith.divf %227, %228 : vector<2x32xf32>
    %230 = vector.extract_strided_slice %219 {offsets = [0, 32], sizes = [2, 32], strides = [1, 1]} : vector<2x96xf32> to vector<2x32xf32>
    %231 = vector.extract_strided_slice %220 {offsets = [0, 32], sizes = [2, 32], strides = [1, 1]} : vector<2x96xf32> to vector<2x32xf32>
    %232 = arith.addf %230, %231 : vector<2x32xf32>
    %233 = arith.negf %232 : vector<2x32xf32>
    %234 = math.exp %233 : vector<2x32xf32>
    %cst_43 = arith.constant 1.000000e+00 : f32
    %235 = vector.broadcast %cst_43 : f32 to vector<2x32xf32>
    %236 = arith.addf %235, %234 : vector<2x32xf32>
    %237 = arith.divf %235, %236 : vector<2x32xf32>
    %238 = vector.extract_strided_slice %219 {offsets = [0, 64], sizes = [2, 32], strides = [1, 1]} : vector<2x96xf32> to vector<2x32xf32>
    %239 = vector.extract_strided_slice %220 {offsets = [0, 64], sizes = [2, 32], strides = [1, 1]} : vector<2x96xf32> to vector<2x32xf32>
    %240 = arith.mulf %229, %239 : vector<2x32xf32>
    %241 = arith.addf %238, %240 : vector<2x32xf32>
    %242 = math.tanh %241 : vector<2x32xf32>
    %cst_44 = arith.constant 1.000000e+00 : f32
    %243 = vector.broadcast %cst_44 : f32 to vector<2x32xf32>
    %244 = arith.subf %243, %237 : vector<2x32xf32>
    %245 = arith.mulf %244, %242 : vector<2x32xf32>
    %246 = arith.mulf %237, %221 : vector<2x32xf32>
    %247 = arith.addf %245, %246 : vector<2x32xf32>
    %248 = vector.extract_strided_slice %28 {offsets = [8, 128], sizes = [2, 96], strides = [1, 1]} : vector<16x256xf32> to vector<2x96xf32>
    %249 = vector.extract_strided_slice %218 {offsets = [0, 128], sizes = [2, 96], strides = [1, 1]} : vector<2x256xf32> to vector<2x96xf32>
    %250 = vector.extract_strided_slice %216 {offsets = [0, 32], sizes = [2, 32], strides = [1, 1]} : vector<2x64xf32> to vector<2x32xf32>
    %251 = vector.extract_strided_slice %248 {offsets = [0, 0], sizes = [2, 32], strides = [1, 1]} : vector<2x96xf32> to vector<2x32xf32>
    %252 = vector.extract_strided_slice %249 {offsets = [0, 0], sizes = [2, 32], strides = [1, 1]} : vector<2x96xf32> to vector<2x32xf32>
    %253 = arith.addf %251, %252 : vector<2x32xf32>
    %254 = arith.negf %253 : vector<2x32xf32>
    %255 = math.exp %254 : vector<2x32xf32>
    %cst_45 = arith.constant 1.000000e+00 : f32
    %256 = vector.broadcast %cst_45 : f32 to vector<2x32xf32>
    %257 = arith.addf %256, %255 : vector<2x32xf32>
    %258 = arith.divf %256, %257 : vector<2x32xf32>
    %259 = vector.extract_strided_slice %248 {offsets = [0, 32], sizes = [2, 32], strides = [1, 1]} : vector<2x96xf32> to vector<2x32xf32>
    %260 = vector.extract_strided_slice %249 {offsets = [0, 32], sizes = [2, 32], strides = [1, 1]} : vector<2x96xf32> to vector<2x32xf32>
    %261 = arith.addf %259, %260 : vector<2x32xf32>
    %262 = arith.negf %261 : vector<2x32xf32>
    %263 = math.exp %262 : vector<2x32xf32>
    %cst_46 = arith.constant 1.000000e+00 : f32
    %264 = vector.broadcast %cst_46 : f32 to vector<2x32xf32>
    %265 = arith.addf %264, %263 : vector<2x32xf32>
    %266 = arith.divf %264, %265 : vector<2x32xf32>
    %267 = vector.extract_strided_slice %248 {offsets = [0, 64], sizes = [2, 32], strides = [1, 1]} : vector<2x96xf32> to vector<2x32xf32>
    %268 = vector.extract_strided_slice %249 {offsets = [0, 64], sizes = [2, 32], strides = [1, 1]} : vector<2x96xf32> to vector<2x32xf32>
    %269 = arith.mulf %258, %268 : vector<2x32xf32>
    %270 = arith.addf %267, %269 : vector<2x32xf32>
    %271 = math.tanh %270 : vector<2x32xf32>
    %cst_47 = arith.constant 1.000000e+00 : f32
    %272 = vector.broadcast %cst_47 : f32 to vector<2x32xf32>
    %273 = arith.subf %272, %266 : vector<2x32xf32>
    %274 = arith.mulf %273, %271 : vector<2x32xf32>
    %275 = arith.mulf %266, %250 : vector<2x32xf32>
    %276 = arith.addf %274, %275 : vector<2x32xf32>
    %277 = tpu.concatenate %247, %276 in 1 : vector<2x32xf32>, vector<2x32xf32> -> vector<2x64xf32>
    %cst_48 = arith.constant dense<0.000000e+00> : vector<2x256xf32>
    %278 = tpu.matmul %277, %29, %cst_48 {dimension_numbers = #tpu.dot_dimension_numbers<[1], [0], [0], [1], [0, 0, 1, 1], [], []>, precision = #tpu.contract_precision<fp32>} : vector<2x64xf32>, vector<64x256xf32>, vector<2x256xf32> -> vector<2x256xf32>
    %279 = arith.addf %278, %32 : vector<2x256xf32>
    %280 = vector.extract_strided_slice %28 {offsets = [8, 0], sizes = [2, 96], strides = [1, 1]} : vector<16x256xf32> to vector<2x96xf32>
    %281 = vector.extract_strided_slice %279 {offsets = [0, 0], sizes = [2, 96], strides = [1, 1]} : vector<2x256xf32> to vector<2x96xf32>
    %282 = vector.extract_strided_slice %277 {offsets = [0, 0], sizes = [2, 32], strides = [1, 1]} : vector<2x64xf32> to vector<2x32xf32>
    %283 = vector.extract_strided_slice %280 {offsets = [0, 0], sizes = [2, 32], strides = [1, 1]} : vector<2x96xf32> to vector<2x32xf32>
    %284 = vector.extract_strided_slice %281 {offsets = [0, 0], sizes = [2, 32], strides = [1, 1]} : vector<2x96xf32> to vector<2x32xf32>
    %285 = arith.addf %283, %284 : vector<2x32xf32>
    %286 = arith.negf %285 : vector<2x32xf32>
    %287 = math.exp %286 : vector<2x32xf32>
    %cst_49 = arith.constant 1.000000e+00 : f32
    %288 = vector.broadcast %cst_49 : f32 to vector<2x32xf32>
    %289 = arith.addf %288, %287 : vector<2x32xf32>
    %290 = arith.divf %288, %289 : vector<2x32xf32>
    %291 = vector.extract_strided_slice %280 {offsets = [0, 32], sizes = [2, 32], strides = [1, 1]} : vector<2x96xf32> to vector<2x32xf32>
    %292 = vector.extract_strided_slice %281 {offsets = [0, 32], sizes = [2, 32], strides = [1, 1]} : vector<2x96xf32> to vector<2x32xf32>
    %293 = arith.addf %291, %292 : vector<2x32xf32>
    %294 = arith.negf %293 : vector<2x32xf32>
    %295 = math.exp %294 : vector<2x32xf32>
    %cst_50 = arith.constant 1.000000e+00 : f32
    %296 = vector.broadcast %cst_50 : f32 to vector<2x32xf32>
    %297 = arith.addf %296, %295 : vector<2x32xf32>
    %298 = arith.divf %296, %297 : vector<2x32xf32>
    %299 = vector.extract_strided_slice %280 {offsets = [0, 64], sizes = [2, 32], strides = [1, 1]} : vector<2x96xf32> to vector<2x32xf32>
    %300 = vector.extract_strided_slice %281 {offsets = [0, 64], sizes = [2, 32], strides = [1, 1]} : vector<2x96xf32> to vector<2x32xf32>
    %301 = arith.mulf %290, %300 : vector<2x32xf32>
    %302 = arith.addf %299, %301 : vector<2x32xf32>
    %303 = math.tanh %302 : vector<2x32xf32>
    %cst_51 = arith.constant 1.000000e+00 : f32
    %304 = vector.broadcast %cst_51 : f32 to vector<2x32xf32>
    %305 = arith.subf %304, %298 : vector<2x32xf32>
    %306 = arith.mulf %305, %303 : vector<2x32xf32>
    %307 = arith.mulf %298, %282 : vector<2x32xf32>
    %308 = arith.addf %306, %307 : vector<2x32xf32>
    %309 = vector.extract_strided_slice %28 {offsets = [6, 128], sizes = [2, 96], strides = [1, 1]} : vector<16x256xf32> to vector<2x96xf32>
    %310 = vector.extract_strided_slice %279 {offsets = [0, 128], sizes = [2, 96], strides = [1, 1]} : vector<2x256xf32> to vector<2x96xf32>
    %311 = vector.extract_strided_slice %277 {offsets = [0, 32], sizes = [2, 32], strides = [1, 1]} : vector<2x64xf32> to vector<2x32xf32>
    %312 = vector.extract_strided_slice %309 {offsets = [0, 0], sizes = [2, 32], strides = [1, 1]} : vector<2x96xf32> to vector<2x32xf32>
    %313 = vector.extract_strided_slice %310 {offsets = [0, 0], sizes = [2, 32], strides = [1, 1]} : vector<2x96xf32> to vector<2x32xf32>
    %314 = arith.addf %312, %313 : vector<2x32xf32>
    %315 = arith.negf %314 : vector<2x32xf32>
    %316 = math.exp %315 : vector<2x32xf32>
    %cst_52 = arith.constant 1.000000e+00 : f32
    %317 = vector.broadcast %cst_52 : f32 to vector<2x32xf32>
    %318 = arith.addf %317, %316 : vector<2x32xf32>
    %319 = arith.divf %317, %318 : vector<2x32xf32>
    %320 = vector.extract_strided_slice %309 {offsets = [0, 32], sizes = [2, 32], strides = [1, 1]} : vector<2x96xf32> to vector<2x32xf32>
    %321 = vector.extract_strided_slice %310 {offsets = [0, 32], sizes = [2, 32], strides = [1, 1]} : vector<2x96xf32> to vector<2x32xf32>
    %322 = arith.addf %320, %321 : vector<2x32xf32>
    %323 = arith.negf %322 : vector<2x32xf32>
    %324 = math.exp %323 : vector<2x32xf32>
    %cst_53 = arith.constant 1.000000e+00 : f32
    %325 = vector.broadcast %cst_53 : f32 to vector<2x32xf32>
    %326 = arith.addf %325, %324 : vector<2x32xf32>
    %327 = arith.divf %325, %326 : vector<2x32xf32>
    %328 = vector.extract_strided_slice %309 {offsets = [0, 64], sizes = [2, 32], strides = [1, 1]} : vector<2x96xf32> to vector<2x32xf32>
    %329 = vector.extract_strided_slice %310 {offsets = [0, 64], sizes = [2, 32], strides = [1, 1]} : vector<2x96xf32> to vector<2x32xf32>
    %330 = arith.mulf %319, %329 : vector<2x32xf32>
    %331 = arith.addf %328, %330 : vector<2x32xf32>
    %332 = math.tanh %331 : vector<2x32xf32>
    %cst_54 = arith.constant 1.000000e+00 : f32
    %333 = vector.broadcast %cst_54 : f32 to vector<2x32xf32>
    %334 = arith.subf %333, %327 : vector<2x32xf32>
    %335 = arith.mulf %334, %332 : vector<2x32xf32>
    %336 = arith.mulf %327, %311 : vector<2x32xf32>
    %337 = arith.addf %335, %336 : vector<2x32xf32>
    %338 = tpu.concatenate %308, %337 in 1 : vector<2x32xf32>, vector<2x32xf32> -> vector<2x64xf32>
    %cst_55 = arith.constant dense<0.000000e+00> : vector<2x256xf32>
    %339 = tpu.matmul %338, %29, %cst_55 {dimension_numbers = #tpu.dot_dimension_numbers<[1], [0], [0], [1], [0, 0, 1, 1], [], []>, precision = #tpu.contract_precision<fp32>} : vector<2x64xf32>, vector<64x256xf32>, vector<2x256xf32> -> vector<2x256xf32>
    %340 = arith.addf %339, %32 : vector<2x256xf32>
    %341 = vector.extract_strided_slice %28 {offsets = [10, 0], sizes = [2, 96], strides = [1, 1]} : vector<16x256xf32> to vector<2x96xf32>
    %342 = vector.extract_strided_slice %340 {offsets = [0, 0], sizes = [2, 96], strides = [1, 1]} : vector<2x256xf32> to vector<2x96xf32>
    %343 = vector.extract_strided_slice %338 {offsets = [0, 0], sizes = [2, 32], strides = [1, 1]} : vector<2x64xf32> to vector<2x32xf32>
    %344 = vector.extract_strided_slice %341 {offsets = [0, 0], sizes = [2, 32], strides = [1, 1]} : vector<2x96xf32> to vector<2x32xf32>
    %345 = vector.extract_strided_slice %342 {offsets = [0, 0], sizes = [2, 32], strides = [1, 1]} : vector<2x96xf32> to vector<2x32xf32>
    %346 = arith.addf %344, %345 : vector<2x32xf32>
    %347 = arith.negf %346 : vector<2x32xf32>
    %348 = math.exp %347 : vector<2x32xf32>
    %cst_56 = arith.constant 1.000000e+00 : f32
    %349 = vector.broadcast %cst_56 : f32 to vector<2x32xf32>
    %350 = arith.addf %349, %348 : vector<2x32xf32>
    %351 = arith.divf %349, %350 : vector<2x32xf32>
    %352 = vector.extract_strided_slice %341 {offsets = [0, 32], sizes = [2, 32], strides = [1, 1]} : vector<2x96xf32> to vector<2x32xf32>
    %353 = vector.extract_strided_slice %342 {offsets = [0, 32], sizes = [2, 32], strides = [1, 1]} : vector<2x96xf32> to vector<2x32xf32>
    %354 = arith.addf %352, %353 : vector<2x32xf32>
    %355 = arith.negf %354 : vector<2x32xf32>
    %356 = math.exp %355 : vector<2x32xf32>
    %cst_57 = arith.constant 1.000000e+00 : f32
    %357 = vector.broadcast %cst_57 : f32 to vector<2x32xf32>
    %358 = arith.addf %357, %356 : vector<2x32xf32>
    %359 = arith.divf %357, %358 : vector<2x32xf32>
    %360 = vector.extract_strided_slice %341 {offsets = [0, 64], sizes = [2, 32], strides = [1, 1]} : vector<2x96xf32> to vector<2x32xf32>
    %361 = vector.extract_strided_slice %342 {offsets = [0, 64], sizes = [2, 32], strides = [1, 1]} : vector<2x96xf32> to vector<2x32xf32>
    %362 = arith.mulf %351, %361 : vector<2x32xf32>
    %363 = arith.addf %360, %362 : vector<2x32xf32>
    %364 = math.tanh %363 : vector<2x32xf32>
    %cst_58 = arith.constant 1.000000e+00 : f32
    %365 = vector.broadcast %cst_58 : f32 to vector<2x32xf32>
    %366 = arith.subf %365, %359 : vector<2x32xf32>
    %367 = arith.mulf %366, %364 : vector<2x32xf32>
    %368 = arith.mulf %359, %343 : vector<2x32xf32>
    %369 = arith.addf %367, %368 : vector<2x32xf32>
    %370 = vector.extract_strided_slice %28 {offsets = [4, 128], sizes = [2, 96], strides = [1, 1]} : vector<16x256xf32> to vector<2x96xf32>
    %371 = vector.extract_strided_slice %340 {offsets = [0, 128], sizes = [2, 96], strides = [1, 1]} : vector<2x256xf32> to vector<2x96xf32>
    %372 = vector.extract_strided_slice %338 {offsets = [0, 32], sizes = [2, 32], strides = [1, 1]} : vector<2x64xf32> to vector<2x32xf32>
    %373 = vector.extract_strided_slice %370 {offsets = [0, 0], sizes = [2, 32], strides = [1, 1]} : vector<2x96xf32> to vector<2x32xf32>
    %374 = vector.extract_strided_slice %371 {offsets = [0, 0], sizes = [2, 32], strides = [1, 1]} : vector<2x96xf32> to vector<2x32xf32>
    %375 = arith.addf %373, %374 : vector<2x32xf32>
    %376 = arith.negf %375 : vector<2x32xf32>
    %377 = math.exp %376 : vector<2x32xf32>
    %cst_59 = arith.constant 1.000000e+00 : f32
    %378 = vector.broadcast %cst_59 : f32 to vector<2x32xf32>
    %379 = arith.addf %378, %377 : vector<2x32xf32>
    %380 = arith.divf %378, %379 : vector<2x32xf32>
    %381 = vector.extract_strided_slice %370 {offsets = [0, 32], sizes = [2, 32], strides = [1, 1]} : vector<2x96xf32> to vector<2x32xf32>
    %382 = vector.extract_strided_slice %371 {offsets = [0, 32], sizes = [2, 32], strides = [1, 1]} : vector<2x96xf32> to vector<2x32xf32>
    %383 = arith.addf %381, %382 : vector<2x32xf32>
    %384 = arith.negf %383 : vector<2x32xf32>
    %385 = math.exp %384 : vector<2x32xf32>
    %cst_60 = arith.constant 1.000000e+00 : f32
    %386 = vector.broadcast %cst_60 : f32 to vector<2x32xf32>
    %387 = arith.addf %386, %385 : vector<2x32xf32>
    %388 = arith.divf %386, %387 : vector<2x32xf32>
    %389 = vector.extract_strided_slice %370 {offsets = [0, 64], sizes = [2, 32], strides = [1, 1]} : vector<2x96xf32> to vector<2x32xf32>
    %390 = vector.extract_strided_slice %371 {offsets = [0, 64], sizes = [2, 32], strides = [1, 1]} : vector<2x96xf32> to vector<2x32xf32>
    %391 = arith.mulf %380, %390 : vector<2x32xf32>
    %392 = arith.addf %389, %391 : vector<2x32xf32>
    %393 = math.tanh %392 : vector<2x32xf32>
    %cst_61 = arith.constant 1.000000e+00 : f32
    %394 = vector.broadcast %cst_61 : f32 to vector<2x32xf32>
    %395 = arith.subf %394, %388 : vector<2x32xf32>
    %396 = arith.mulf %395, %393 : vector<2x32xf32>
    %397 = arith.mulf %388, %372 : vector<2x32xf32>
    %398 = arith.addf %396, %397 : vector<2x32xf32>
    %399 = tpu.concatenate %369, %398 in 1 : vector<2x32xf32>, vector<2x32xf32> -> vector<2x64xf32>
    %cst_62 = arith.constant dense<0.000000e+00> : vector<2x256xf32>
    %400 = tpu.matmul %399, %29, %cst_62 {dimension_numbers = #tpu.dot_dimension_numbers<[1], [0], [0], [1], [0, 0, 1, 1], [], []>, precision = #tpu.contract_precision<fp32>} : vector<2x64xf32>, vector<64x256xf32>, vector<2x256xf32> -> vector<2x256xf32>
    %401 = arith.addf %400, %32 : vector<2x256xf32>
    %402 = vector.extract_strided_slice %28 {offsets = [12, 0], sizes = [2, 96], strides = [1, 1]} : vector<16x256xf32> to vector<2x96xf32>
    %403 = vector.extract_strided_slice %401 {offsets = [0, 0], sizes = [2, 96], strides = [1, 1]} : vector<2x256xf32> to vector<2x96xf32>
    %404 = vector.extract_strided_slice %399 {offsets = [0, 0], sizes = [2, 32], strides = [1, 1]} : vector<2x64xf32> to vector<2x32xf32>
    %405 = vector.extract_strided_slice %402 {offsets = [0, 0], sizes = [2, 32], strides = [1, 1]} : vector<2x96xf32> to vector<2x32xf32>
    %406 = vector.extract_strided_slice %403 {offsets = [0, 0], sizes = [2, 32], strides = [1, 1]} : vector<2x96xf32> to vector<2x32xf32>
    %407 = arith.addf %405, %406 : vector<2x32xf32>
    %408 = arith.negf %407 : vector<2x32xf32>
    %409 = math.exp %408 : vector<2x32xf32>
    %cst_63 = arith.constant 1.000000e+00 : f32
    %410 = vector.broadcast %cst_63 : f32 to vector<2x32xf32>
    %411 = arith.addf %410, %409 : vector<2x32xf32>
    %412 = arith.divf %410, %411 : vector<2x32xf32>
    %413 = vector.extract_strided_slice %402 {offsets = [0, 32], sizes = [2, 32], strides = [1, 1]} : vector<2x96xf32> to vector<2x32xf32>
    %414 = vector.extract_strided_slice %403 {offsets = [0, 32], sizes = [2, 32], strides = [1, 1]} : vector<2x96xf32> to vector<2x32xf32>
    %415 = arith.addf %413, %414 : vector<2x32xf32>
    %416 = arith.negf %415 : vector<2x32xf32>
    %417 = math.exp %416 : vector<2x32xf32>
    %cst_64 = arith.constant 1.000000e+00 : f32
    %418 = vector.broadcast %cst_64 : f32 to vector<2x32xf32>
    %419 = arith.addf %418, %417 : vector<2x32xf32>
    %420 = arith.divf %418, %419 : vector<2x32xf32>
    %421 = vector.extract_strided_slice %402 {offsets = [0, 64], sizes = [2, 32], strides = [1, 1]} : vector<2x96xf32> to vector<2x32xf32>
    %422 = vector.extract_strided_slice %403 {offsets = [0, 64], sizes = [2, 32], strides = [1, 1]} : vector<2x96xf32> to vector<2x32xf32>
    %423 = arith.mulf %412, %422 : vector<2x32xf32>
    %424 = arith.addf %421, %423 : vector<2x32xf32>
    %425 = math.tanh %424 : vector<2x32xf32>
    %cst_65 = arith.constant 1.000000e+00 : f32
    %426 = vector.broadcast %cst_65 : f32 to vector<2x32xf32>
    %427 = arith.subf %426, %420 : vector<2x32xf32>
    %428 = arith.mulf %427, %425 : vector<2x32xf32>
    %429 = arith.mulf %420, %404 : vector<2x32xf32>
    %430 = arith.addf %428, %429 : vector<2x32xf32>
    %431 = vector.extract_strided_slice %28 {offsets = [2, 128], sizes = [2, 96], strides = [1, 1]} : vector<16x256xf32> to vector<2x96xf32>
    %432 = vector.extract_strided_slice %401 {offsets = [0, 128], sizes = [2, 96], strides = [1, 1]} : vector<2x256xf32> to vector<2x96xf32>
    %433 = vector.extract_strided_slice %399 {offsets = [0, 32], sizes = [2, 32], strides = [1, 1]} : vector<2x64xf32> to vector<2x32xf32>
    %434 = vector.extract_strided_slice %431 {offsets = [0, 0], sizes = [2, 32], strides = [1, 1]} : vector<2x96xf32> to vector<2x32xf32>
    %435 = vector.extract_strided_slice %432 {offsets = [0, 0], sizes = [2, 32], strides = [1, 1]} : vector<2x96xf32> to vector<2x32xf32>
    %436 = arith.addf %434, %435 : vector<2x32xf32>
    %437 = arith.negf %436 : vector<2x32xf32>
    %438 = math.exp %437 : vector<2x32xf32>
    %cst_66 = arith.constant 1.000000e+00 : f32
    %439 = vector.broadcast %cst_66 : f32 to vector<2x32xf32>
    %440 = arith.addf %439, %438 : vector<2x32xf32>
    %441 = arith.divf %439, %440 : vector<2x32xf32>
    %442 = vector.extract_strided_slice %431 {offsets = [0, 32], sizes = [2, 32], strides = [1, 1]} : vector<2x96xf32> to vector<2x32xf32>
    %443 = vector.extract_strided_slice %432 {offsets = [0, 32], sizes = [2, 32], strides = [1, 1]} : vector<2x96xf32> to vector<2x32xf32>
    %444 = arith.addf %442, %443 : vector<2x32xf32>
    %445 = arith.negf %444 : vector<2x32xf32>
    %446 = math.exp %445 : vector<2x32xf32>
    %cst_67 = arith.constant 1.000000e+00 : f32
    %447 = vector.broadcast %cst_67 : f32 to vector<2x32xf32>
    %448 = arith.addf %447, %446 : vector<2x32xf32>
    %449 = arith.divf %447, %448 : vector<2x32xf32>
    %450 = vector.extract_strided_slice %431 {offsets = [0, 64], sizes = [2, 32], strides = [1, 1]} : vector<2x96xf32> to vector<2x32xf32>
    %451 = vector.extract_strided_slice %432 {offsets = [0, 64], sizes = [2, 32], strides = [1, 1]} : vector<2x96xf32> to vector<2x32xf32>
    %452 = arith.mulf %441, %451 : vector<2x32xf32>
    %453 = arith.addf %450, %452 : vector<2x32xf32>
    %454 = math.tanh %453 : vector<2x32xf32>
    %cst_68 = arith.constant 1.000000e+00 : f32
    %455 = vector.broadcast %cst_68 : f32 to vector<2x32xf32>
    %456 = arith.subf %455, %449 : vector<2x32xf32>
    %457 = arith.mulf %456, %454 : vector<2x32xf32>
    %458 = arith.mulf %449, %433 : vector<2x32xf32>
    %459 = arith.addf %457, %458 : vector<2x32xf32>
    %460 = tpu.concatenate %430, %459 in 1 : vector<2x32xf32>, vector<2x32xf32> -> vector<2x64xf32>
    %cst_69 = arith.constant dense<0.000000e+00> : vector<2x256xf32>
    %461 = tpu.matmul %460, %29, %cst_69 {dimension_numbers = #tpu.dot_dimension_numbers<[1], [0], [0], [1], [0, 0, 1, 1], [], []>, precision = #tpu.contract_precision<fp32>} : vector<2x64xf32>, vector<64x256xf32>, vector<2x256xf32> -> vector<2x256xf32>
    %462 = arith.addf %461, %32 : vector<2x256xf32>
    %463 = vector.extract_strided_slice %28 {offsets = [14, 0], sizes = [2, 96], strides = [1, 1]} : vector<16x256xf32> to vector<2x96xf32>
    %464 = vector.extract_strided_slice %462 {offsets = [0, 0], sizes = [2, 96], strides = [1, 1]} : vector<2x256xf32> to vector<2x96xf32>
    %465 = vector.extract_strided_slice %460 {offsets = [0, 0], sizes = [2, 32], strides = [1, 1]} : vector<2x64xf32> to vector<2x32xf32>
    %466 = vector.extract_strided_slice %463 {offsets = [0, 0], sizes = [2, 32], strides = [1, 1]} : vector<2x96xf32> to vector<2x32xf32>
    %467 = vector.extract_strided_slice %464 {offsets = [0, 0], sizes = [2, 32], strides = [1, 1]} : vector<2x96xf32> to vector<2x32xf32>
    %468 = arith.addf %466, %467 : vector<2x32xf32>
    %469 = arith.negf %468 : vector<2x32xf32>
    %470 = math.exp %469 : vector<2x32xf32>
    %cst_70 = arith.constant 1.000000e+00 : f32
    %471 = vector.broadcast %cst_70 : f32 to vector<2x32xf32>
    %472 = arith.addf %471, %470 : vector<2x32xf32>
    %473 = arith.divf %471, %472 : vector<2x32xf32>
    %474 = vector.extract_strided_slice %463 {offsets = [0, 32], sizes = [2, 32], strides = [1, 1]} : vector<2x96xf32> to vector<2x32xf32>
    %475 = vector.extract_strided_slice %464 {offsets = [0, 32], sizes = [2, 32], strides = [1, 1]} : vector<2x96xf32> to vector<2x32xf32>
    %476 = arith.addf %474, %475 : vector<2x32xf32>
    %477 = arith.negf %476 : vector<2x32xf32>
    %478 = math.exp %477 : vector<2x32xf32>
    %cst_71 = arith.constant 1.000000e+00 : f32
    %479 = vector.broadcast %cst_71 : f32 to vector<2x32xf32>
    %480 = arith.addf %479, %478 : vector<2x32xf32>
    %481 = arith.divf %479, %480 : vector<2x32xf32>
    %482 = vector.extract_strided_slice %463 {offsets = [0, 64], sizes = [2, 32], strides = [1, 1]} : vector<2x96xf32> to vector<2x32xf32>
    %483 = vector.extract_strided_slice %464 {offsets = [0, 64], sizes = [2, 32], strides = [1, 1]} : vector<2x96xf32> to vector<2x32xf32>
    %484 = arith.mulf %473, %483 : vector<2x32xf32>
    %485 = arith.addf %482, %484 : vector<2x32xf32>
    %486 = math.tanh %485 : vector<2x32xf32>
    %cst_72 = arith.constant 1.000000e+00 : f32
    %487 = vector.broadcast %cst_72 : f32 to vector<2x32xf32>
    %488 = arith.subf %487, %481 : vector<2x32xf32>
    %489 = arith.mulf %488, %486 : vector<2x32xf32>
    %490 = arith.mulf %481, %465 : vector<2x32xf32>
    %491 = arith.addf %489, %490 : vector<2x32xf32>
    %492 = vector.extract_strided_slice %28 {offsets = [0, 128], sizes = [2, 96], strides = [1, 1]} : vector<16x256xf32> to vector<2x96xf32>
    %493 = vector.extract_strided_slice %462 {offsets = [0, 128], sizes = [2, 96], strides = [1, 1]} : vector<2x256xf32> to vector<2x96xf32>
    %494 = vector.extract_strided_slice %460 {offsets = [0, 32], sizes = [2, 32], strides = [1, 1]} : vector<2x64xf32> to vector<2x32xf32>
    %495 = vector.extract_strided_slice %492 {offsets = [0, 0], sizes = [2, 32], strides = [1, 1]} : vector<2x96xf32> to vector<2x32xf32>
    %496 = vector.extract_strided_slice %493 {offsets = [0, 0], sizes = [2, 32], strides = [1, 1]} : vector<2x96xf32> to vector<2x32xf32>
    %497 = arith.addf %495, %496 : vector<2x32xf32>
    %498 = arith.negf %497 : vector<2x32xf32>
    %499 = math.exp %498 : vector<2x32xf32>
    %cst_73 = arith.constant 1.000000e+00 : f32
    %500 = vector.broadcast %cst_73 : f32 to vector<2x32xf32>
    %501 = arith.addf %500, %499 : vector<2x32xf32>
    %502 = arith.divf %500, %501 : vector<2x32xf32>
    %503 = vector.extract_strided_slice %492 {offsets = [0, 32], sizes = [2, 32], strides = [1, 1]} : vector<2x96xf32> to vector<2x32xf32>
    %504 = vector.extract_strided_slice %493 {offsets = [0, 32], sizes = [2, 32], strides = [1, 1]} : vector<2x96xf32> to vector<2x32xf32>
    %505 = arith.addf %503, %504 : vector<2x32xf32>
    %506 = arith.negf %505 : vector<2x32xf32>
    %507 = math.exp %506 : vector<2x32xf32>
    %cst_74 = arith.constant 1.000000e+00 : f32
    %508 = vector.broadcast %cst_74 : f32 to vector<2x32xf32>
    %509 = arith.addf %508, %507 : vector<2x32xf32>
    %510 = arith.divf %508, %509 : vector<2x32xf32>
    %511 = vector.extract_strided_slice %492 {offsets = [0, 64], sizes = [2, 32], strides = [1, 1]} : vector<2x96xf32> to vector<2x32xf32>
    %512 = vector.extract_strided_slice %493 {offsets = [0, 64], sizes = [2, 32], strides = [1, 1]} : vector<2x96xf32> to vector<2x32xf32>
    %513 = arith.mulf %502, %512 : vector<2x32xf32>
    %514 = arith.addf %511, %513 : vector<2x32xf32>
    %515 = math.tanh %514 : vector<2x32xf32>
    %cst_75 = arith.constant 1.000000e+00 : f32
    %516 = vector.broadcast %cst_75 : f32 to vector<2x32xf32>
    %517 = arith.subf %516, %510 : vector<2x32xf32>
    %518 = arith.mulf %517, %515 : vector<2x32xf32>
    %519 = arith.mulf %510, %494 : vector<2x32xf32>
    %520 = arith.addf %518, %519 : vector<2x32xf32>
    %521 = tpu.concatenate %64, %125, %186, %247, %308, %369, %430, %491 in 0 : vector<2x32xf32>, vector<2x32xf32>, vector<2x32xf32>, vector<2x32xf32>, vector<2x32xf32>, vector<2x32xf32>, vector<2x32xf32>, vector<2x32xf32> -> vector<16x32xf32>
    %522 = tpu.concatenate %520, %459, %398, %337, %276, %215, %154, %93 in 0 : vector<2x32xf32>, vector<2x32xf32>, vector<2x32xf32>, vector<2x32xf32>, vector<2x32xf32>, vector<2x32xf32>, vector<2x32xf32>, vector<2x32xf32> -> vector<16x32xf32>
    %c0_76 = arith.constant 0 : index
    %c0_77 = arith.constant 0 : index
    %523 = vector.load %arg9[%c0_76, %c0_77] : memref<64x192xf32, #tpu.memory_space<vmem>>, vector<64x192xf32>
    %c0_78 = arith.constant 0 : index
    %c0_79 = arith.constant 0 : index
    %524 = vector.load %arg10[%c0_78, %c0_79] : memref<1x192xf32, #tpu.memory_space<vmem>>, vector<1x192xf32>
    %c0_80 = arith.constant 0 : index
    %c0_81 = arith.constant 0 : index
    %525 = vector.load %arg11[%c0_80, %c0_81] : memref<64x64xf32, #tpu.memory_space<vmem>>, vector<64x64xf32>
    %c0_82 = arith.constant 0 : index
    %c0_83 = arith.constant 0 : index
    %526 = vector.load %arg12[%c0_82, %c0_83] : memref<64x32xf32, #tpu.memory_space<vmem>>, vector<64x32xf32>
    %c0_84 = arith.constant 0 : index
    %c0_85 = arith.constant 0 : index
    %527 = vector.load %arg13[%c0_84, %c0_85] : memref<1x32xf32, #tpu.memory_space<vmem>>, vector<1x32xf32>
    %528 = vector.extract_strided_slice %523 {offsets = [0, 0], sizes = [32, 192], strides = [1, 1]} : vector<64x192xf32> to vector<32x192xf32>
    %cst_86 = arith.constant dense<0.000000e+00> : vector<16x192xf32>
    %529 = tpu.matmul %521, %528, %cst_86 {dimension_numbers = #tpu.dot_dimension_numbers<[1], [0], [0], [1], [0, 0, 1, 1], [], []>} : vector<16x32xf32>, vector<32x192xf32>, vector<16x192xf32> -> vector<16x192xf32>
    %530 = vector.extract_strided_slice %523 {offsets = [32, 0], sizes = [32, 192], strides = [1, 1]} : vector<64x192xf32> to vector<32x192xf32>
    %cst_87 = arith.constant dense<0.000000e+00> : vector<16x192xf32>
    %531 = tpu.matmul %522, %530, %cst_87 {dimension_numbers = #tpu.dot_dimension_numbers<[1], [0], [0], [1], [0, 0, 1, 1], [], []>} : vector<16x32xf32>, vector<32x192xf32>, vector<16x192xf32> -> vector<16x192xf32>
    %532 = arith.addf %529, %531 : vector<16x192xf32>
    %533 = vector.broadcast %524 : vector<1x192xf32> to vector<16x192xf32>
    %534 = arith.addf %532, %533 : vector<16x192xf32>
    %535 = tpu.iota {dimensions = array<i32: 0>} : vector<16x16xi32>
    %536 = tpu.iota {dimensions = array<i32: 1>} : vector<16x16xi32>
    %537 = arith.xori %535, %536 : vector<16x16xi32>
    %c1_i32 = arith.constant 1 : i32
    %538 = vector.broadcast %c1_i32 : i32 to vector<16x16xi32>
    %539 = arith.andi %537, %538 : vector<16x16xi32>
    %c0_i32 = arith.constant 0 : i32
    %540 = vector.broadcast %c0_i32 : i32 to vector<16x16xi32>
    %541 = arith.cmpi eq, %539, %540 : vector<16x16xi32>
    %cst_88 = arith.constant 0.000000e+00 : f32
    %cst_89 = arith.constant -1.000000e+30 : f32
    %542 = vector.broadcast %cst_88 : f32 to vector<16x16xf32>
    %543 = vector.broadcast %cst_89 : f32 to vector<16x16xf32>
    %544 = arith.select %541, %542, %543 : vector<16x16xi1>, vector<16x16xf32>
    %cst_90 = arith.constant 0.000000e+00 : f32
    %545 = vector.broadcast %cst_90 : f32 to vector<16x64xf32>
    %546 = vector.extract_strided_slice %534 {offsets = [0, 0], sizes = [16, 32], strides = [1, 1]} : vector<16x192xf32> to vector<16x32xf32>
    %547 = vector.extract_strided_slice %534 {offsets = [0, 64], sizes = [16, 32], strides = [1, 1]} : vector<16x192xf32> to vector<16x32xf32>
    %548 = vector.extract_strided_slice %534 {offsets = [0, 128], sizes = [16, 32], strides = [1, 1]} : vector<16x192xf32> to vector<16x32xf32>
    %cst_91 = arith.constant dense<0.000000e+00> : vector<16x16xf32>
    %549 = tpu.matmul %546, %547, %cst_91 {dimension_numbers = #tpu.dot_dimension_numbers<[1], [1], [0], [0], [0, 0, 1, 0], [], []>} : vector<16x32xf32>, vector<16x32xf32>, vector<16x16xf32> -> vector<16x16xf32>
    %cst_92 = arith.constant 0.176776692 : f32
    %550 = vector.broadcast %cst_92 : f32 to vector<16x16xf32>
    %551 = arith.mulf %549, %550 : vector<16x16xf32>
    %552 = arith.addf %551, %544 : vector<16x16xf32>
    %cst_93 = arith.constant dense<0xFF800000> : vector<16xf32>
    %553 = vector.multi_reduction <maximumf>, %552, %cst_93 [1] : vector<16x16xf32> to vector<16xf32>
    %554 = vector.shape_cast %553 : vector<16xf32> to vector<16x1xf32>
    %555 = vector.broadcast %554 : vector<16x1xf32> to vector<16x16xf32>
    %556 = arith.subf %552, %555 : vector<16x16xf32>
    %557 = math.exp %556 : vector<16x16xf32>
    %cst_94 = arith.constant dense<0.000000e+00> : vector<16xf32>
    %558 = vector.multi_reduction <add>, %557, %cst_94 [1] : vector<16x16xf32> to vector<16xf32>
    %559 = vector.shape_cast %558 : vector<16xf32> to vector<16x1xf32>
    %560 = tpu.reciprocal %559 {approx = true} : vector<16x1xf32> -> vector<16x1xf32>
    %561 = vector.broadcast %560 : vector<16x1xf32> to vector<16x16xf32>
    %562 = arith.mulf %557, %561 : vector<16x16xf32>
    %cst_95 = arith.constant dense<0.000000e+00> : vector<16x32xf32>
    %563 = tpu.matmul %562, %548, %cst_95 {dimension_numbers = #tpu.dot_dimension_numbers<[1], [0], [0], [1], [0, 0, 1, 1], [], []>} : vector<16x16xf32>, vector<16x32xf32>, vector<16x32xf32> -> vector<16x32xf32>
    %564 = vector.extract_strided_slice %525 {offsets = [0, 0], sizes = [32, 64], strides = [1, 1]} : vector<64x64xf32> to vector<32x64xf32>
    %cst_96 = arith.constant dense<0.000000e+00> : vector<16x64xf32>
    %565 = tpu.matmul %563, %564, %cst_96 {dimension_numbers = #tpu.dot_dimension_numbers<[1], [0], [0], [1], [0, 0, 1, 1], [], []>} : vector<16x32xf32>, vector<32x64xf32>, vector<16x64xf32> -> vector<16x64xf32>
    %566 = arith.addf %545, %565 : vector<16x64xf32>
    %567 = vector.extract_strided_slice %534 {offsets = [0, 32], sizes = [16, 32], strides = [1, 1]} : vector<16x192xf32> to vector<16x32xf32>
    %568 = vector.extract_strided_slice %534 {offsets = [0, 96], sizes = [16, 32], strides = [1, 1]} : vector<16x192xf32> to vector<16x32xf32>
    %569 = vector.extract_strided_slice %534 {offsets = [0, 160], sizes = [16, 32], strides = [1, 1]} : vector<16x192xf32> to vector<16x32xf32>
    %cst_97 = arith.constant dense<0.000000e+00> : vector<16x16xf32>
    %570 = tpu.matmul %567, %568, %cst_97 {dimension_numbers = #tpu.dot_dimension_numbers<[1], [1], [0], [0], [0, 0, 1, 0], [], []>} : vector<16x32xf32>, vector<16x32xf32>, vector<16x16xf32> -> vector<16x16xf32>
    %cst_98 = arith.constant 0.176776692 : f32
    %571 = vector.broadcast %cst_98 : f32 to vector<16x16xf32>
    %572 = arith.mulf %570, %571 : vector<16x16xf32>
    %573 = arith.addf %572, %544 : vector<16x16xf32>
    %cst_99 = arith.constant dense<0xFF800000> : vector<16xf32>
    %574 = vector.multi_reduction <maximumf>, %573, %cst_99 [1] : vector<16x16xf32> to vector<16xf32>
    %575 = vector.shape_cast %574 : vector<16xf32> to vector<16x1xf32>
    %576 = vector.broadcast %575 : vector<16x1xf32> to vector<16x16xf32>
    %577 = arith.subf %573, %576 : vector<16x16xf32>
    %578 = math.exp %577 : vector<16x16xf32>
    %cst_100 = arith.constant dense<0.000000e+00> : vector<16xf32>
    %579 = vector.multi_reduction <add>, %578, %cst_100 [1] : vector<16x16xf32> to vector<16xf32>
    %580 = vector.shape_cast %579 : vector<16xf32> to vector<16x1xf32>
    %581 = tpu.reciprocal %580 {approx = true} : vector<16x1xf32> -> vector<16x1xf32>
    %582 = vector.broadcast %581 : vector<16x1xf32> to vector<16x16xf32>
    %583 = arith.mulf %578, %582 : vector<16x16xf32>
    %cst_101 = arith.constant dense<0.000000e+00> : vector<16x32xf32>
    %584 = tpu.matmul %583, %569, %cst_101 {dimension_numbers = #tpu.dot_dimension_numbers<[1], [0], [0], [1], [0, 0, 1, 1], [], []>} : vector<16x16xf32>, vector<16x32xf32>, vector<16x32xf32> -> vector<16x32xf32>
    %585 = vector.extract_strided_slice %525 {offsets = [32, 0], sizes = [32, 64], strides = [1, 1]} : vector<64x64xf32> to vector<32x64xf32>
    %cst_102 = arith.constant dense<0.000000e+00> : vector<16x64xf32>
    %586 = tpu.matmul %584, %585, %cst_102 {dimension_numbers = #tpu.dot_dimension_numbers<[1], [0], [0], [1], [0, 0, 1, 1], [], []>} : vector<16x32xf32>, vector<32x64xf32>, vector<16x64xf32> -> vector<16x64xf32>
    %587 = arith.addf %566, %586 : vector<16x64xf32>
    %cst_103 = arith.constant dense<0.000000e+00> : vector<16x32xf32>
    %588 = tpu.matmul %587, %526, %cst_103 {dimension_numbers = #tpu.dot_dimension_numbers<[1], [0], [0], [1], [0, 0, 1, 1], [], []>} : vector<16x64xf32>, vector<64x32xf32>, vector<16x32xf32> -> vector<16x32xf32>
    %589 = vector.broadcast %527 : vector<1x32xf32> to vector<16x32xf32>
    %590 = arith.addf %588, %589 : vector<16x32xf32>
    %c0_104 = arith.constant 0 : index
    %c0_105 = arith.constant 0 : index
    %c0_106 = arith.constant 0 : index
    %591 = vector.load %arg14[%c0_104, %c0_105, %c0_106] : memref<3x32x32xf32, #tpu.memory_space<vmem>>, vector<1x32x32xf32>
    %592 = vector.shape_cast %591 : vector<1x32x32xf32> to vector<32x32xf32>
    %c1 = arith.constant 1 : index
    %c0_107 = arith.constant 0 : index
    %c0_108 = arith.constant 0 : index
    %593 = vector.load %arg14[%c1, %c0_107, %c0_108] : memref<3x32x32xf32, #tpu.memory_space<vmem>>, vector<1x32x32xf32>
    %594 = vector.shape_cast %593 : vector<1x32x32xf32> to vector<32x32xf32>
    %c2 = arith.constant 2 : index
    %c0_109 = arith.constant 0 : index
    %c0_110 = arith.constant 0 : index
    %595 = vector.load %arg14[%c2, %c0_109, %c0_110] : memref<3x32x32xf32, #tpu.memory_space<vmem>>, vector<1x32x32xf32>
    %596 = vector.shape_cast %595 : vector<1x32x32xf32> to vector<32x32xf32>
    %cst_111 = arith.constant 0.000000e+00 : f32
    %597 = vector.broadcast %cst_111 : f32 to vector<2x32xf32>
    %598 = vector.extract_strided_slice %590 {offsets = [0, 0], sizes = [14, 32], strides = [1, 1]} : vector<16x32xf32> to vector<14x32xf32>
    %599 = tpu.concatenate %597, %598 in 0 : vector<2x32xf32>, vector<14x32xf32> -> vector<16x32xf32>
    %600 = vector.extract_strided_slice %590 {offsets = [2, 0], sizes = [14, 32], strides = [1, 1]} : vector<16x32xf32> to vector<14x32xf32>
    %601 = tpu.concatenate %600, %597 in 0 : vector<14x32xf32>, vector<2x32xf32> -> vector<16x32xf32>
    %cst_112 = arith.constant dense<0.000000e+00> : vector<16x32xf32>
    %602 = tpu.matmul %599, %592, %cst_112 {dimension_numbers = #tpu.dot_dimension_numbers<[1], [0], [0], [1], [0, 0, 1, 1], [], []>} : vector<16x32xf32>, vector<32x32xf32>, vector<16x32xf32> -> vector<16x32xf32>
    %cst_113 = arith.constant dense<0.000000e+00> : vector<16x32xf32>
    %603 = tpu.matmul %590, %594, %cst_113 {dimension_numbers = #tpu.dot_dimension_numbers<[1], [0], [0], [1], [0, 0, 1, 1], [], []>} : vector<16x32xf32>, vector<32x32xf32>, vector<16x32xf32> -> vector<16x32xf32>
    %604 = arith.addf %602, %603 : vector<16x32xf32>
    %cst_114 = arith.constant dense<0.000000e+00> : vector<16x32xf32>
    %605 = tpu.matmul %601, %596, %cst_114 {dimension_numbers = #tpu.dot_dimension_numbers<[1], [0], [0], [1], [0, 0, 1, 1], [], []>} : vector<16x32xf32>, vector<32x32xf32>, vector<16x32xf32> -> vector<16x32xf32>
    %606 = arith.addf %604, %605 : vector<16x32xf32>
    %cst_115 = arith.constant 0.000000e+00 : f32
    %607 = vector.broadcast %cst_115 : f32 to vector<16x32xf32>
    %608 = arith.maximumf %606, %607 : vector<16x32xf32>
    %609 = vector.extract_strided_slice %608 {offsets = [0, 0], sizes = [8, 32], strides = [1, 1]} : vector<16x32xf32> to vector<8x32xf32>
    %610 = vector.extract_strided_slice %608 {offsets = [8, 0], sizes = [8, 32], strides = [1, 1]} : vector<16x32xf32> to vector<8x32xf32>
    %611 = arith.maximumf %609, %610 : vector<8x32xf32>
    %612 = vector.extract_strided_slice %611 {offsets = [0, 0], sizes = [4, 32], strides = [1, 1]} : vector<8x32xf32> to vector<4x32xf32>
    %613 = vector.extract_strided_slice %611 {offsets = [4, 0], sizes = [4, 32], strides = [1, 1]} : vector<8x32xf32> to vector<4x32xf32>
    %614 = arith.maximumf %612, %613 : vector<4x32xf32>
    %615 = vector.extract_strided_slice %614 {offsets = [0, 0], sizes = [2, 32], strides = [1, 1]} : vector<4x32xf32> to vector<2x32xf32>
    %616 = vector.extract_strided_slice %614 {offsets = [2, 0], sizes = [2, 32], strides = [1, 1]} : vector<4x32xf32> to vector<2x32xf32>
    %617 = arith.maximumf %615, %616 : vector<2x32xf32>
    %c0_116 = arith.constant 0 : index
    %c0_117 = arith.constant 0 : index
    %618 = vector.load %arg15[%c0_116, %c0_117] : memref<2x32xf32, #tpu.memory_space<vmem>>, vector<2x32xf32>
    tpu.vector_store %arg15[%c0_116, %c0_117], %617 {strides = array<i32>} : memref<2x32xf32, #tpu.memory_space<vmem>>, vector<2x32xf32>,
    return
  }
}

</mosaic_0001>

<bundles_post_ra>
// kernel: att_cnn_encoder_forward.1
= control target key start
LH: loop header
LB: loop body
LE: loop exit
PB: predicated region body
PF: predicated region fallthrough
CT: control target
= control target key end

     0   :  { %20 = vsyncpa [#allocation3], 0  ;;  %s12244_s0 = inlined_call_operand.vmem [shape: s32[16,1], index: 0, kind: input, shape index: {}]   ;;  %s12245_s1 = inlined_call_operand.vmem [shape: s32[16,1], index: 1, kind: input, shape index: {}]   ;;  %s12246_s2 = inlined_call_operand.vmem [shape: s32[16,1], index: 2, kind: input, shape index: {}]   ;;  %s12247_s3 = inlined_call_operand.hbm [shape: f32[22,256], index: 3, kind: input, shape index: {}]   ;;  %s12248_s4 = inlined_call_operand.hbm [shape: f32[16,256], index: 4, kind: input, shape index: {}]   ;;  %s12249_s5 = inlined_call_operand.hbm [shape: f32[16,256], index: 5, kind: input, shape index: {}]   ;;  %s12250_s6 = inlined_call_operand.vmem [shape: f32[1,256], index: 6, kind: input, shape index: {}]   ;;  %s12251_s7 = inlined_call_operand.hbm [shape: f32[1,256], index: 7, kind: input, shape index: {}]   ;;  %s12252_s8 = inlined_call_operand.vmem [shape: f32[64,256], index: 8, kind: input, shape index: {}]   ;;  %s12253_s9 = inlined_call_operand.vmem [shape: f32[64,192], index: 9, kind: input, shape index: {}]   ;;  %s12254_s10 = inlined_call_operand.hbm [shape: f32[1,192], index: 10, kind: input, shape index: {}]   ;;  %s12255_s11 = inlined_call_operand.hbm [shape: f32[64,64], index: 11, kind: input, shape index: {}]   ;;  %s12256_s12 = inlined_call_operand.vmem [shape: f32[64,32], index: 12, kind: input, shape index: {}]   ;;  %s12257_s13 = inlined_call_operand.hbm [shape: f32[1,32], index: 13, kind: input, shape index: {}]   ;;  %s12258_s14 = inlined_call_operand.hbm [shape: f32[3,32,32], index: 14, kind: input, shape index: {}]   ;;  %s12259_s15 = inlined_call_operand.hbm [shape: f32[2,32], index: 15, kind: output, shape index: {}]  }
   0x1   :  { %21 = vsyncpa [#allocation6], 0 }
   0x2   :  { %22 = vsyncpa [#allocation9], 0 }
   0x3   :  { %23 = vsyncpa [#allocation12], 0 }
   0x4   :  { %24 = vsyncpa [#allocation15], 0 }
   0x5   :  { %25 = vsyncpa [#allocation4], 0  ;;  %s10558_s18 = smov [#allocation5]   ;;  %s10559_s20 = smov [#allocation8]  }
   0x6   :  { %s49_s19 = sshll.u32 %s10558_s18, 4  ;;  %s76_s21 = sshll.u32 %s10559_s20, 4  ;;  %s50_s19 = int_to_ptr.vmem [resolvable:$true] %s49_s19  ;;  %s77_s21 = int_to_ptr.vmem [resolvable:$true] %s76_s21 }
   0x7   :  { %s10348_s24 = scalar_lea.hbm %s12248_s4, 512 }
   0x8   :  { %p10349_p0 = scmp.ne.s32.totalorder %s12248_s4, %s10348_s24  ;;  %p10352_p1 = scmp.lt.u32.totalorder %s10348_s24, %s12248_s4 }
   0xa   :  { %p10354_p2 = pnand %p10352_p1, %p10349_p0 }
   0xc   :  { %10357 = shalt.err (!%p10354_p2)
}
   0xd   :  { %s10358_s29 = scalar_lea.vmem %s50_s19, 512  ;;  %p10363_p4 = scmp.lt.s32.totalorder %s50_s19, %s50_s19 }
   0xe   :  { %p10359_p3 = scmp.ne.s32.totalorder %s50_s19, %s10358_s29  ;;  %p10364_p5 = scmp.lt.s32.totalorder %s10358_s29, %s10358_s29 }
  0x10   :  { %p10365_p6 = por %p10364_p5, %p10363_p4 }
  0x12   :  { %p10366_p7 = pnand %p10365_p6, %p10359_p3 }
  0x14   :  { %10369 = shalt.err (!%p10366_p7)
}
  0x15   :  { %s12260_s30 = smov 256   ;;  %s10561_s16 = smov 16  }
  0x16   :  { %55 = dma.hbm_to_vmem [thread:$0]  %s12248_s4, 512, %s50_s19, [#allocation6], %s12260_s30, %s12260_s30, %s10561_s16  }
  0x17   :  { %s10370_s23 = scalar_lea.hbm %s12251_s7, 32 }
  0x18   :  { %p10371_p8 = scmp.ne.s32.totalorder %s12251_s7, %s10370_s23  ;;  %p10374_p9 = scmp.lt.u32.totalorder %s10370_s23, %s12251_s7 }
  0x1a   :  { %p10376_p10 = pnand %p10374_p9, %p10371_p8 }
  0x1c   :  { %10379 = shalt.err (!%p10376_p10)
}
  0x1d   :  { %s10380_s28 = scalar_lea.vmem %s77_s21, 32  ;;  %p10385_p12 = scmp.lt.s32.totalorder %s77_s21, %s77_s21 }
  0x1e   :  { %p10381_p11 = scmp.ne.s32.totalorder %s77_s21, %s10380_s28  ;;  %p10386_p13 = scmp.lt.s32.totalorder %s10380_s28, %s10380_s28 }
  0x20   :  { %p10387_p0 = por %p10386_p13, %p10385_p12 }
  0x22   :  { %p10388_p1 = pnand %p10387_p0, %p10381_p11 }
  0x24   :  { %10391 = shalt.err (!%p10388_p1)
}
  0x25   :  { %79 = dma.hbm_to_vmem [thread:$0]  %s12251_s7, 32, %s77_s21, [#allocation9]  }
  0x26   :  { %s10562_s29 = smov [#allocation11]   ;;  %s10392_s22 = scalar_lea.hbm %s12255_s11, 1024 }
  0x27   :  { %s99_s17 = sshll.u32 %s10562_s29, 4  ;;  %p10393_p2 = scmp.ne.s32.totalorder %s12255_s11, %s10392_s22  ;;  %s100_s17 = int_to_ptr.vmem [resolvable:$true] %s99_s17 }
  0x28   :  { %p10396_p3 = scmp.lt.u32.totalorder %s10392_s22, %s12255_s11 }
  0x2a   :  { %p10398_p4 = pnand %p10396_p3, %p10393_p2 }
  0x2c   :  { %10401 = shalt.err (!%p10398_p4)
}
  0x2d   :  { %s10402_s27 = scalar_lea.vmem %s100_s17, 1024  ;;  %p10407_p6 = scmp.lt.s32.totalorder %s100_s17, %s100_s17 }
  0x2e   :  { %p10403_p5 = scmp.ne.s32.totalorder %s100_s17, %s10402_s27  ;;  %p10408_p7 = scmp.lt.s32.totalorder %s10402_s27, %s10402_s27 }
  0x30   :  { %p10409_p8 = por %p10408_p7, %p10407_p6 }
  0x32   :  { %p10410_p9 = pnand %p10409_p8, %p10403_p5 }
  0x34   :  { %10413 = shalt.err (!%p10410_p9)
}
  0x35   :  { %s10563_s7 = smov 128   ;;  %s10564_s21 = smov 8  }
  0x36   :  { %105 = dma.hbm_to_vmem [thread:$0]  %s12255_s11, 1024, %s100_s17, [#allocation12], %s10563_s7, %s10563_s7, %s10564_s21  }
  0x37   :  { %s10565_s19 = smov [#allocation2]   ;;  %s10566_s18 = smov [#allocation7]  }
  0x38   :  { %s37_s29 = sshll.u32 %s10565_s19, 4  ;;  %s61_s20 = sshll.u32 %s10566_s18, 4  ;;  %s38_s29 = int_to_ptr.vmem [resolvable:$true] %s37_s29  ;;  %s62_s20 = int_to_ptr.vmem [resolvable:$true] %s61_s20 }
  0x39   :  { %s10414_s24 = scalar_lea.hbm %s12247_s3, 768 }
  0x3a   :  { %p10415_p10 = scmp.ne.s32.totalorder %s12247_s3, %s10414_s24  ;;  %p10418_p11 = scmp.lt.u32.totalorder %s10414_s24, %s12247_s3 }
  0x3c   :  { %p10420_p12 = pnand %p10418_p11, %p10415_p10 }
  0x3e   :  { %10423 = shalt.err (!%p10420_p12)
}
  0x3f   :  { %s10424_s11 = scalar_lea.vmem %s38_s29, 768  ;;  %p10429_p0 = scmp.lt.s32.totalorder %s38_s29, %s38_s29 }
  0x40   :  { %p10425_p13 = scmp.ne.s32.totalorder %s38_s29, %s10424_s11  ;;  %p10430_p1 = scmp.lt.s32.totalorder %s10424_s11, %s10424_s11 }
  0x42   :  { %p10431_p2 = por %p10430_p1, %p10429_p0 }
  0x44   :  { %p10432_p3 = pnand %p10431_p2, %p10425_p13 }
  0x46   :  { %10435 = shalt.err (!%p10432_p3)
}
  0x47   :  { %s12294_s17 = smov 256   ;;  %s10436_s18 = scalar_lea.hbm %s12249_s5, 512 }
  0x48   :  { %43 = dma.hbm_to_vmem [thread:$0]  %s12247_s3, 768, %s38_s29, [#allocation3], %s12294_s17, %s12294_s17, %s10561_s16  }
  0x49   :  { %p10437_p4 = scmp.ne.s32.totalorder %s12249_s5, %s10436_s18  ;;  %p10440_p5 = scmp.lt.u32.totalorder %s10436_s18, %s12249_s5 }
  0x4b   :  { %p10442_p6 = pnand %p10440_p5, %p10437_p4 }
  0x4d   :  { %10445 = shalt.err (!%p10442_p6)
}
  0x4e   :  { %s10446_s26 = scalar_lea.vmem %s62_s20, 512  ;;  %p10451_p8 = scmp.lt.s32.totalorder %s62_s20, %s62_s20 }
  0x4f   :  { %p10447_p7 = scmp.ne.s32.totalorder %s62_s20, %s10446_s26  ;;  %p10452_p9 = scmp.lt.s32.totalorder %s10446_s26, %s10446_s26 }
  0x51   :  { %p10453_p10 = por %p10452_p9, %p10451_p8 }
  0x53   :  { %p10454_p11 = pnand %p10453_p10, %p10447_p7 }
  0x55   :  { %10457 = shalt.err (!%p10454_p11)
}
  0x56   :  { %67 = dma.hbm_to_vmem [thread:$0]  %s12249_s5, 512, %s62_s20, [#allocation6], %s12294_s17, %s12294_s17, %s10561_s16  }
  0x57   :  { %s10567_s27 = smov [#allocation10]   ;;  %s10568_s28 = smov [#allocation13]  }
  0x58   :  { %s90_s11 = sshll.u32 %s10567_s27, 4  ;;  %s114_s4 = sshll.u32 %s10568_s28, 4  ;;  %s91_s11 = int_to_ptr.vmem [resolvable:$true] %s90_s11  ;;  %s115_s4 = int_to_ptr.vmem [resolvable:$true] %s114_s4 }
  0x59   :  { %s10458_s18 = scalar_lea.hbm %s12254_s10, 32 }
  0x5a   :  { %p10459_p12 = scmp.ne.s32.totalorder %s12254_s10, %s10458_s18  ;;  %p10462_p13 = scmp.lt.u32.totalorder %s10458_s18, %s12254_s10 }
  0x5c   :  { %p10464_p0 = pnand %p10462_p13, %p10459_p12 }
  0x5e   :  { %10467 = shalt.err (!%p10464_p0)
}
  0x5f   :  { %s10468_s5 = scalar_lea.vmem %s91_s11, 32  ;;  %p10473_p2 = scmp.lt.s32.totalorder %s91_s11, %s91_s11 }
  0x60   :  { %p10469_p1 = scmp.ne.s32.totalorder %s91_s11, %s10468_s5  ;;  %p10474_p3 = scmp.lt.s32.totalorder %s10468_s5, %s10468_s5 }
  0x62   :  { %p10475_p4 = por %p10474_p3, %p10473_p2 }
  0x64   :  { %p10476_p5 = pnand %p10475_p4, %p10469_p1 }
  0x66   :  { %10479 = shalt.err (!%p10476_p5)
}
  0x67   :  { %93 = dma.hbm_to_vmem [thread:$0]  %s12254_s10, 32, %s91_s11, [#allocation9]  }
  0x68   :  { %s10480_s3 = scalar_lea.hbm %s12257_s13, 16 }
  0x69   :  { %p10481_p6 = scmp.ne.s32.totalorder %s12257_s13, %s10480_s3  ;;  %p10484_p7 = scmp.lt.u32.totalorder %s10480_s3, %s12257_s13 }
  0x6b   :  { %p10486_p8 = pnand %p10484_p7, %p10481_p6 }
  0x6d   :  { %10489 = shalt.err (!%p10486_p8)
}
  0x6e   :  { %s10490_s30 = scalar_lea.vmem %s115_s4, 16  ;;  %s10494_s18 = scalar_lea.vmem %s115_s4, 32 }
  0x6f   :  { %p10491_p9 = scmp.ne.s32.totalorder %s115_s4, %s10490_s30  ;;  %p10495_p10 = scmp.lt.s32.totalorder %s115_s4, %s115_s4 }
  0x70   :  { %p10496_p11 = scmp.lt.s32.totalorder %s10494_s18, %s10490_s30 }
  0x72   :  { %p10497_p12 = por %p10496_p11, %p10495_p10 }
  0x74   :  { %p10498_p13 = pnand %p10497_p12, %p10491_p9 }
  0x76   :  { %10501 = shalt.err (!%p10498_p13)
}
  0x77   :  { %117 = dma.hbm_to_vmem [thread:$0]  %s12257_s13, 16, %s115_s4, [#allocation12]  }
  0x78   :  { %s10569_s22 = smov [#allocation14]   ;;  %s10502_s5 = scalar_lea.hbm %s12258_s14, 1536 }
  0x79   :  { %s123_s23 = sshll.u32 %s10569_s22, 4  ;;  %p10503_p0 = scmp.ne.s32.totalorder %s12258_s14, %s10502_s5  ;;  %s124_s23 = int_to_ptr.vmem [resolvable:$true] %s123_s23 }
  0x7a   :  { %p10506_p1 = scmp.lt.u32.totalorder %s10502_s5, %s12258_s14 }
  0x7c   :  { %p10508_p2 = pnand %p10506_p1, %p10503_p0 }
  0x7e   :  { %10511 = shalt.err (!%p10508_p2)
}
  0x7f   :  { %s10512_s3 = scalar_lea.vmem %s124_s23, 1536  ;;  %p10517_p4 = scmp.lt.s32.totalorder %s124_s23, %s124_s23 }
  0x80   :  { %p10513_p3 = scmp.ne.s32.totalorder %s124_s23, %s10512_s3  ;;  %p10518_p5 = scmp.lt.s32.totalorder %s10512_s3, %s10512_s3 }
  0x82   :  { %p10519_p6 = por %p10518_p5, %p10517_p4 }
  0x84   :  { %p10520_p7 = pnand %p10519_p6, %p10513_p3 }
  0x86   :  { %10523 = shalt.err (!%p10520_p7)
}
  0x87   :  { %129 = dma.hbm_to_vmem [thread:$0]  %s12258_s14, 1536, %s124_s23, [#allocation15], %s10563_s7, %s10563_s7, %s10564_s21  }
  0x88   :  { %10546 = dma.done.wait [#allocation3], 768  }
  0x89   :  { %10547 = vsyncadd [#allocation3], 4294966528 }
  0x8a   :  { %10548 = dma.done.wait [#allocation6], 1024  }
  0x8b   :  { %10549 = vsyncadd [#allocation6], 4294966272 }
  0x8c   :  { %10550 = dma.done.wait [#allocation9], 64  }
  0x8d   :  { %10551 = vsyncadd [#allocation9], 4294967232 }
  0x8e   :  { %10552 = dma.done.wait [#allocation12], 1040  }
  0x8f   :  { %10553 = vsyncadd [#allocation12], 4294966256 }
  0x90   :  { %10554 = dma.done.wait [#allocation15], 1536  }
  0x91   :  { %10555 = vsyncadd [#allocation15], 4294965760  ;;  %v10570_v0 = vmov 0   ;;  %v12279_v1 = vmov 0.0   ;;  %v176_v2 = vld [vmem:[%s12245_s1] sm:$0xff]  ;;  %v177_v3 = vld [vmem:[%s12245_s1 + $0x8] sm:$0xff]  ;;  %v12262_v56 = vlaneseq }
  0x92   :  { %10219 = vset.pattern.permute.xlu0 %v10570_v0  ;;  %10220 = vset.pattern.permute.xlu1 %v10570_v0  ;;  %v156_v4 = vld [vmem:[%s12244_s0] sm:$0xff]  ;;  %v191_v5 = vld [vmem:[#allocation5 + $0x8] sm:$0xff]  ;;  %v193_v6 = vld [vmem:[#allocation5 + $0x18] sm:$0xff]  ;;  %vm194_vm0 = vcmask 130048   ;;  %vm741_vm3 = vcmask 179200   ;;  %vm748_vm5 = vcmask 1045504  }
  0x93   :  { %376 = vmatprep.mubr.f32.mxu0 %v12279_v1  ;;  %269 = vmatprep.mubr.f32.mxu1 %v12279_v1  ;;  %v190_v7 = vld [vmem:[#allocation5] sm:$0xff]  ;;  %v157_v8 = vld [vmem:[%s12244_s0 + $0x8] sm:$0xff]  ;;  %v201_v9 = vand.u32 4294901760, %v191_v5  ;;  %v205_v10 = vand.u32 4294901760, %v193_v6  ;;  %v192_v11 = vld [vmem:[#allocation5 + $0x10] sm:$0xff]  ;;  %v10830_v59 = vand.u32 127, %v12262_v56 }
  0x94   :  { %179 = vperm.xlu0 %10219, %v176_v2   ;;  %159 = vperm.xlu1 %10220, %v156_v4   ;;  %v203_v12 = vand.u32 4294901760, %v190_v7  ;;  %v207_v13 = vand.u32 4294901760, %v192_v11  ;;  %v1321_v18 = vld [vmem:[%s12246_s2] sm:$0xff]  ;;  %v1906_v21 = vld [vmem:[%s12252_s8 + $0x8] sm:$0xff]  ;;  %v1908_v22 = vld [vmem:[%s12252_s8 + $0x18] sm:$0xff]  ;;  %vm2645_vm9 = vcmask 261120  }
  0x95   :  { %v293_v14 = vsub.f32 %v191_v5, %v201_v9  ;;  %v305_v15 = vsub.f32 %v193_v6, %v205_v10  ;;  %v10784_v17 = vpack.c.bf16 %v205_v10, %v201_v9  ;;  %v1322_v23 = vld [vmem:[%s12246_s2 + $0x8] sm:$0xff]  ;;  %v1937_v29 = vand.u32 4294901760, %v1906_v21  ;;  %v1905_v57 = vld [vmem:[%s12252_s8] sm:$0xff]  ;;  %v1907_v58 = vld [vmem:[%s12252_s8 + $0x10] sm:$0xff]  ;;  %12295 = vst [vmem:[#allocation23_spill] sm:$0xff] %v10830_v59  ;;  %s10574_s20 = smov 32  }
  0x96   :  { %v10782_v16 = vsub.f32 %v190_v7, %v203_v12  ;;  %v10789_v19 = vsub.f32 %v192_v11, %v207_v13  ;;  %v10791_v20 = vpack.c.bf16 %v207_v13, %v203_v12  ;;  %v1941_v30 = vand.u32 4294901760, %v1908_v22  ;;  %v1910_v60 = vld [vmem:[%s12252_s8 + $0x28] sm:$0xff]  ;;  %v1912_v61 = vld [vmem:[%s12252_s8 + $0x38] sm:$0xff]  ;;  %v1909_v0 = vld [vmem:[%s12252_s8 + $0x20] sm:$0xff] }
  0x97   :  { %v294_v24 = vand.u32 4294901760, %v293_v14  ;;  %v306_v25 = vand.u32 4294901760, %v305_v15  ;;  %9095 = vmatprep.subr.bf16.mxu1 %v10784_v17  ;;  %v9102_v41 = vpack.c.bf16 %v305_v15, %v293_v14  ;;  %v2030_v43 = vsub.f32 %v1906_v21, %v1937_v29  ;;  %v1911_v2 = vld [vmem:[%s12252_s8 + $0x30] sm:$0xff]  ;;  %v1914_v6 = vld [vmem:[%s12252_s8 + $0x48] sm:$0xff]  ;;  %v1916_v7 = vld [vmem:[%s12252_s8 + $0x58] sm:$0xff] }
  0x98   :  { %182 = vperm.xlu0 %10219, %v177_v3   ;;  %162 = vperm.xlu1 %10220, %v157_v8   ;;  %v300_v26 = vand.u32 4294901760, %v10782_v16  ;;  %v312_v27 = vand.u32 4294901760, %v10789_v19  ;;  %v9104_v28 = vpack.c.bf16 %v10789_v19, %v10782_v16  ;;  %v10810_v35 = vpack.c.bf16 %v1941_v30, %v1937_v29  ;;  %vm12148_vm13 = vmpackc.low %vm2645_vm9, %vm2645_vm9 }
  0x99   :  { %9097 = vmatpush1.bf16.msra.mxu1 %v10791_v20  ;;  %v295_v31 = vsub.f32 %v293_v14, %v294_v24  ;;  %v307_v32 = vsub.f32 %v305_v15, %v306_v25  ;;  %v2042_v44 = vsub.f32 %v1908_v22, %v1941_v30  ;;  %v2031_v45 = vand.u32 4294901760, %v2030_v43 }
  0x9a   :  { %v301_v33 = vsub.f32 %v10782_v16, %v300_v26  ;;  %v313_v34 = vsub.f32 %v10789_v19, %v312_v27  ;;  %9167 = vmatprep.subr.bf16.mxu1 %v10810_v35  ;;  %v10813_v47 = vpack.c.bf16 %v306_v25, %v294_v24  ;;  %v10815_v50 = vpack.c.bf16 %v312_v27, %v300_v26  ;;  %v1913_v26 = vld [vmem:[%s12252_s8 + $0x40] sm:$0xff]  ;;  %v1915_v27 = vld [vmem:[%s12252_s8 + $0x50] sm:$0xff] }
  0x9b   :  { %v296_v36 = vand.u32 4294901760, %v295_v31  ;;  %v308_v37 = vand.u32 4294901760, %v307_v32  ;;  %v2043_v46 = vand.u32 4294901760, %v2042_v44  ;;  %v2032_v48 = vsub.f32 %v2030_v43, %v2031_v45 }
  0x9c   :  { %1324 = vperm.xlu0 %10219, %v1321_v18   ;;  %1327 = vperm.xlu1 %10220, %v1322_v23   ;;  %v302_v38 = vand.u32 4294901760, %v301_v33  ;;  %v314_v39 = vand.u32 4294901760, %v313_v34  ;;  %v10819_v54 = vpack.c.bf16 %v2042_v44, %v2030_v43  ;;  %v1939_v62 = vand.u32 4294901760, %v1905_v57 }
  0x9d   :  { %v9098_v40 = vpack.c.bf16 %v308_v37, %v296_v36  ;;  %v2044_v49 = vsub.f32 %v2042_v44, %v2043_v46  ;;  %v2033_v51 = vand.u32 4294901760, %v2032_v48  ;;  %v10821_v55 = vpack.c.bf16 %v2043_v46, %v2031_v45  ;;  %v1920_v44 = vld [vmem:[%s12252_s8 + $0x78] sm:$0xff]  ;;  %v10921_v45 = vld [vmem:[%s12252_s8 + $0x60] sm:$0xff]  ;;  %v10926_v46 = vld [vmem:[%s12252_s8 + $0x70] sm:$0xff] }
  0x9e   :  { %v9100_v42 = vpack.c.bf16 %v314_v39, %v302_v38  ;;  %v1943_v63 = vand.u32 4294901760, %v1907_v58  ;;  %v1945_v4 = vand.u32 4294901760, %v1910_v60  ;;  %v1949_v5 = vand.u32 4294901760, %v1912_v61 }
  0x9f   :  { %9099 = vmatprep.subr.bf16.mxu0 %v9098_v40  ;;  %v2045_v52 = vand.u32 4294901760, %v2044_v49  ;;  %v10851_v8 = vsub.f32 %v1905_v57, %v1939_v62  ;;  %v1947_v11 = vand.u32 4294901760, %v1909_v0  ;;  %v1951_v12 = vand.u32 4294901760, %v1911_v2 }
  0xa0   :  { %9101 = vmatpush1.bf16.msra.mxu0 %v9100_v42  ;;  %v10853_v9 = vsub.f32 %v1907_v58, %v1943_v63  ;;  %v10862_v14 = vpack.c.bf16 %v1943_v63, %v1939_v62  ;;  %v10864_v15 = vsub.f32 %v1910_v60, %v1945_v4  ;;  %v10866_v18 = vsub.f32 %v1912_v61, %v1949_v5  ;;  %v1918_v42 = vld [vmem:[%s12252_s8 + $0x68] sm:$0xff]  ;;  %s10572_s8 = smov 64  }
  0xa1   :  { %9103 = vmatprep.subr.bf16.mxu0 %v9102_v41  ;;  %v10817_v53 = vpack.c.bf16 %v2045_v52, %v2033_v51  ;;  %v10874_v23 = vpack.c.bf16 %v1949_v5, %v1945_v4  ;;  %v1953_v24 = vand.u32 4294901760, %v1914_v6  ;;  %v1957_v25 = vand.u32 4294901760, %v1916_v7 }
  0xa2   :  { %v12272_v29 = vand.u32 4294901760, %v10851_v8  ;;  %v12271_v16 = vand.u32 4294901760, %v10853_v9  ;;  %v10886_v19 = vsub.f32 %v1909_v0, %v1947_v11  ;;  %v10892_v31 = vpack.c.bf16 %v1951_v12, %v1947_v11 }
  0xa3   :  { %v10894_v32 = vsub.f32 %v1911_v2, %v1951_v12  ;;  %v12267_v34 = vand.u32 4294901760, %v10864_v15  ;;  %v12266_v36 = vand.u32 4294901760, %v10866_v18  ;;  %v10902_v37 = vsub.f32 %v1914_v6, %v1953_v24 }
  0xa4   :  { %v1955_v40 = vand.u32 4294901760, %v1913_v26  ;;  %v1959_v41 = vand.u32 4294901760, %v1915_v27  ;;  %v10913_v43 = vpack.c.bf16 %v1957_v25, %v1953_v24  ;;  %v2038_v48 = vsub.f32 %v10851_v8, %v12272_v29  ;;  %v173_v24 = vld [vmem:[#allocation2 + $0x18] sm:$0xff] }
  0xa5   :  { %v2050_v49 = vsub.f32 %v10853_v9, %v12271_v16  ;;  %v12264_v51 = vand.u32 4294901760, %v10886_v19  ;;  %v12263_v58 = vand.u32 4294901760, %v10894_v32  ;;  %v10937_v60 = vsub.f32 %v1916_v7, %v1957_v25 }
  0xa6   :  { %v1961_v61 = vand.u32 4294901760, %v1918_v42  ;;  %v2056_v62 = vsub.f32 %v10864_v15, %v12267_v34  ;;  %v2068_v63 = vsub.f32 %v10866_v18, %v12266_v36  ;;  %v12265_v0 = vand.u32 4294901760, %v10902_v37 }
  0xa7   :  { %v1963_v4 = vand.u32 4294901760, %v10921_v45  ;;  %v1967_v5 = vand.u32 4294901760, %v10926_v46  ;;  %v2039_v6 = vand.u32 4294901760, %v2038_v48  ;;  %v2051_v7 = vand.u32 4294901760, %v2050_v49 }
  0xa8   :  { %v10958_v12 = vsub.f32 %v10886_v19, %v12264_v51  ;;  %v12270_v48 = vand.u32 4294901760, %v10937_v60  ;;  %v2069_v49 = vand.u32 4294901760, %v2068_v63  ;;  %v759_v51 = vand.u32 4294901760, %v173_v24  ;;  %v10995_v63 = vld [vmem:[#allocation2] sm:$0xff] }
  0xa9   :  { %v10984_v56 = vpack.c.bf16 %v1967_v5, %v1963_v4  ;;  %vm1933_vm10 = vcmask 523264   ;;  %vm7669_vm11 = vcmask 1041408   ;;  %vm7671_vm12 = vcmask 1043456  }
 0x113   :  { %v180_v3 = vpop.permute.xlu0 %179  ;;  %v160_v11 = vpop.permute.xlu1 %159 }
 0x114   :  { %vm184_vm1 = vcmp.eq.s32.totalorder %v10830_v59, %v180_v3  ;;  %v1965_v3 = vand.u32 4294901760, %v1920_v44  ;;  %vm164_vm4 = vcmp.eq.s32.totalorder %v10830_v59, %v160_v11 }
 0x115   :  { %v10856_v10 = vsel %vm184_vm1, 1.0, %v12279_v1 }
 0x116   :  { %v196_v13 = vsel %vm194_vm0, %v10856_v10, 0  ;;  %8871 = vmatmul.mubr.msk.f32.vlgmr.msra.gmra.mrb[0].mxu0 %vm194_vm0, %v10856_v10  ;;  %v11001_v36 = vsub.f32 %v1920_v44, %v1965_v3  ;;  %v11016_v44 = vsub.f32 %v173_v24, %v759_v51 }
 0x117   :  { %v10868_v21 = vsub.f32 %v196_v13, %v196_v13  ;;  %v183_v22 = vpop.permute.xlu0 %182  ;;  %383 = vmatprep.mubr.f32.mxu0 %v12279_v1  ;;  %9105 = vmatpush1.bf16.msra.mxu0 %v9104_v28  ;;  %v10960_v13 = vsub.f32 %v1913_v26, %v1955_v40  ;;  %v2057_v26 = vand.u32 4294901760, %v2056_v62  ;;  %v2063_v62 = vand.u32 4294901760, %v10958_v12 }
 0x118   :  { %vm185_vm2 = vcmp.eq.s32.totalorder %v10830_v59, %v183_v22  ;;  %9107 = vmatprep.subr.bf16.mxu0 %v10784_v17  ;;  %v171_v22 = vld [vmem:[#allocation2 + $0x8] sm:$0xff]  ;;  %v2092_v12 = vsub.f32 %v10937_v60, %v12270_v48 }
 0x119   :  { %v10889_v28 = vsel %vm185_vm2, 1.0, %v12279_v1  ;;  %v272_v30 = vand.u32 4294901760, %v10868_v21 }
 0x11a   :  { %8872 = vmatmul.mubr.msk.f32.gmra.mrb[2].mxu0 %vm194_vm0, %v10889_v28  ;;  %v199_v33 = vsel %vm194_vm0, %v10889_v28, 0  ;;  %v2093_v11 = vand.u32 4294901760, %v2092_v12 }
 0x11b   :  { %463 = vmatprep.mubr.f32.mxu0 %v12279_v1  ;;  %v273_v38 = vsub.f32 %v10868_v21, %v272_v30  ;;  %v10908_v39 = vsub.f32 %v199_v33, %v199_v33  ;;  %v10964_v33 = vpack.c.bf16 %v1959_v41, %v1955_v40  ;;  %v10979_v40 = vsub.f32 %v1915_v27, %v1959_v41 }
 0x11c   :  { %v12269_v27 = vand.u32 4294901760, %v10960_v13 }
 0x11d   :  { %v274_v52 = vand.u32 4294901760, %v273_v38  ;;  %v283_v57 = vand.u32 4294901760, %v10908_v39  ;;  %v10969_v38 = vsub.f32 %v10894_v32, %v12263_v58  ;;  %v755_v58 = vand.u32 4294901760, %v171_v22 }
 0x11e   :  { %466 = vmatmul.mubr.f32.vlgmr.msra.gmra.mrb[0].mxu0 %v10868_v21  ;;  %v12268_v34 = vand.u32 4294901760, %v10979_v40  ;;  %v11019_v21 = vsub.f32 %v10921_v45, %v1963_v4  ;;  %v12273_v4 = vand.u32 4294901760, %v11001_v36 }
 0x11f   :  { %275 = vmatmul.mubr.f32.vlgmr.msra.gmra.mrb[0].mxu1 %v274_v52  ;;  %471 = vmatprep.mubr.f32.mxu0 %v12279_v1  ;;  %v284_v2 = vsub.f32 %v10908_v39, %v283_v57  ;;  %v10977_v52 = vsub.f32 %v10902_v37, %v12265_v0  ;;  %v2075_v41 = vand.u32 4294901760, %v10969_v38  ;;  %v10999_v0 = vsub.f32 %v1918_v42, %v1961_v61  ;;  %v163_v38 = vpop.permute.xlu1 %162 }
 0x120   :  { %9169 = vmatpush1.bf16.msra.mxu1 %v10862_v14  ;;  %280 = vmatprep.mubr.f32.mxu1 %v12279_v1  ;;  %v11014_v42 = vsub.f32 %v171_v22, %v755_v58  ;;  %v11031_v22 = vsub.f32 %v10926_v46, %v1967_v5  ;;  %vm165_vm6 = vcmp.eq.s32.totalorder %v10830_v59, %v163_v38 }
 0x121   :  { %9171 = vmatprep.subr.bf16.mxu1 %v10874_v23  ;;  %v285_v25 = vand.u32 4294901760, %v284_v2  ;;  %9109 = vmatpush1.bf16.msra.mxu0 %v10791_v20  ;;  %v10982_v2 = vpack.c.bf16 %v1965_v3, %v1961_v61  ;;  %v11026_v61 = vsel %vm164_vm4, 1.0, %v12279_v1  ;;  %v12275_v45 = vand.u32 4294901760, %v10999_v0 }
 0x122   :  { %474 = vmatmul.mubr.f32.gmra.mrb[2].mxu0 %v10908_v39  ;;  %9111 = vmatprep.subr.bf16.mxu0 %v10813_v47  ;;  %v10988_v47 = vpack.c.bf16 %v2051_v7, %v2039_v6  ;;  %v11005_v6 = vpack.c.bf16 %v2069_v49, %v2057_v26  ;;  %v2081_v7 = vand.u32 4294901760, %v10977_v52  ;;  %v2098_v46 = vsub.f32 %v10979_v40, %v12268_v34  ;;  %v174_v26 = vld [vmem:[#allocation2 + $0x20] sm:$0x3f] }
 0x123   :  { %286 = vmatmul.mubr.f32.gmra.mrb[2].mxu1 %v285_v25  ;;  %548 = vmatprep.mubr.f32.mxu0 %v12279_v1  ;;  %v10997_v25 = vld [vmem:[#allocation2 + $0x10] sm:$0xff]  ;;  %v11045_v5 = vpack.c.bf16 %v759_v51, %v755_v58  ;;  %v743_v49 = vsel %vm741_vm3, %v11026_v61, 0  ;;  %v12274_v52 = vand.u32 4294901760, %v11019_v21  ;;  %v12277_v39 = vand.u32 4294901760, %v11014_v42 }
 0x124   :  { %9173 = vmatpush1.bf16.msra.mxu1 %v10892_v31  ;;  %2017 = vmatprep.mubr.f32.mxu1 %v12279_v1  ;;  %12296 = vst [vmem:[#allocation24_spill] sm:$0xff] %v11005_v6  ;;  %v761_v3 = vand.u32 4294901760, %v10997_v25  ;;  %v11058_v51 = vsel %vm165_vm6, 1.0, %v12279_v1  ;;  %v2104_v34 = vsub.f32 %v10999_v0, %v12275_v45  ;;  %v2116_v38 = vsub.f32 %v11001_v36, %v12273_v4 }
 0x125   :  { %9175 = vmatprep.subr.bf16.mxu1 %v10913_v43  ;;  %v11081_v48 = vpack.c.bf16 %v2075_v41, %v2063_v62  ;;  %v2099_v29 = vand.u32 4294901760, %v2098_v46  ;;  %v746_v4 = vsel %vm741_vm3, %v11058_v51, 0  ;;  %v11106_v45 = vpack.c.bf16 %v2093_v11, %v2081_v7 }
 0x126   :  { %552 = vmatmul.mubr.f32.vlgmr.msra.gmra.mrb[0].mxu0 %v272_v30  ;;  %v175_v30 = vld [vmem:[#allocation2 + $0x28] sm:$0x3f]  ;;  %v11064_v12 = vsub.f32 %v10997_v25, %v761_v3  ;;  %v11079_v25 = vsub.f32 %v743_v49, %v743_v49  ;;  %v851_v49 = vsub.f32 %v11014_v42, %v12277_v39  ;;  %v2117_v39 = vand.u32 4294901760, %v2116_v38 }
 0x127   :  { %557 = vmatprep.mubr.f32.mxu0 %v12279_v1  ;;  %9113 = vmatpush1.bf16.msra.mxu0 %v10815_v50  ;;  %v757_v50 = vand.u32 4294901760, %v10995_v63  ;;  %v753_v24 = vsel %vm748_vm5, %v175_v30, 0  ;;  %v12278_v30 = vand.u32 4294901760, %v11031_v22 }
 0x128   :  { %9177 = vmatpush1.bf16.msra.mxu1 %v10964_v33  ;;  %9115 = vmatprep.subr.bf16.mxu0 %v10784_v17  ;;  %v2086_v17 = vsub.f32 %v10960_v13, %v12269_v27  ;;  %v11074_v27 = vand.u32 4294901760, %v753_v24  ;;  %v852_v11 = vand.u32 4294901760, %v851_v49 }
 0x129   :  { %9179 = vmatprep.subr.bf16.mxu1 %v10982_v2  ;;  %v11061_v58 = vsub.f32 %v10995_v63, %v757_v50  ;;  %v750_v63 = vsel %vm748_vm5, %v174_v26, 0  ;;  %v2110_v26 = vsub.f32 %v11019_v21, %v12274_v52  ;;  %v2122_v41 = vsub.f32 %v11031_v22, %v12278_v30 }
 0x12a   :  { %561 = vmatmul.mubr.f32.gmra.mrb[2].mxu0 %v283_v57  ;;  %v12276_v57 = vand.u32 4294901760, %v11016_v44  ;;  %v2087_v16 = vand.u32 4294901760, %v2086_v17  ;;  %v11101_v17 = vand.u32 4294901760, %v750_v63  ;;  %v11117_v46 = vpack.c.bf16 %v761_v3, %v757_v50 }
 0x12b   :  { %643 = vmatprep.mubr.f32.mxu0 %v12279_v1  ;;  %v12297_v52 = vmov 0.0   ;;  %v12299_v3 = vand.u32 4294901760, %v11064_v12 }
 0x12c   :  { %9181 = vmatpush1.bf16.msra.mxu1 %v10984_v56  ;;  %v863_v62 = vsub.f32 %v11016_v44, %v12276_v57  ;;  %v2105_v57 = vand.u32 4294901760, %v2104_v34  ;;  %v11121_v7 = vpack.c.bf16 %v2099_v29, %v2087_v16  ;;  %v2111_v34 = vand.u32 4294901760, %v2110_v26 }
 0x12d   :  { %9183 = vmatprep.subr.bf16.mxu1 %v10817_v53  ;;  %v869_v30 = vsub.f32 %v11064_v12, %v12299_v3  ;;  %v12300_v26 = vand.u32 4294901760, %v11079_v25 }
 0x12e   :  { %8873 = vmatmul.mubr.msk.f32.vlgmr.msra.gmra.mrb[0].mxu0 %vm194_vm0, %v10856_v10  ;;  %v864_v38 = vand.u32 4294901760, %v863_v62  ;;  %v11134_v29 = vpack.c.bf16 %v2117_v39, %v2105_v57 }
 0x12f   :  { %2023 = vmatmul.mubr.f32.vlgmr.msra.gmra.mrb[4].mxu1 %v12279_v1  ;;  %650 = vmatprep.mubr.f32.mxu0 %v12279_v1  ;;  %v11115_v1 = vsub.f32 %v746_v4, %v746_v4  ;;  %v12298_v4 = vand.u32 4294901760, %v11061_v58  ;;  %v829_v49 = vsub.f32 %v11079_v25, %v12300_v26  ;;  %v11179_v26 = vpack.c.bf16 %v10894_v32, %v10886_v19 }
 0x130   :  { %9185 = vmatpush1.bf16.msra.mxu1 %v10988_v47  ;;  %9117 = vmatpush1.bf16.msra.mxu0 %v10791_v20  ;;  %v11110_v20 = vsub.f32 %v753_v24, %v11074_v27  ;;  %v2123_v24 = vand.u32 4294901760, %v2122_v41  ;;  %v9122_v62 = vpack.c.bf16 %v864_v38, %v852_v11  ;;  %v870_v41 = vand.u32 4294901760, %v869_v30 }
 0x131   :  { %9187 = vmatprep.subr.bf16.mxu1 %v11005_v6  ;;  %9119 = vmatprep.subr.bf16.mxu0 %v11045_v5  ;;  %v11125_v6 = vsub.f32 %v750_v63, %v11101_v17  ;;  %v857_v50 = vsub.f32 %v11061_v58, %v12298_v4  ;;  %v12284_v63 = vand.u32 4294901760, %v11115_v1  ;;  %v830_v3 = vand.u32 4294901760, %v829_v49 }
 0x132   :  { %8874 = vmatmul.mubr.msk.f32.gmra.mrb[2].mxu0 %vm194_vm0, %v10889_v28  ;;  %2173 = vmatprep.mubr.f32.mxu1 %v12297_v52  ;;  %v12285_v16 = vand.u32 4294901760, %v11110_v20  ;;  %v11146_v39 = vpack.c.bf16 %v2123_v24, %v2111_v34  ;;  %v11164_v30 = vpack.c.bf16 %v10853_v9, %v10851_v8  ;;  %v11172_v38 = vpack.c.bf16 %v10866_v18, %v10864_v15 }
 0x133   :  { %726 = vmatprep.mubr.f32.mxu0 %v12297_v52  ;;  %v858_v57 = vand.u32 4294901760, %v857_v50  ;;  %v12283_v4 = vand.u32 4294901760, %v11125_v6  ;;  %v840_v34 = vsub.f32 %v11115_v1, %v12284_v63  ;;  %v12305_v63 = vand.u32 4294901760, %v11064_v12 }
 0x134   :  { %9189 = vmatpush1.bf16.msra.mxu1 %v11081_v48 }
 0x135   :  { %9191 = vmatprep.subr.bf16.mxu1 %v11106_v45  ;;  %v9124_v11 = vpack.c.bf16 %v870_v41, %v858_v57  ;;  %v841_v50 = vand.u32 4294901760, %v840_v34  ;;  %v9126_v57 = vpack.c.bf16 %v11016_v44, %v11014_v42  ;;  %v9128_v41 = vpack.c.bf16 %v11064_v12, %v11061_v58  ;;  %v1328_v12 = vpop.permute.xlu1 %1327 }
 0x136   :  { %8875 = vmatmul.mubr.msk.f32.vlgmr.msra.gmra.mrb[0].mxu0 %vm194_vm0, %v10856_v10  ;;  %v875_v10 = vsub.f32 %v11110_v20, %v12285_v16  ;;  %v11208_v34 = vpack.c.bf16 %v11031_v22, %v11019_v21  ;;  %vm1330_vm8 = vcmp.eq.s32.totalorder %v10830_v59, %v1328_v12 }
 0x137   :  { %733 = vmatprep.mubr.f32.mxu0 %v12297_v52  ;;  %9121 = vmatpush1.bf16.msra.mxu0 %v11117_v46 }
 0x138   :  { %9193 = vmatpush1.bf16.msra.mxu1 %v11121_v7  ;;  %764 = vmatprep.subr.mxu0 %v11074_v27  ;;  %v876_v24 = vand.u32 4294901760, %v875_v10  ;;  %v11195_v10 = vpack.c.bf16 %v10979_v40, %v10960_v13  ;;  %12301 = vst [vmem:[#allocation25_spill] sm:$0xff] %v11208_v34 }
 0x139   :  { %9195 = vmatprep.subr.bf16.mxu1 %v11134_v29 }
 0x13a   :  { %8876 = vmatmul.mubr.msk.f32.gmra.mrb[2].mxu0 %vm194_vm0, %v10889_v28  ;;  %v881_v28 = vsub.f32 %v11125_v6, %v12283_v4  ;;  %v12304_v4 = vand.u32 4294901760, %v11061_v58  ;;  %v12306_v58 = vand.u32 4294901760, %v11079_v25 }
 0x13b   :  { %766 = vmatpush1.msra.mxu0 %v11101_v17  ;;  %825 = vmatprep.mubr.f32.mxu0 %v12297_v52 }
 0x13c   :  { %9197 = vmatpush1.bf16.msra.mxu1 %v11146_v39  ;;  %9123 = vmatprep.subr.bf16.mxu0 %v9122_v62  ;;  %v882_v49 = vand.u32 4294901760, %v881_v28  ;;  %v11184_v62 = vpack.c.bf16 %v10937_v60, %v10902_v37  ;;  %v11221_v28 = vld [vmem:[#allocation7 + $0x18] sm:$0xff]  ;;  %v9136_v16 = vpack.c.bf16 %v12305_v63, %v12304_v4  ;;  %v12307_v4 = vand.u32 4294901760, %v11110_v20 }
 0x13d   :  { %9199 = vmatprep.subr.bf16.mxu1 %v10819_v54 }
 0x13e   :  { %831 = vmatmul.mubr.f32.vlgmr.msra.gmra.mrb[0].mxu0 %v830_v3  ;;  %v11200_v3 = vpack.c.bf16 %v11001_v36, %v10999_v0 }
 0x13f   :  { %2175 = vmatmul.mubr.f32.vlgmr.msra.gmra.mrb[4].mxu1 %v12297_v52  ;;  %836 = vmatprep.mubr.f32.mxu0 %v12297_v52 }
 0x140   :  { %9201 = vmatpush1.bf16.msra.mxu1 %v11164_v30  ;;  %9125 = vmatpush1.bf16.msra.mxu0 %v9124_v11  ;;  %v11219_v11 = vld [vmem:[#allocation7 + $0x8] sm:$0xff] }
 0x141   :  { %9203 = vmatprep.subr.bf16.mxu1 %v11172_v38  ;;  %877 = vmatprep.subr.mxu0 %v876_v24  ;;  %v1345_v24 = vand.u32 4294901760, %v11219_v11 }
 0x142   :  { %842 = vmatmul.mubr.f32.gmra.mrb[2].mxu0 %v841_v50  ;;  %2277 = vmatprep.mubr.f32.mxu1 %v12297_v52  ;;  %v1349_v50 = vand.u32 4294901760, %v11221_v28 }
 0x143   :  { %942 = vmatprep.mubr.f32.mxu0 %v12297_v52 }
 0x144   :  { %9205 = vmatpush1.bf16.msra.mxu1 %v11179_v26  ;;  %883 = vmatpush1.msra.mxu0 %v882_v49  ;;  %v12302_v49 = vand.u32 4294901760, %v11014_v42  ;;  %v11246_v42 = vsub.f32 %v11219_v11, %v1345_v24 }
 0x145   :  { %9207 = vmatprep.subr.bf16.mxu1 %v11184_v62  ;;  %9127 = vmatprep.subr.bf16.mxu0 %v9126_v57  ;;  %v12303_v57 = vand.u32 4294901760, %v11016_v44  ;;  %v11249_v44 = vsub.f32 %v11221_v28, %v1349_v50 }
 0x146   :  { %8877 = vmatmul.mubr.msk.f32.vlgmr.msra.gmra.mrb[0].mxu0 %vm741_vm3, %v11026_v61  ;;  %v12288_v28 = vand.u32 4294901760, %v11246_v42 }
 0x147   :  { %949 = vmatprep.mubr.f32.mxu0 %v12297_v52  ;;  %9129 = vmatpush1.bf16.msra.mxu0 %v9128_v41  ;;  %v9134_v41 = vpack.c.bf16 %v12303_v57, %v12302_v49  ;;  %v1335_v49 = vld [vmem:[#allocation7] sm:$0xff]  ;;  %v1337_v57 = vld [vmem:[#allocation7 + $0x10] sm:$0xff] }
 0x148   :  { %9209 = vmatpush1.bf16.msra.mxu1 %v11195_v10  ;;  %971 = vmatprep.subr.mxu0 %v11110_v20  ;;  %v1347_v63 = vand.u32 4294901760, %v1335_v49  ;;  %v1351_v11 = vand.u32 4294901760, %v1337_v57  ;;  %v12310_v20 = vand.u32 4294901760, %v10851_v8  ;;  %v12312_v8 = vand.u32 4294901760, %v11249_v44 }
 0x149   :  { %9211 = vmatprep.subr.bf16.mxu1 %v11200_v3 }
 0x14a   :  { %8878 = vmatmul.mubr.msk.f32.gmra.mrb[2].mxu0 %vm741_vm3, %v11058_v51  ;;  %v11284_v12 = vsub.f32 %v1337_v57, %v1351_v11  ;;  %v12315_v57 = vand.u32 4294901760, %v10886_v19  ;;  %v12317_v19 = vand.u32 4294901760, %v10902_v37 }
 0x14b   :  { %974 = vmatpush1.msra.mxu0 %v11125_v6  ;;  %1033 = vmatprep.mubr.f32.mxu0 %v12297_v52 }
 0x14c   :  { %9213 = vmatpush1.bf16.msra.mxu1 %v11208_v34  ;;  %9131 = vmatprep.subr.bf16.mxu0 %v11045_v5  ;;  %v1325_v34 = vpop.permute.xlu0 %1324 }
 0x14d   :  { %9215 = vmatprep.subr.bf16.mxu1 %v10810_v35  ;;  %vm1329_vm7 = vcmp.eq.s32.totalorder %v10830_v59, %v1325_v34  ;;  %v12309_v34 = vand.u32 4294901760, %v11125_v6  ;;  %v1439_v6 = vsub.f32 %v11246_v42, %v12288_v28  ;;  %v1456_v28 = vand.u32 4294901760, %v11284_v12 }
 0x14e   :  { %1036 = vmatmul.mubr.f32.vlgmr.msra.gmra.mrb[0].mxu0 %v11079_v25  ;;  %v11264_v25 = vsel %vm1329_vm7, 1.0, %v12297_v52 }
 0x14f   :  { %2280 = vmatmul.mubr.f32.vlgmr.msra.gmra.mrb[4].mxu1 %v12297_v52  ;;  %1041 = vmatprep.mubr.f32.mxu0 %v12297_v52 }
 0x150   :  { %9217 = vmatpush1.bf16.msra.mxu1 %v10862_v14  ;;  %9133 = vmatpush1.bf16.msra.mxu0 %v11117_v46 }
 0x151   :  { %9219 = vmatprep.subr.bf16.mxu1 %v10874_v23  ;;  %1059 = vmatprep.subr.mxu0 %v11074_v27 }
 0x152   :  { %1044 = vmatmul.mubr.f32.gmra.mrb[2].mxu0 %v11115_v1  ;;  %2366 = vmatprep.mubr.f32.mxu1 %v12297_v52 }
 0x153   :  { %1120 = vmatprep.mubr.f32.mxu0 %v12297_v52 }
 0x154   :  { %9221 = vmatpush1.bf16.msra.mxu1 %v10892_v31  ;;  %1061 = vmatpush1.msra.mxu0 %v11101_v17 }
 0x155   :  { %9223 = vmatprep.subr.bf16.mxu1 %v10913_v43  ;;  %9135 = vmatprep.subr.bf16.mxu0 %v9134_v41  ;;  %v11277_v41 = vsub.f32 %v1335_v49, %v1347_v63  ;;  %v1340_v49 = vsel %vm194_vm0, %v11264_v25, 0 }
 0x156   :  { %1124 = vmatmul.mubr.f32.vlgmr.msra.gmra.mrb[0].mxu0 %v12306_v58  ;;  %v12311_v58 = vand.u32 4294901760, %v10853_v9  ;;  %v1451_v9 = vsub.f32 %v11249_v44, %v12312_v8  ;;  %v11314_v8 = vsub.f32 %v1340_v49, %v1340_v49  ;;  %v11327_v49 = vpack.c.bf16 %v1349_v50, %v1345_v24 }
 0x157   :  { %1129 = vmatprep.mubr.f32.mxu0 %v12297_v52  ;;  %9137 = vmatpush1.bf16.msra.mxu0 %v9136_v16  ;;  %v12308_v16 = vand.u32 4294901760, %v11115_v1  ;;  %v11282_v1 = vsel %vm1330_vm8, 1.0, %v12297_v52 }
 0x158   :  { %9225 = vmatpush1.bf16.msra.mxu1 %v10964_v33  ;;  %1158 = vmatprep.subr.mxu0 %v12307_v4  ;;  %v11275_v4 = vpack.c.bf16 %v12311_v58, %v12310_v20  ;;  %v12316_v20 = vand.u32 4294901760, %v10894_v32  ;;  %v12318_v32 = vand.u32 4294901760, %v10937_v60  ;;  %v11341_v60 = vpack.c.bf16 %v1351_v11, %v1347_v63 }
 0x159   :  { %9227 = vmatprep.subr.bf16.mxu1 %v10982_v2  ;;  %v1416_v24 = vand.u32 4294901760, %v11314_v8  ;;  %v12322_v63 = vand.u32 4294901760, %v11001_v36  ;;  %v12324_v36 = vand.u32 4294901760, %v11031_v22  ;;  %v9150_v22 = vpack.c.bf16 %v11249_v44, %v11246_v42 }
 0x15a   :  { %1133 = vmatmul.mubr.f32.gmra.mrb[2].mxu0 %v12308_v16  ;;  %v12314_v16 = vand.u32 4294901760, %v10866_v18  ;;  %v11309_v58 = vpack.c.bf16 %v12316_v20, %v12315_v57  ;;  %v1444_v18 = vand.u32 4294901760, %v11277_v41  ;;  %v11325_v57 = vpack.c.bf16 %v12318_v32, %v12317_v19 }
 0x15b   :  { %1162 = vmatpush1.msra.mxu0 %v12309_v34  ;;  %1221 = vmatprep.mubr.f32.mxu0 %v12297_v52  ;;  %v1417_v20 = vsub.f32 %v11314_v8, %v1416_v24 }
 0x15c   :  { %9229 = vmatpush1.bf16.msra.mxu1 %v10984_v56  ;;  %9139 = vmatprep.subr.bf16.mxu0 %v11045_v5  ;;  %v12313_v5 = vand.u32 4294901760, %v10864_v15  ;;  %v1343_v15 = vsel %vm194_vm0, %v11282_v1, 0 }
 0x15d   :  { %9231 = vmatprep.subr.bf16.mxu1 %v10821_v55  ;;  %v1418_v19 = vand.u32 4294901760, %v1417_v20 }
 0x15e   :  { %v11299_v34 = vpack.c.bf16 %v12314_v16, %v12313_v5  ;;  %8879 = vmatmul.mubr.msk.f32.vlgmr.msra.gmra.mrb[0].mxu0 %vm741_vm3, %v11026_v61  ;;  %v1440_v5 = vand.u32 4294901760, %v1439_v6  ;;  %v1452_v16 = vand.u32 4294901760, %v1451_v9  ;;  %v12319_v6 = vand.u32 4294901760, %v10960_v13 }
 0x15f   :  { %2370 = vmatmul.mubr.f32.vlgmr.msra.gmra.mrb[4].mxu1 %v12297_v52  ;;  %1228 = vmatprep.mubr.f32.mxu0 %v12297_v52  ;;  %v1445_v9 = vsub.f32 %v11277_v41, %v1444_v18  ;;  %v1457_v13 = vsub.f32 %v11284_v12, %v1456_v28 }
 0x160   :  { %9233 = vmatpush1.bf16.msra.mxu1 %v11275_v4  ;;  %9141 = vmatpush1.bf16.msra.mxu0 %v11117_v46  ;;  %v11331_v46 = vsub.f32 %v1343_v15, %v1343_v15  ;;  %v9146_v50 = vpack.c.bf16 %v1452_v16, %v1440_v5 }
 0x161   :  { %9235 = vmatprep.subr.bf16.mxu1 %v11299_v34  ;;  %1245 = vmatprep.subr.mxu0 %v11074_v27  ;;  %v12320_v27 = vand.u32 4294901760, %v10979_v40  ;;  %v12321_v40 = vand.u32 4294901760, %v10999_v0  ;;  %v12323_v0 = vand.u32 4294901760, %v11019_v21  ;;  %v1458_v5 = vand.u32 4294901760, %v1457_v13 }
 0x162   :  { %8880 = vmatmul.mubr.msk.f32.gmra.mrb[2].mxu0 %vm741_vm3, %v11058_v51  ;;  %2488 = vmatprep.mubr.f32.mxu1 %v12297_v52 }
 0x163   :  { %1306 = vmatprep.mubr.f32.mxu0 %v12297_v52  ;;  %v11339_v37 = vpack.c.bf16 %v12320_v27, %v12319_v6  ;;  %v11358_v11 = vpack.c.bf16 %v12322_v63, %v12321_v40  ;;  %v11373_v15 = vpack.c.bf16 %v12324_v36, %v12323_v0  ;;  %v12325_v6 = vand.u32 4294901760, %v11246_v42 }
 0x164   :  { %9237 = vmatpush1.bf16.msra.mxu1 %v11309_v58  ;;  %1247 = vmatpush1.msra.mxu0 %v11101_v17  ;;  %v1427_v17 = vand.u32 4294901760, %v11331_v46  ;;  %v12326_v27 = vand.u32 4294901760, %v11249_v44  ;;  %v9160_v42 = vpack.c.bf16 %v1456_v28, %v1444_v18 }
 0x165   :  { %9239 = vmatprep.subr.bf16.mxu1 %v11325_v57  ;;  %9143 = vmatprep.subr.bf16.mxu0 %v11327_v49 }
 0x166   :  { %8881 = vmatmul.mubr.msk.f32.vlgmr.msra.gmra.mrb[0].mxu0 %vm741_vm3, %v11026_v61  ;;  %v1446_v61 = vand.u32 4294901760, %v1445_v9  ;;  %v1428_v16 = vsub.f32 %v11331_v46, %v1427_v17 }
 0x167   :  { %1313 = vmatprep.mubr.f32.mxu0 %v12297_v52  ;;  %9145 = vmatpush1.bf16.msra.mxu0 %v11341_v60 }
 0x168   :  { %9241 = vmatpush1.bf16.msra.mxu1 %v11339_v37  ;;  %9147 = vmatprep.subr.bf16.mxu0 %v9146_v50  ;;  %v9148_v21 = vpack.c.bf16 %v1458_v5, %v1446_v61  ;;  %v1429_v32 = vand.u32 4294901760, %v1428_v16  ;;  %v9158_v50 = vpack.c.bf16 %v12326_v27, %v12325_v6 }
 0x169   :  { %9243 = vmatprep.subr.bf16.mxu1 %v11358_v11 }
 0x16a   :  { %8882 = vmatmul.mubr.msk.f32.gmra.mrb[2].mxu0 %vm741_vm3, %v11058_v51  ;;  %v9152_v51 = vpack.c.bf16 %v11284_v12, %v11277_v41  ;;  %v12327_v12 = vlaneseq }
 0x16b   :  { %1413 = vmatprep.mubr.f32.mxu0 %v12297_v52 }
 0x16c   :  { %9245 = vmatpush1.bf16.msra.mxu1 %v11373_v15 }
 0x16d   :  { %9247 = vmatprep.subr.bf16.mxu1 %v10810_v35 }
 0x16e   :  { %1419 = vmatmul.mubr.f32.vlgmr.msra.gmra.mrb[0].mxu0 %v1418_v19 }
 0x16f   :  { %2490 = vmatmul.mubr.f32.vlgmr.msra.gmra.mrb[4].mxu1 %v12297_v52  ;;  %1424 = vmatprep.mubr.f32.mxu0 %v12297_v52 }
 0x170   :  { %9249 = vmatpush1.bf16.msra.mxu1 %v10862_v14  ;;  %9149 = vmatpush1.bf16.msra.mxu0 %v9148_v21 }
 0x171   :  { %9251 = vmatprep.subr.bf16.mxu1 %v10874_v23  ;;  %9151 = vmatprep.subr.bf16.mxu0 %v9150_v22 }
 0x172   :  { %1430 = vmatmul.mubr.f32.gmra.mrb[2].mxu0 %v1429_v32  ;;  %2576 = vmatprep.mubr.f32.mxu1 %v12297_v52 }
 0x173   :  { %1520 = vmatprep.mubr.f32.mxu0 %v12297_v52 }
 0x174   :  { %9253 = vmatpush1.bf16.msra.mxu1 %v10892_v31 }
 0x175   :  { %9255 = vmatprep.subr.bf16.mxu1 %v10913_v43 }
 0x176   :  { %8885 = vmatmul.mubr.msk.f32.vlgmr.msra.gmra.mrb[0].mxu0 %vm194_vm0, %v11264_v25 }
 0x177   :  { %1527 = vmatprep.mubr.f32.mxu0 %v12297_v52  ;;  %9153 = vmatpush1.bf16.msra.mxu0 %v9152_v51 }
 0x178   :  { %9257 = vmatpush1.bf16.msra.mxu1 %v10964_v33  ;;  %9155 = vmatprep.subr.bf16.mxu0 %v11327_v49 }
 0x179   :  { %9259 = vmatprep.subr.bf16.mxu1 %v10982_v2 }
 0x17a   :  { %8886 = vmatmul.mubr.msk.f32.gmra.mrb[2].mxu0 %vm194_vm0, %v11282_v1 }
 0x17b   :  { %1607 = vmatprep.mubr.f32.mxu0 %v12297_v52 }
 0x17c   :  { %9261 = vmatpush1.bf16.msra.mxu1 %v10984_v56 }
 0x17d   :  { %9263 = vmatprep.subr.bf16.mxu1 %v10810_v35 }
 0x17e   :  { %1610 = vmatmul.mubr.f32.vlgmr.msra.gmra.mrb[0].mxu0 %v11314_v8  ;;  %v1921_v8 = vld [vmem:[#allocation8] sm:$0x3] }
 0x17f   :  { %2578 = vmatmul.mubr.f32.vlgmr.msra.gmra.mrb[4].mxu1 %v12297_v52  ;;  %1615 = vmatprep.mubr.f32.mxu0 %v12297_v52 }
 0x180   :  { %9157 = vmatpush1.bf16.msra.mxu0 %v11341_v60  ;;  %9265 = vmatpush1.bf16.msra.mxu1 %v10862_v14 }
 0x181   :  { %9159 = vmatprep.subr.bf16.mxu0 %v9158_v50  ;;  %9267 = vmatprep.subr.bf16.mxu1 %v10874_v23 }
 0x182   :  { %1618 = vmatmul.mubr.f32.gmra.mrb[2].mxu0 %v11331_v46  ;;  %2730 = vmatprep.mubr.f32.mxu1 %v12297_v52 }
 0x183   :  { %1692 = vmatprep.mubr.f32.mxu0 %v12297_v52 }
 0x184   :  { %9269 = vmatpush1.bf16.msra.mxu1 %v10892_v31 }
 0x185   :  { %9271 = vmatprep.subr.bf16.mxu1 %v10913_v43 }
 0x186   :  { %1696 = vmatmul.mubr.f32.vlgmr.msra.gmra.mrb[0].mxu0 %v1416_v24 }
 0x187   :  { %1701 = vmatprep.mubr.f32.mxu0 %v12297_v52  ;;  %9161 = vmatpush1.bf16.msra.mxu0 %v9160_v42 }
 0x188   :  { %9163 = vmatprep.subr.bf16.mxu0 %v11327_v49  ;;  %9273 = vmatpush1.bf16.msra.mxu1 %v10964_v33 }
 0x189   :  { %9275 = vmatprep.subr.bf16.mxu1 %v10982_v2 }
 0x18a   :  { %1705 = vmatmul.mubr.f32.gmra.mrb[2].mxu0 %v1427_v17  ;;  %v1889_v17 = vld [vmem:[%s12250_s6] sm:$0x3]  ;;  %s10573_s6 = smov 96  }
 0x18b   :  { %1787 = vmatprep.mubr.f32.mxu0 %v12297_v52 }
 0x18c   :  { %9277 = vmatpush1.bf16.msra.mxu1 %v10984_v56 }
 0x18d   :  { %9279 = vmatprep.subr.bf16.mxu1 %v10817_v53 }
 0x18e   :  { %8887 = vmatmul.mubr.msk.f32.vlgmr.msra.gmra.mrb[0].mxu0 %vm194_vm0, %v11264_v25 }
 0x18f   :  { %1794 = vmatprep.mubr.f32.mxu0 %v12297_v52  ;;  %9165 = vmatpush1.bf16.msra.mxu0 %v11341_v60 }
 0x190   :  { %9359 = vmatprep.subr.bf16.mxu0 %v10810_v35 }
 0x192   :  { %8888 = vmatmul.mubr.msk.f32.gmra.mrb[2].mxu0 %vm194_vm0, %v11282_v1 }
 0x193   :  { %1870 = vmatprep.mubr.f32.mxu0 %v12297_v52 }
 0x196   :  { %8889 = vmatmul.mubr.msk.f32.vlgmr.msra.gmra.mrb[0].mxu0 %vm194_vm0, %v11264_v25 }
 0x197   :  { %1877 = vmatprep.mubr.f32.mxu0 %v12297_v52  ;;  %9361 = vmatpush1.bf16.msra.mxu0 %v10862_v14 }
 0x198   :  { %9363 = vmatprep.subr.bf16.mxu0 %v10874_v23 }
 0x19a   :  { %8890 = vmatmul.mubr.msk.f32.gmra.mrb[2].mxu0 %vm194_vm0, %v11282_v1  ;;  %v11456_v1 = vshrl.u32 %v12327_v12, 7 }
 0x19b   :  { %9365 = vmatpush1.bf16.msra.mxu0 %v10892_v31  ;;  %3451 = vmatprep.mubr.f32.mxu0 %v12297_v52 }
 0x19c   :  { %9367 = vmatprep.subr.bf16.mxu0 %v10913_v43  ;;  %12328 = vst [vmem:[#allocation26_spill] sm:$0xff] %v11456_v1  ;;  %v11459_v18 = vsub.s32 0, %v11456_v1  ;;  %v11462_v49 = vsub.s32 1, %v11456_v1 }
 0x19e   :  { %v11465_v46 = vrot.slane %v1921_v8, %v11459_v18  ;;  %v11468_v60 = vrot.slane %v1921_v8, %v11462_v49  ;;  %v1898_v0 = vrot.slane %v1889_v17, %v11462_v49  ;;  %v1894_v21 = vrot.slane %v1889_v17, %v11459_v18 }
 0x19f   :  { %9369 = vmatpush1.bf16.msra.mxu0 %v10964_v33 }
 0x1a0   :  { %9371 = vmatprep.subr.bf16.mxu0 %v10982_v2 }
 0x1a3   :  { %9373 = vmatpush1.bf16.msra.mxu0 %v10984_v56 }
 0x1a4   :  { %9375 = vmatprep.subr.bf16.mxu0 %v10817_v53 }
 0x1f2   :  { %v276_v44 = vpop.f32.mrb[0].mxu1 }
 0x1f3   :  { %v278_v28 = vpop.f32.mrb[1].mxu1 }
 0x1f6   :  { %v287_v41 = vpop.f32.mrb[2].mxu1 }
 0x1f7   :  { %v289_v25 = vpop.f32.mrb[3].mxu1 }
 0x252   :  { %v2579_v24 = vpop.f32.mrb[4].mxu1 }
 0x253   :  { %v10030_v9 = vadd.f32 %v2579_v24, %v11465_v46  ;;  %v2581_v13 = vpop.f32.mrb[5].mxu1 }
 0x254   :  { %v10031_v40 = vadd.f32 %v2581_v13, %v11468_v60 }
 0x255   :  { %2592 = vrot.lane.b32.xlu0 %v10030_v9, %s10572_s8 }
 0x256   :  { %v2611_v63 = vrot.slane %v10031_v40, 2 }
 0x258   :  { %2620 = vrot.lane.b32.xlu1 %v2611_v63, %s10572_s8 }
 0x269   :  { %v1873_v20 = vpop.f32.mrb[0].mxu0 }
 0x26a   :  { %v10026_v36 = vadd.f32 %v1873_v20, %v276_v44  ;;  %v1875_v61 = vpop.f32.mrb[1].mxu0 }
 0x26b   :  { %v10027_v5 = vadd.f32 %v1875_v61, %v278_v28 }
 0x26c   :  { %v11483_v27 = vadd.f32 %v10026_v36, %v1894_v21 }
 0x26d   :  { %v11478_v16 = vadd.f32 %v10027_v5, %v1898_v0  ;;  %v1880_v19 = vpop.f32.mrb[2].mxu0 }
 0x26e   :  { %v10028_v22 = vadd.f32 %v1880_v19, %v287_v41  ;;  %v1882_v32 = vpop.f32.mrb[3].mxu0  ;;  %v2584_v42 = vadd.f32 %v10030_v9, %v11483_v27 }
 0x26f   :  { %v10029_v51 = vadd.f32 %v1882_v32, %v289_v25 }
 0x270   :  { %v11481_v6 = vadd.f32 %v10028_v22, %v1894_v21  ;;  %v8891_v12 = vmul.f32 -1.442695, %v2584_v42 }
 0x271   :  { %v11485_v50 = vadd.f32 %v10029_v51, %v1898_v0 }
 0x272   :  { %10236 = vpow2.f32 %v8891_v12 }
 0x273   :  { %v2613_v44 = vadd.f32 %v2611_v63, %v11485_v50 }
 0x275   :  { %v8892_v28 = vmul.f32 -1.442695, %v2613_v44 }
 0x277   :  { %10238 = vpow2.f32 %v8892_v28 }
 0x27c   :  { %v10237_v8 = vpop.eup %10236 }
 0x27d   :  { %v2588_v13 = vadd.f32 1.0, %v10237_v8 }
 0x27f   :  { %10240 = vrcp.f32 %v2588_v13 }
 0x281   :  { %v10239_v24 = vpop.eup %10238 }
 0x282   :  { %v2617_v41 = vadd.f32 1.0, %v10239_v24 }
 0x284   :  { %10242 = vrcp.f32 %v2617_v41 }
 0x289   :  { %v10241_v25 = vpop.eup %10240 }
 0x28a   :  { %v2602_v22 = vsub.f32 1.0, %v10241_v25  ;;  %v2608_v51 = vmul.f32 0.0, %v10241_v25 }
 0x28e   :  { %v10243_v20 = vpop.eup %10242 }
 0x28f   :  { %v2630_v28 = vsub.f32 1.0, %v10243_v20  ;;  %v2636_v24 = vmul.f32 0.0, %v10243_v20 }
 0x2c7   :  { %v2593_v40 = vpop.permute.xlu0 %2592 }
 0x2c8   :  { %v2595_v17 = vmul.f32 %v10241_v25, %v2593_v40 }
 0x2ca   :  { %2597 = vrot.lane.b32.xlu0 %v2595_v17, %s10572_s8  ;;  %v2621_v0 = vpop.permute.xlu1 %2620 }
 0x2cb   :  { %v2623_v9 = vmul.f32 %v10243_v20, %v2621_v0  ;;  %v12329_v20 = vld [vmem:[#allocation24_spill] sm:$0xff] }
 0x2cd   :  { %2625 = vrot.lane.b32.xlu1 %v2623_v9, %s10572_s8 }
 0x33c   :  { %v2598_v63 = vpop.permute.xlu0 %2597 }
 0x33d   :  { %v2600_v36 = vadd.f32 %v2598_v63, %v11483_v27 }
 0x33f   :  { %10244 = vtanh.f32 %v2600_v36  ;;  %v2626_v61 = vpop.permute.xlu1 %2625 }
 0x340   :  { %v2628_v5 = vadd.f32 %v2626_v61, %v11485_v50 }
 0x342   :  { %10246 = vtanh.f32 %v2628_v5  ;;  %v12330_v5 = vld [vmem:[#allocation25_spill] sm:$0xff] }
 0x349   :  { %v10245_v19 = vpop.eup %10244 }
 0x34a   :  { %2604 = vrot.lane.b32.xlu0 %v10245_v19, %s10573_s6 }
 0x34c   :  { %v10247_v21 = vpop.eup %10246 }
 0x34d   :  { %2632 = vrot.lane.b32.xlu1 %v10247_v21, %s10573_s6 }
 0x3bc   :  { %v2605_v32 = vpop.permute.xlu0 %2604 }
 0x3bd   :  { %v2607_v42 = vmul.f32 %v2605_v32, %v2602_v22 }
 0x3bf   :  { %v11495_v44 = vadd.f32 %v2608_v51, %v2607_v42  ;;  %v2633_v12 = vpop.permute.xlu1 %2632 }
 0x3c0   :  { %v2635_v8 = vmul.f32 %v2633_v12, %v2630_v28 }
 0x3c1   :  { %2639 = vrot.lane.b32.xlu0 %v11495_v44, %s10573_s6 }
 0x3c2   :  { %v11499_v13 = vadd.f32 %v2636_v24, %v2635_v8 }
 0x3c4   :  { %v2643_v41 = vrot.slane %v11499_v13, 6 }
 0x433   :  { %v2640_v40 = vpop.permute.xlu0 %2639 }
 0x434   :  { %v11503_v17 = vsel %vm2645_vm9, %v2640_v40, %v2643_v41 }
 0x435   :  { %v2648_v25 = vsel %vm1933_vm10, %v11503_v17, 0 }
 0x436   :  { %v2731_v0 = vand.u32 4294901760, %v2648_v25 }
 0x438   :  { %v2732_v9 = vsub.f32 %v2648_v25, %v2731_v0 }
 0x43a   :  { %v2733_v63 = vand.u32 4294901760, %v2732_v9 }
 0x43c   :  { %v2734_v36 = vsub.f32 %v2732_v9, %v2733_v63 }
 0x43e   :  { %v2735_v61 = vand.u32 4294901760, %v2734_v36 }
 0x440   :  { %2736 = vmatmul.mubr.f32.vlgmr.msra.gmra.mrb[6].mxu1 %v2735_v61 }
 0x441   :  { %9281 = vmatpush1.bf16.msra.mxu1 %v10988_v47  ;;  %2886 = vmatprep.mubr.f32.mxu1 %v12297_v52 }
 0x442   :  { %9283 = vmatprep.subr.bf16.mxu1 %v12329_v20 }
 0x445   :  { %9285 = vmatpush1.bf16.msra.mxu1 %v11081_v48 }
 0x446   :  { %9287 = vmatprep.subr.bf16.mxu1 %v11106_v45 }
 0x449   :  { %9289 = vmatpush1.bf16.msra.mxu1 %v11121_v7 }
 0x44a   :  { %9291 = vmatprep.subr.bf16.mxu1 %v11134_v29 }
 0x44d   :  { %9293 = vmatpush1.bf16.msra.mxu1 %v11146_v39 }
 0x44e   :  { %9295 = vmatprep.subr.bf16.mxu1 %v10819_v54 }
 0x450   :  { %2888 = vmatmul.mubr.f32.vlgmr.msra.gmra.mrb[6].mxu1 %v2731_v0 }
 0x451   :  { %9297 = vmatpush1.bf16.msra.mxu1 %v11164_v30  ;;  %2990 = vmatprep.mubr.f32.mxu1 %v12297_v52 }
 0x452   :  { %9299 = vmatprep.subr.bf16.mxu1 %v11172_v38 }
 0x455   :  { %9301 = vmatpush1.bf16.msra.mxu1 %v11179_v26 }
 0x456   :  { %9303 = vmatprep.subr.bf16.mxu1 %v11184_v62 }
 0x459   :  { %9305 = vmatpush1.bf16.msra.mxu1 %v11195_v10 }
 0x45a   :  { %9307 = vmatprep.subr.bf16.mxu1 %v11200_v3 }
 0x45d   :  { %9309 = vmatpush1.bf16.msra.mxu1 %v12330_v5 }
 0x45e   :  { %9311 = vmatprep.subr.bf16.mxu1 %v10810_v35 }
 0x460   :  { %2993 = vmatmul.mubr.f32.vlgmr.msra.gmra.mrb[6].mxu1 %v2732_v9 }
 0x461   :  { %9313 = vmatpush1.bf16.msra.mxu1 %v10862_v14  ;;  %3079 = vmatprep.mubr.f32.mxu1 %v12297_v52 }
 0x462   :  { %9315 = vmatprep.subr.bf16.mxu1 %v10874_v23 }
 0x465   :  { %9317 = vmatpush1.bf16.msra.mxu1 %v10892_v31 }
 0x466   :  { %9319 = vmatprep.subr.bf16.mxu1 %v10913_v43 }
 0x469   :  { %9321 = vmatpush1.bf16.msra.mxu1 %v10964_v33 }
 0x46a   :  { %9323 = vmatprep.subr.bf16.mxu1 %v10982_v2 }
 0x46d   :  { %9325 = vmatpush1.bf16.msra.mxu1 %v10984_v56 }
 0x46e   :  { %9327 = vmatprep.subr.bf16.mxu1 %v10821_v55 }
 0x470   :  { %3083 = vmatmul.mubr.f32.vlgmr.msra.gmra.mrb[6].mxu1 %v2733_v63 }
 0x471   :  { %9329 = vmatpush1.bf16.msra.mxu1 %v11275_v4  ;;  %3201 = vmatprep.mubr.f32.mxu1 %v12297_v52 }
 0x472   :  { %9331 = vmatprep.subr.bf16.mxu1 %v11299_v34 }
 0x475   :  { %9333 = vmatpush1.bf16.msra.mxu1 %v11309_v58 }
 0x476   :  { %9335 = vmatprep.subr.bf16.mxu1 %v11325_v57 }
 0x479   :  { %9337 = vmatpush1.bf16.msra.mxu1 %v11339_v37 }
 0x47a   :  { %9339 = vmatprep.subr.bf16.mxu1 %v11358_v11 }
 0x47d   :  { %9341 = vmatpush1.bf16.msra.mxu1 %v11373_v15 }
 0x47e   :  { %9343 = vmatprep.subr.bf16.mxu1 %v10810_v35 }
 0x480   :  { %3203 = vmatmul.mubr.f32.vlgmr.msra.gmra.mrb[6].mxu1 %v2731_v0 }
 0x481   :  { %9345 = vmatpush1.bf16.msra.mxu1 %v10862_v14  ;;  %3289 = vmatprep.mubr.f32.mxu1 %v12297_v52 }
 0x482   :  { %9347 = vmatprep.subr.bf16.mxu1 %v10874_v23 }
 0x485   :  { %9349 = vmatpush1.bf16.msra.mxu1 %v10892_v31 }
 0x486   :  { %9351 = vmatprep.subr.bf16.mxu1 %v10913_v43 }
 0x489   :  { %9353 = vmatpush1.bf16.msra.mxu1 %v10964_v33 }
 0x48a   :  { %9355 = vmatprep.subr.bf16.mxu1 %v10982_v2 }
 0x48d   :  { %9357 = vmatpush1.bf16.msra.mxu1 %v10984_v56 }
 0x48e   :  { %9455 = vmatprep.subr.bf16.mxu1 %v10810_v35 }
 0x490   :  { %3291 = vmatmul.mubr.f32.vlgmr.msra.gmra.mrb[6].mxu1 %v2731_v0 }
 0x491   :  { %9457 = vmatpush1.bf16.msra.mxu1 %v10862_v14  ;;  %4170 = vmatprep.mubr.f32.mxu1 %v12297_v52 }
 0x492   :  { %9459 = vmatprep.subr.bf16.mxu1 %v10874_v23 }
 0x495   :  { %9461 = vmatpush1.bf16.msra.mxu1 %v10892_v31 }
 0x496   :  { %9463 = vmatprep.subr.bf16.mxu1 %v10913_v43 }
 0x499   :  { %9465 = vmatpush1.bf16.msra.mxu1 %v10964_v33 }
 0x49a   :  { %9467 = vmatprep.subr.bf16.mxu1 %v10982_v2 }
 0x49d   :  { %9469 = vmatpush1.bf16.msra.mxu1 %v10984_v56 }
 0x49e   :  { %9471 = vmatprep.subr.bf16.mxu1 %v10817_v53 }
 0x563   :  { %v3292_v19 = vpop.f32.mrb[6].mxu1 }
 0x564   :  { %v10032_v21 = vadd.f32 %v3292_v19, %v11465_v46  ;;  %v3294_v22 = vpop.f32.mrb[7].mxu1 }
 0x565   :  { %v10033_v32 = vadd.f32 %v3294_v22, %v11468_v60  ;;  %v3323_v22 = vrot.slane %v11503_v17, 6 }
 0x566   :  { %v3298_v51 = vrot.slane %v10032_v21, 6 }
 0x567   :  { %v3330_v42 = vrot.slane %v10033_v32, 4 }
 0x568   :  { %3307 = vrot.lane.b32.xlu1 %v3298_v51, %s10572_s8  ;;  %v3300_v12 = vadd.f32 %v3298_v51, %v11483_v27 }
 0x569   :  { %3339 = vrot.lane.b32.xlu0 %v3330_v42, %s10572_s8  ;;  %v3332_v28 = vadd.f32 %v3330_v42, %v11485_v50 }
 0x56a   :  { %v8893_v8 = vmul.f32 -1.442695, %v3300_v12 }
 0x56b   :  { %v8894_v24 = vmul.f32 -1.442695, %v3332_v28 }
 0x56c   :  { %10248 = vpow2.f32 %v8893_v8 }
 0x56d   :  { %10250 = vpow2.f32 %v8894_v24 }
 0x576   :  { %v10249_v41 = vpop.eup %10248 }
 0x577   :  { %v10251_v40 = vpop.eup %10250  ;;  %v3304_v25 = vadd.f32 1.0, %v10249_v41 }
 0x578   :  { %v3336_v0 = vadd.f32 1.0, %v10251_v40 }
 0x579   :  { %10252 = vrcp.f32 %v3304_v25 }
 0x57a   :  { %10254 = vrcp.f32 %v3336_v0 }
 0x583   :  { %v10253_v9 = vpop.eup %10252 }
 0x584   :  { %v10255_v36 = vpop.eup %10254  ;;  %v3317_v41 = vsub.f32 1.0, %v10253_v9 }
 0x5da   :  { %v3308_v63 = vpop.permute.xlu1 %3307 }
 0x5db   :  { %v3310_v61 = vmul.f32 %v10253_v9, %v3308_v63  ;;  %v3340_v19 = vpop.permute.xlu0 %3339 }
 0x5dc   :  { %v3342_v21 = vmul.f32 %v10255_v36, %v3340_v19  ;;  %v3349_v19 = vsub.f32 1.0, %v10255_v36 }
 0x5dd   :  { %3312 = vrot.lane.b32.xlu1 %v3310_v61, %s10572_s8 }
 0x5de   :  { %3344 = vrot.lane.b32.xlu0 %v3342_v21, %s10572_s8  ;;  %v3355_v21 = vrot.slane %v11503_v17, 4 }
 0x5e2   :  { %3324 = vrot.lane.b32.xlu0 %v3323_v22, %s10574_s20 }
 0x64f   :  { %v3313_v32 = vpop.permute.xlu1 %3312 }
 0x650   :  { %v3315_v51 = vadd.f32 %v3313_v32, %v11483_v27  ;;  %v3345_v42 = vpop.permute.xlu0 %3344  ;;  %v3357_v32 = vmul.f32 %v10255_v36, %v3355_v21 }
 0x651   :  { %v3347_v12 = vadd.f32 %v3345_v42, %v11485_v50 }
 0x652   :  { %10256 = vtanh.f32 %v3315_v51 }
 0x653   :  { %10258 = vtanh.f32 %v3347_v12 }
 0x654   :  { %v3325_v24 = vpop.permute.xlu0 %3324 }
 0x655   :  { %v3327_v25 = vmul.f32 %v10253_v9, %v3325_v24 }
 0x65c   :  { %v10257_v28 = vpop.eup %10256 }
 0x65d   :  { %3319 = vrot.lane.b32.xlu1 %v10257_v28, %s10573_s6  ;;  %v10259_v8 = vpop.eup %10258 }
 0x661   :  { %3351 = vrot.lane.b32.xlu1 %v10259_v8, %s10573_s6 }
 0x6cf   :  { %v3320_v40 = vpop.permute.xlu1 %3319 }
 0x6d0   :  { %v3322_v0 = vmul.f32 %v3320_v40, %v3317_v41 }
 0x6d2   :  { %v11575_v63 = vadd.f32 %v3327_v25, %v3322_v0 }
 0x6d3   :  { %v3352_v61 = vpop.permute.xlu1 %3351 }
 0x6d4   :  { %3360 = vrot.lane.b32.xlu0 %v11575_v63, %s10573_s6  ;;  %v3354_v22 = vmul.f32 %v3352_v61, %v3349_v19 }
 0x6d6   :  { %v11580_v51 = vadd.f32 %v3357_v32, %v3354_v22 }
 0x6d8   :  { %v3364_v42 = vrot.slane %v11580_v51, 2 }
 0x746   :  { %v3361_v12 = vpop.permute.xlu0 %3360 }
 0x747   :  { %v11584_v28 = vsel %vm2645_vm9, %v3361_v12, %v3364_v42 }
 0x748   :  { %v3368_v9 = vrot.slane %v11584_v28, 2 }
 0x74a   :  { %v3369_v8 = vsel %vm1933_vm10, %v3368_v9, 0 }
 0x74b   :  { %v3452_v24 = vand.u32 4294901760, %v3369_v8 }
 0x74d   :  { %v3453_v41 = vsub.f32 %v3369_v8, %v3452_v24 }
 0x74f   :  { %v3454_v40 = vand.u32 4294901760, %v3453_v41 }
 0x751   :  { %v3455_v25 = vsub.f32 %v3453_v41, %v3454_v40 }
 0x753   :  { %v3456_v0 = vand.u32 4294901760, %v3455_v25 }
 0x755   :  { %3457 = vmatmul.mubr.f32.vlgmr.msra.gmra.mrb[4].mxu0 %v3456_v0 }
 0x756   :  { %9377 = vmatpush1.bf16.msra.mxu0 %v10988_v47  ;;  %3607 = vmatprep.mubr.f32.mxu0 %v12297_v52 }
 0x757   :  { %9379 = vmatprep.subr.bf16.mxu0 %v12329_v20 }
 0x75a   :  { %9381 = vmatpush1.bf16.msra.mxu0 %v11081_v48 }
 0x75b   :  { %9383 = vmatprep.subr.bf16.mxu0 %v11106_v45 }
 0x75e   :  { %9385 = vmatpush1.bf16.msra.mxu0 %v11121_v7 }
 0x75f   :  { %9387 = vmatprep.subr.bf16.mxu0 %v11134_v29 }
 0x762   :  { %9389 = vmatpush1.bf16.msra.mxu0 %v11146_v39 }
 0x763   :  { %9391 = vmatprep.subr.bf16.mxu0 %v10819_v54 }
 0x765   :  { %3609 = vmatmul.mubr.f32.vlgmr.msra.gmra.mrb[4].mxu0 %v3452_v24 }
 0x766   :  { %9393 = vmatpush1.bf16.msra.mxu0 %v11164_v30  ;;  %3711 = vmatprep.mubr.f32.mxu0 %v12297_v52 }
 0x767   :  { %9395 = vmatprep.subr.bf16.mxu0 %v11172_v38 }
 0x76a   :  { %9397 = vmatpush1.bf16.msra.mxu0 %v11179_v26 }
 0x76b   :  { %9399 = vmatprep.subr.bf16.mxu0 %v11184_v62 }
 0x76e   :  { %9401 = vmatpush1.bf16.msra.mxu0 %v11195_v10 }
 0x76f   :  { %9403 = vmatprep.subr.bf16.mxu0 %v11200_v3 }
 0x772   :  { %9405 = vmatpush1.bf16.msra.mxu0 %v12330_v5 }
 0x773   :  { %9407 = vmatprep.subr.bf16.mxu0 %v10810_v35 }
 0x775   :  { %3714 = vmatmul.mubr.f32.vlgmr.msra.gmra.mrb[4].mxu0 %v3453_v41 }
 0x776   :  { %9409 = vmatpush1.bf16.msra.mxu0 %v10862_v14  ;;  %3800 = vmatprep.mubr.f32.mxu0 %v12297_v52 }
 0x777   :  { %9411 = vmatprep.subr.bf16.mxu0 %v10874_v23 }
 0x77a   :  { %9413 = vmatpush1.bf16.msra.mxu0 %v10892_v31 }
 0x77b   :  { %9415 = vmatprep.subr.bf16.mxu0 %v10913_v43 }
 0x77e   :  { %9417 = vmatpush1.bf16.msra.mxu0 %v10964_v33 }
 0x77f   :  { %9419 = vmatprep.subr.bf16.mxu0 %v10982_v2 }
 0x782   :  { %9421 = vmatpush1.bf16.msra.mxu0 %v10984_v56 }
 0x783   :  { %9423 = vmatprep.subr.bf16.mxu0 %v10821_v55 }
 0x785   :  { %3804 = vmatmul.mubr.f32.vlgmr.msra.gmra.mrb[4].mxu0 %v3454_v40 }
 0x786   :  { %9425 = vmatpush1.bf16.msra.mxu0 %v11275_v4  ;;  %3922 = vmatprep.mubr.f32.mxu0 %v12297_v52 }
 0x787   :  { %9427 = vmatprep.subr.bf16.mxu0 %v11299_v34 }
 0x78a   :  { %9429 = vmatpush1.bf16.msra.mxu0 %v11309_v58 }
 0x78b   :  { %9431 = vmatprep.subr.bf16.mxu0 %v11325_v57 }
 0x78e   :  { %9433 = vmatpush1.bf16.msra.mxu0 %v11339_v37 }
 0x78f   :  { %9435 = vmatprep.subr.bf16.mxu0 %v11358_v11 }
 0x792   :  { %9437 = vmatpush1.bf16.msra.mxu0 %v11373_v15 }
 0x793   :  { %9439 = vmatprep.subr.bf16.mxu0 %v10810_v35 }
 0x795   :  { %3924 = vmatmul.mubr.f32.vlgmr.msra.gmra.mrb[4].mxu0 %v3452_v24 }
 0x796   :  { %9441 = vmatpush1.bf16.msra.mxu0 %v10862_v14  ;;  %4010 = vmatprep.mubr.f32.mxu0 %v12297_v52 }
 0x797   :  { %9443 = vmatprep.subr.bf16.mxu0 %v10874_v23 }
 0x79a   :  { %9445 = vmatpush1.bf16.msra.mxu0 %v10892_v31 }
 0x79b   :  { %9447 = vmatprep.subr.bf16.mxu0 %v10913_v43 }
 0x79e   :  { %9449 = vmatpush1.bf16.msra.mxu0 %v10964_v33 }
 0x79f   :  { %9451 = vmatprep.subr.bf16.mxu0 %v10982_v2 }
 0x7a2   :  { %9453 = vmatpush1.bf16.msra.mxu0 %v10984_v56 }
 0x7a3   :  { %9551 = vmatprep.subr.bf16.mxu0 %v10810_v35 }
 0x7a5   :  { %4012 = vmatmul.mubr.f32.vlgmr.msra.gmra.mrb[4].mxu0 %v3452_v24 }
 0x7a6   :  { %9553 = vmatpush1.bf16.msra.mxu0 %v10862_v14  ;;  %4888 = vmatprep.mubr.f32.mxu0 %v12297_v52 }
 0x7a7   :  { %9555 = vmatprep.subr.bf16.mxu0 %v10874_v23 }
 0x7aa   :  { %9557 = vmatpush1.bf16.msra.mxu0 %v10892_v31 }
 0x7ab   :  { %9559 = vmatprep.subr.bf16.mxu0 %v10913_v43 }
 0x7ae   :  { %9561 = vmatpush1.bf16.msra.mxu0 %v10964_v33 }
 0x7af   :  { %9563 = vmatprep.subr.bf16.mxu0 %v10982_v2 }
 0x7b2   :  { %9565 = vmatpush1.bf16.msra.mxu0 %v10984_v56 }
 0x7b3   :  { %9567 = vmatprep.subr.bf16.mxu0 %v10817_v53 }
 0x878   :  { %v4013_v17 = vpop.f32.mrb[4].mxu0 }
 0x879   :  { %v10034_v36 = vadd.f32 %v4013_v17, %v11465_v46  ;;  %v4015_v61 = vpop.f32.mrb[5].mxu0 }
 0x87a   :  { %v10035_v19 = vadd.f32 %v4015_v61, %v11468_v60 }
 0x87b   :  { %v4019_v21 = vrot.slane %v10034_v36, 4 }
 0x87c   :  { %v4051_v22 = vrot.slane %v10035_v19, 6 }
 0x87d   :  { %4028 = vrot.lane.b32.xlu1 %v4019_v21, %s10572_s8  ;;  %v4021_v32 = vadd.f32 %v4019_v21, %v11483_v27  ;;  %v4044_v21 = vrot.slane %v11584_v28, 6 }
 0x87e   :  { %4060 = vrot.lane.b32.xlu0 %v4051_v22, %s10572_s8  ;;  %v4053_v42 = vadd.f32 %v4051_v22, %v11485_v50 }
 0x87f   :  { %v8895_v12 = vmul.f32 -1.442695, %v4021_v32 }
 0x880   :  { %v8896_v9 = vmul.f32 -1.442695, %v4053_v42 }
 0x881   :  { %10260 = vpow2.f32 %v8895_v12 }
 0x882   :  { %10262 = vpow2.f32 %v8896_v9 }
 0x88b   :  { %v10261_v8 = vpop.eup %10260 }
 0x88c   :  { %v10263_v24 = vpop.eup %10262  ;;  %v4025_v41 = vadd.f32 1.0, %v10261_v8 }
 0x88d   :  { %v4057_v40 = vadd.f32 1.0, %v10263_v24 }
 0x88e   :  { %10264 = vrcp.f32 %v4025_v41 }
 0x88f   :  { %10266 = vrcp.f32 %v4057_v40 }
 0x898   :  { %v10265_v25 = vpop.eup %10264 }
 0x899   :  { %v10267_v17 = vpop.eup %10266  ;;  %v4038_v41 = vsub.f32 1.0, %v10265_v25 }
 0x8ef   :  { %v4029_v0 = vpop.permute.xlu1 %4028 }
 0x8f0   :  { %v4031_v36 = vmul.f32 %v10265_v25, %v4029_v0  ;;  %v4061_v61 = vpop.permute.xlu0 %4060 }
 0x8f1   :  { %v4063_v19 = vmul.f32 %v10267_v17, %v4061_v61 }
 0x8f2   :  { %4033 = vrot.lane.b32.xlu1 %v4031_v36, %s10572_s8 }
 0x8f3   :  { %4065 = vrot.lane.b32.xlu0 %v4063_v19, %s10572_s8  ;;  %v7670_v19 = vsel %vm7669_vm11, %v11495_v44, %v11575_v63 }
 0x8f7   :  { %4045 = vrot.lane.b32.xlu0 %v4044_v21, %s10574_s20 }
 0x964   :  { %v4034_v22 = vpop.permute.xlu1 %4033 }
 0x965   :  { %v4036_v32 = vadd.f32 %v4034_v22, %v11483_v27  ;;  %v4066_v42 = vpop.permute.xlu0 %4065 }
 0x966   :  { %v4068_v12 = vadd.f32 %v4066_v42, %v11485_v50 }
 0x967   :  { %10268 = vtanh.f32 %v4036_v32  ;;  %v4070_v32 = vsub.f32 1.0, %v10267_v17 }
 0x968   :  { %10270 = vtanh.f32 %v4068_v12  ;;  %v4076_v12 = vmul.f32 %v10267_v17, %v11584_v28 }
 0x969   :  { %v4046_v24 = vpop.permute.xlu0 %4045 }
 0x96a   :  { %v4048_v0 = vmul.f32 %v10265_v25, %v4046_v24 }
 0x971   :  { %v10269_v9 = vpop.eup %10268 }
 0x972   :  { %4040 = vrot.lane.b32.xlu1 %v10269_v9, %s10573_s6  ;;  %v10271_v8 = vpop.eup %10270 }
 0x976   :  { %4072 = vrot.lane.b32.xlu1 %v10271_v8, %s10573_s6 }
 0x9e4   :  { %v4041_v40 = vpop.permute.xlu1 %4040 }
 0x9e5   :  { %v4043_v36 = vmul.f32 %v4041_v40, %v4038_v41 }
 0x9e7   :  { %v4049_v61 = vadd.f32 %v4048_v0, %v4043_v36 }
 0x9e8   :  { %v4073_v22 = vpop.permute.xlu1 %4072 }
 0x9e9   :  { %4079 = vrot.lane.b32.xlu0 %v4049_v61, %s10573_s6  ;;  %v11661_v21 = vsel %vm7671_vm12, %v7670_v19, %v4049_v61  ;;  %v4075_v42 = vmul.f32 %v4073_v22, %v4070_v32 }
 0x9eb   :  { %v11664_v9 = vadd.f32 %v4076_v12, %v4075_v42 }
 0x9ed   :  { %v4083_v25 = vrot.slane %v11664_v9, 6 }
 0xa5b   :  { %v4080_v8 = vpop.permute.xlu0 %4079 }
 0xa5c   :  { %v11668_v24 = vsel %vm2645_vm9, %v4080_v8, %v4083_v25 }
 0xa5d   :  { %v12289_v44 = vrot.slane %v11668_v24, 4 }
 0xa5f   :  { %v4088_v63 = vsel %vm1933_vm10, %v12289_v44, 0 }
 0xa60   :  { %v4171_v41 = vand.u32 4294901760, %v4088_v63 }
 0xa62   :  { %v4172_v40 = vsub.f32 %v4088_v63, %v4171_v41 }
 0xa64   :  { %v4173_v0 = vand.u32 4294901760, %v4172_v40 }
 0xa66   :  { %v4174_v36 = vsub.f32 %v4172_v40, %v4173_v0 }
 0xa68   :  { %v4175_v61 = vand.u32 4294901760, %v4174_v36 }
 0xa6a   :  { %4176 = vmatmul.mubr.f32.vlgmr.msra.gmra.mrb[8].mxu1 %v4175_v61 }
 0xa6b   :  { %9473 = vmatpush1.bf16.msra.mxu1 %v10988_v47  ;;  %4326 = vmatprep.mubr.f32.mxu1 %v12297_v52 }
 0xa6c   :  { %9475 = vmatprep.subr.bf16.mxu1 %v12329_v20 }
 0xa6f   :  { %9477 = vmatpush1.bf16.msra.mxu1 %v11081_v48 }
 0xa70   :  { %9479 = vmatprep.subr.bf16.mxu1 %v11106_v45 }
 0xa73   :  { %9481 = vmatpush1.bf16.msra.mxu1 %v11121_v7 }
 0xa74   :  { %9483 = vmatprep.subr.bf16.mxu1 %v11134_v29 }
 0xa77   :  { %9485 = vmatpush1.bf16.msra.mxu1 %v11146_v39 }
 0xa78   :  { %9487 = vmatprep.subr.bf16.mxu1 %v10819_v54 }
 0xa7a   :  { %4328 = vmatmul.mubr.f32.vlgmr.msra.gmra.mrb[8].mxu1 %v4171_v41 }
 0xa7b   :  { %9489 = vmatpush1.bf16.msra.mxu1 %v11164_v30  ;;  %4430 = vmatprep.mubr.f32.mxu1 %v12297_v52 }
 0xa7c   :  { %9491 = vmatprep.subr.bf16.mxu1 %v11172_v38 }
 0xa7f   :  { %9493 = vmatpush1.bf16.msra.mxu1 %v11179_v26 }
 0xa80   :  { %9495 = vmatprep.subr.bf16.mxu1 %v11184_v62 }
 0xa83   :  { %9497 = vmatpush1.bf16.msra.mxu1 %v11195_v10 }
 0xa84   :  { %9499 = vmatprep.subr.bf16.mxu1 %v11200_v3 }
 0xa87   :  { %9501 = vmatpush1.bf16.msra.mxu1 %v12330_v5 }
 0xa88   :  { %9503 = vmatprep.subr.bf16.mxu1 %v10810_v35 }
 0xa8a   :  { %4433 = vmatmul.mubr.f32.vlgmr.msra.gmra.mrb[8].mxu1 %v4172_v40 }
 0xa8b   :  { %9505 = vmatpush1.bf16.msra.mxu1 %v10862_v14  ;;  %4519 = vmatprep.mubr.f32.mxu1 %v12297_v52 }
 0xa8c   :  { %9507 = vmatprep.subr.bf16.mxu1 %v10874_v23 }
 0xa8f   :  { %9509 = vmatpush1.bf16.msra.mxu1 %v10892_v31 }
 0xa90   :  { %9511 = vmatprep.subr.bf16.mxu1 %v10913_v43 }
 0xa93   :  { %9513 = vmatpush1.bf16.msra.mxu1 %v10964_v33 }
 0xa94   :  { %9515 = vmatprep.subr.bf16.mxu1 %v10982_v2 }
 0xa97   :  { %9517 = vmatpush1.bf16.msra.mxu1 %v10984_v56 }
 0xa98   :  { %9519 = vmatprep.subr.bf16.mxu1 %v10821_v55 }
 0xa9a   :  { %4523 = vmatmul.mubr.f32.vlgmr.msra.gmra.mrb[8].mxu1 %v4173_v0 }
 0xa9b   :  { %9521 = vmatpush1.bf16.msra.mxu1 %v11275_v4  ;;  %4641 = vmatprep.mubr.f32.mxu1 %v12297_v52 }
 0xa9c   :  { %9523 = vmatprep.subr.bf16.mxu1 %v11299_v34 }
 0xa9f   :  { %9525 = vmatpush1.bf16.msra.mxu1 %v11309_v58 }
 0xaa0   :  { %9527 = vmatprep.subr.bf16.mxu1 %v11325_v57 }
 0xaa3   :  { %9529 = vmatpush1.bf16.msra.mxu1 %v11339_v37 }
 0xaa4   :  { %9531 = vmatprep.subr.bf16.mxu1 %v11358_v11 }
 0xaa7   :  { %9533 = vmatpush1.bf16.msra.mxu1 %v11373_v15 }
 0xaa8   :  { %9535 = vmatprep.subr.bf16.mxu1 %v10810_v35 }
 0xaaa   :  { %4643 = vmatmul.mubr.f32.vlgmr.msra.gmra.mrb[8].mxu1 %v4171_v41 }
 0xaab   :  { %9537 = vmatpush1.bf16.msra.mxu1 %v10862_v14  ;;  %4729 = vmatprep.mubr.f32.mxu1 %v12297_v52 }
 0xaac   :  { %9539 = vmatprep.subr.bf16.mxu1 %v10874_v23 }
 0xaaf   :  { %9541 = vmatpush1.bf16.msra.mxu1 %v10892_v31 }
 0xab0   :  { %9543 = vmatprep.subr.bf16.mxu1 %v10913_v43 }
 0xab3   :  { %9545 = vmatpush1.bf16.msra.mxu1 %v10964_v33 }
 0xab4   :  { %9547 = vmatprep.subr.bf16.mxu1 %v10982_v2 }
 0xab7   :  { %9549 = vmatpush1.bf16.msra.mxu1 %v10984_v56 }
 0xab8   :  { %9647 = vmatprep.subr.bf16.mxu1 %v10810_v35 }
 0xaba   :  { %4731 = vmatmul.mubr.f32.vlgmr.msra.gmra.mrb[8].mxu1 %v4171_v41 }
 0xabb   :  { %9649 = vmatpush1.bf16.msra.mxu1 %v10862_v14  ;;  %5603 = vmatprep.mubr.f32.mxu1 %v12297_v52 }
 0xabc   :  { %9651 = vmatprep.subr.bf16.mxu1 %v10874_v23 }
 0xabf   :  { %9653 = vmatpush1.bf16.msra.mxu1 %v10892_v31 }
 0xac0   :  { %9655 = vmatprep.subr.bf16.mxu1 %v10913_v43 }
 0xac3   :  { %9657 = vmatpush1.bf16.msra.mxu1 %v10964_v33 }
 0xac4   :  { %9659 = vmatprep.subr.bf16.mxu1 %v10982_v2 }
 0xac7   :  { %9661 = vmatpush1.bf16.msra.mxu1 %v10984_v56 }
 0xac8   :  { %9663 = vmatprep.subr.bf16.mxu1 %v10817_v53 }
 0xb8d   :  { %v4732_v28 = vpop.f32.mrb[8].mxu1 }
 0xb8e   :  { %v10036_v17 = vadd.f32 %v4732_v28, %v11465_v46  ;;  %v4734_v19 = vpop.f32.mrb[9].mxu1 }
 0xb8f   :  { %v10037_v22 = vadd.f32 %v4734_v19, %v11468_v60 }
 0xb90   :  { %v4738_v32 = vrot.slane %v10036_v17, 2 }
 0xb91   :  { %4777 = vrot.lane.b32.xlu0 %v10037_v22, %s10572_s8  ;;  %v4769_v42 = vadd.f32 %v10037_v22, %v11485_v50  ;;  %v4763_v22 = vrot.slane %v11668_v24, 6 }
 0xb92   :  { %4747 = vrot.lane.b32.xlu1 %v4738_v32, %s10572_s8  ;;  %v4740_v12 = vadd.f32 %v4738_v32, %v11483_v27 }
 0xb93   :  { %v8898_v25 = vmul.f32 -1.442695, %v4769_v42 }
 0xb94   :  { %v8897_v8 = vmul.f32 -1.442695, %v4740_v12 }
 0xb95   :  { %10272 = vpow2.f32 %v8898_v25 }
 0xb96   :  { %10274 = vpow2.f32 %v8897_v8 }
 0xb9f   :  { %v10273_v63 = vpop.eup %10272 }
 0xba0   :  { %v10275_v41 = vpop.eup %10274  ;;  %v4773_v40 = vadd.f32 1.0, %v10273_v63 }
 0xba1   :  { %v4744_v0 = vadd.f32 1.0, %v10275_v41 }
 0xba2   :  { %10276 = vrcp.f32 %v4773_v40 }
 0xba3   :  { %10278 = vrcp.f32 %v4744_v0 }
 0xbac   :  { %v10277_v36 = vpop.eup %10276 }
 0xbad   :  { %v10279_v28 = vpop.eup %10278 }
 0xc03   :  { %v4778_v61 = vpop.permute.xlu0 %4777 }
 0xc04   :  { %v4780_v17 = vmul.f32 %v10277_v36, %v4778_v61  ;;  %v4748_v19 = vpop.permute.xlu1 %4747 }
 0xc05   :  { %v4750_v44 = vmul.f32 %v10279_v28, %v4748_v19  ;;  %v4787_v19 = vsub.f32 1.0, %v10277_v36 }
 0xc06   :  { %4782 = vrot.lane.b32.xlu0 %v4780_v17, %s10572_s8 }
 0xc07   :  { %4752 = vrot.lane.b32.xlu1 %v4750_v44, %s10572_s8  ;;  %v4757_v44 = vsub.f32 1.0, %v10279_v28 }
 0xc0a   :  { %4764 = vrot.lane.b32.xlu0 %v4763_v22, %s10574_s20 }
 0xc78   :  { %v4783_v32 = vpop.permute.xlu0 %4782 }
 0xc79   :  { %v4753_v42 = vpop.permute.xlu1 %4752  ;;  %v4785_v25 = vadd.f32 %v4783_v32, %v11485_v50  ;;  %v12331_v32 = vrot.slane %v11668_v24, 4 }
 0xc7a   :  { %v4755_v12 = vadd.f32 %v4753_v42, %v11483_v27 }
 0xc7b   :  { %v4794_v42 = vmul.f32 %v10277_v36, %v12331_v32 }
 0xc7c   :  { %10280 = vtanh.f32 %v4755_v12  ;;  %v4765_v41 = vpop.permute.xlu0 %4764 }
 0xc7d   :  { %10282 = vtanh.f32 %v4785_v25  ;;  %v4767_v0 = vmul.f32 %v10279_v28, %v4765_v41 }
 0xc86   :  { %v10281_v8 = vpop.eup %10280 }
 0xc87   :  { %4759 = vrot.lane.b32.xlu1 %v10281_v8, %s10573_s6  ;;  %v10283_v63 = vpop.eup %10282 }
 0xc8b   :  { %4789 = vrot.lane.b32.xlu1 %v10283_v63, %s10573_s6 }
 0xcf9   :  { %v4760_v40 = vpop.permute.xlu1 %4759 }
 0xcfa   :  { %v4762_v61 = vmul.f32 %v4760_v40, %v4757_v44 }
 0xcfc   :  { %v4768_v17 = vadd.f32 %v4767_v0, %v4762_v61 }
 0xcfd   :  { %v4790_v50 = vpop.permute.xlu1 %4789 }
 0xcfe   :  { %4797 = vrot.lane.b32.xlu0 %v4768_v17, %s10573_s6  ;;  %v11745_v27 = vsel %vm748_vm5, %v11661_v21, %v4768_v17  ;;  %v4792_v22 = vmul.f32 %v4790_v50, %v4787_v19 }
 0xd00   :  { %v11749_v12 = vadd.f32 %v4794_v42, %v4792_v22 }
 0xd02   :  { %v4801_v25 = vrot.slane %v11749_v12, 2 }
 0xd70   :  { %v4798_v8 = vpop.permute.xlu0 %4797 }
 0xd71   :  { %v11753_v28 = vsel %vm2645_vm9, %v4798_v8, %v4801_v25 }
 0xd72   :  { %v4805_v63 = vrot.slane %v11753_v28, 6 }
 0xd74   :  { %v4806_v21 = vsel %vm1933_vm10, %v4805_v63, 0 }
 0xd75   :  { %v4889_v41 = vand.u32 4294901760, %v4806_v21 }
 0xd77   :  { %v4890_v44 = vsub.f32 %v4806_v21, %v4889_v41 }
 0xd79   :  { %v4891_v40 = vand.u32 4294901760, %v4890_v44 }
 0xd7b   :  { %v4892_v0 = vsub.f32 %v4890_v44, %v4891_v40 }
 0xd7d   :  { %v4893_v24 = vand.u32 4294901760, %v4892_v0 }
 0xd7f   :  { %4894 = vmatmul.mubr.f32.vlgmr.msra.gmra.mrb[6].mxu0 %v4893_v24 }
 0xd80   :  { %9569 = vmatpush1.bf16.msra.mxu0 %v10988_v47  ;;  %5044 = vmatprep.mubr.f32.mxu0 %v12297_v52 }
 0xd81   :  { %9571 = vmatprep.subr.bf16.mxu0 %v12329_v20 }
 0xd84   :  { %9573 = vmatpush1.bf16.msra.mxu0 %v11081_v48 }
 0xd85   :  { %9575 = vmatprep.subr.bf16.mxu0 %v11106_v45 }
 0xd88   :  { %9577 = vmatpush1.bf16.msra.mxu0 %v11121_v7 }
 0xd89   :  { %9579 = vmatprep.subr.bf16.mxu0 %v11134_v29 }
 0xd8c   :  { %9581 = vmatpush1.bf16.msra.mxu0 %v11146_v39 }
 0xd8d   :  { %9583 = vmatprep.subr.bf16.mxu0 %v10819_v54 }
 0xd8f   :  { %5046 = vmatmul.mubr.f32.vlgmr.msra.gmra.mrb[6].mxu0 %v4889_v41 }
 0xd90   :  { %9585 = vmatpush1.bf16.msra.mxu0 %v11164_v30  ;;  %5148 = vmatprep.mubr.f32.mxu0 %v12297_v52 }
 0xd91   :  { %9587 = vmatprep.subr.bf16.mxu0 %v11172_v38 }
 0xd94   :  { %9589 = vmatpush1.bf16.msra.mxu0 %v11179_v26 }
 0xd95   :  { %9591 = vmatprep.subr.bf16.mxu0 %v11184_v62 }
 0xd98   :  { %9593 = vmatpush1.bf16.msra.mxu0 %v11195_v10 }
 0xd99   :  { %9595 = vmatprep.subr.bf16.mxu0 %v11200_v3 }
 0xd9c   :  { %9597 = vmatpush1.bf16.msra.mxu0 %v12330_v5 }
 0xd9d   :  { %9599 = vmatprep.subr.bf16.mxu0 %v10810_v35 }
 0xd9f   :  { %5151 = vmatmul.mubr.f32.vlgmr.msra.gmra.mrb[6].mxu0 %v4890_v44 }
 0xda0   :  { %9601 = vmatpush1.bf16.msra.mxu0 %v10862_v14  ;;  %5237 = vmatprep.mubr.f32.mxu0 %v12297_v52 }
 0xda1   :  { %9603 = vmatprep.subr.bf16.mxu0 %v10874_v23 }
 0xda4   :  { %9605 = vmatpush1.bf16.msra.mxu0 %v10892_v31 }
 0xda5   :  { %9607 = vmatprep.subr.bf16.mxu0 %v10913_v43 }
 0xda8   :  { %9609 = vmatpush1.bf16.msra.mxu0 %v10964_v33 }
 0xda9   :  { %9611 = vmatprep.subr.bf16.mxu0 %v10982_v2 }
 0xdac   :  { %9613 = vmatpush1.bf16.msra.mxu0 %v10984_v56 }
 0xdad   :  { %9615 = vmatprep.subr.bf16.mxu0 %v10821_v55 }
 0xdaf   :  { %5241 = vmatmul.mubr.f32.vlgmr.msra.gmra.mrb[6].mxu0 %v4891_v40 }
 0xdb0   :  { %9617 = vmatpush1.bf16.msra.mxu0 %v11275_v4  ;;  %5359 = vmatprep.mubr.f32.mxu0 %v12297_v52 }
 0xdb1   :  { %9619 = vmatprep.subr.bf16.mxu0 %v11299_v34 }
 0xdb4   :  { %9621 = vmatpush1.bf16.msra.mxu0 %v11309_v58 }
 0xdb5   :  { %9623 = vmatprep.subr.bf16.mxu0 %v11325_v57 }
 0xdb8   :  { %9625 = vmatpush1.bf16.msra.mxu0 %v11339_v37 }
 0xdb9   :  { %9627 = vmatprep.subr.bf16.mxu0 %v11358_v11 }
 0xdbc   :  { %9629 = vmatpush1.bf16.msra.mxu0 %v11373_v15 }
 0xdbd   :  { %9631 = vmatprep.subr.bf16.mxu0 %v10810_v35 }
 0xdbf   :  { %5361 = vmatmul.mubr.f32.vlgmr.msra.gmra.mrb[6].mxu0 %v4889_v41 }
 0xdc0   :  { %9633 = vmatpush1.bf16.msra.mxu0 %v10862_v14  ;;  %5447 = vmatprep.mubr.f32.mxu0 %v12297_v52 }
 0xdc1   :  { %9635 = vmatprep.subr.bf16.mxu0 %v10874_v23 }
 0xdc4   :  { %9637 = vmatpush1.bf16.msra.mxu0 %v10892_v31 }
 0xdc5   :  { %9639 = vmatprep.subr.bf16.mxu0 %v10913_v43 }
 0xdc8   :  { %9641 = vmatpush1.bf16.msra.mxu0 %v10964_v33 }
 0xdc9   :  { %9643 = vmatprep.subr.bf16.mxu0 %v10982_v2 }
 0xdcc   :  { %9645 = vmatpush1.bf16.msra.mxu0 %v10984_v56 }
 0xdcd   :  { %9743 = vmatprep.subr.bf16.mxu0 %v10810_v35 }
 0xdcf   :  { %5449 = vmatmul.mubr.f32.vlgmr.msra.gmra.mrb[6].mxu0 %v4889_v41 }
 0xdd0   :  { %9745 = vmatpush1.bf16.msra.mxu0 %v10862_v14  ;;  %6324 = vmatprep.mubr.f32.mxu0 %v12297_v52 }
 0xdd1   :  { %9747 = vmatprep.subr.bf16.mxu0 %v10874_v23 }
 0xdd4   :  { %9749 = vmatpush1.bf16.msra.mxu0 %v10892_v31 }
 0xdd5   :  { %9751 = vmatprep.subr.bf16.mxu0 %v10913_v43 }
 0xdd8   :  { %9753 = vmatpush1.bf16.msra.mxu0 %v10964_v33 }
 0xdd9   :  { %9755 = vmatprep.subr.bf16.mxu0 %v10982_v2 }
 0xddc   :  { %9757 = vmatpush1.bf16.msra.mxu0 %v10984_v56 }
 0xddd   :  { %9759 = vmatprep.subr.bf16.mxu0 %v10817_v53 }
 0xea2   :  { %v5450_v36 = vpop.f32.mrb[6].mxu0 }
 0xea3   :  { %v10038_v61 = vadd.f32 %v5450_v36, %v11465_v46  ;;  %v5452_v17 = vpop.f32.mrb[7].mxu0 }
 0xea4   :  { %v10039_v50 = vadd.f32 %v5452_v17, %v11468_v60 }
 0xea5   :  { %5463 = vrot.lane.b32.xlu1 %v10038_v61, %s10572_s8  ;;  %v5455_v22 = vadd.f32 %v10038_v61, %v11481_v6 }
 0xea6   :  { %v5485_v19 = vrot.slane %v10039_v50, 2 }
 0xea7   :  { %v8899_v42 = vmul.f32 -1.442695, %v5455_v22 }
 0xea8   :  { %5494 = vrot.lane.b32.xlu0 %v5485_v19, %s10572_s8  ;;  %v5487_v32 = vadd.f32 %v5485_v19, %v11478_v16 }
 0xea9   :  { %10284 = vpow2.f32 %v8899_v42 }
 0xeaa   :  { %v8900_v25 = vmul.f32 -1.442695, %v5487_v32 }
 0xeac   :  { %10286 = vpow2.f32 %v8900_v25 }
 0xeb3   :  { %v10285_v8 = vpop.eup %10284 }
 0xeb4   :  { %v5459_v41 = vadd.f32 1.0, %v10285_v8 }
 0xeb6   :  { %v10287_v21 = vpop.eup %10286  ;;  %10288 = vrcp.f32 %v5459_v41 }
 0xeb7   :  { %v5491_v44 = vadd.f32 1.0, %v10287_v21 }
 0xeb9   :  { %10290 = vrcp.f32 %v5491_v44 }
 0xec0   :  { %v10289_v40 = vpop.eup %10288 }
 0xec1   :  { %v5473_v21 = vsub.f32 1.0, %v10289_v40 }
 0xec3   :  { %v10291_v36 = vpop.eup %10290 }
 0xf17   :  { %v5464_v0 = vpop.permute.xlu1 %5463 }
 0xf18   :  { %v5466_v24 = vmul.f32 %v10289_v40, %v5464_v0 }
 0xf1a   :  { %v5495_v17 = vpop.permute.xlu0 %5494  ;;  %5468 = vrot.lane.b32.xlu1 %v5466_v24, %s10572_s8 }
 0xf1b   :  { %v5497_v61 = vmul.f32 %v10291_v36, %v5495_v17  ;;  %v5504_v17 = vsub.f32 1.0, %v10291_v36 }
 0xf1d   :  { %5499 = vrot.lane.b32.xlu0 %v5497_v61, %s10572_s8 }
 0xf21   :  { %5479 = vrot.lane.b32.xlu0 %v4805_v63, %s10574_s20 }
 0xf8c   :  { %v5469_v50 = vpop.permute.xlu1 %5468 }
 0xf8d   :  { %v5471_v19 = vadd.f32 %v5469_v50, %v11481_v6  ;;  %v5510_v50 = vmul.f32 %v10291_v36, %v11753_v28 }
 0xf8f   :  { %10292 = vtanh.f32 %v5471_v19  ;;  %v5500_v22 = vpop.permute.xlu0 %5499 }
 0xf90   :  { %v5502_v32 = vadd.f32 %v5500_v22, %v11478_v16 }
 0xf92   :  { %10294 = vtanh.f32 %v5502_v32 }
 0xf93   :  { %v5480_v8 = vpop.permute.xlu0 %5479 }
 0xf94   :  { %v5482_v44 = vmul.f32 %v10289_v40, %v5480_v8 }
 0xf99   :  { %v10293_v42 = vpop.eup %10292 }
 0xf9a   :  { %5475 = vrot.lane.b32.xlu1 %v10293_v42, %s10573_s6 }
 0xf9c   :  { %v10295_v25 = vpop.eup %10294 }
 0xf9e   :  { %5506 = vrot.lane.b32.xlu1 %v10295_v25, %s10573_s6 }
0x100c   :  { %v5476_v41 = vpop.permute.xlu1 %5475 }
0x100d   :  { %v5478_v0 = vmul.f32 %v5476_v41, %v5473_v21 }
0x100f   :  { %v11828_v63 = vadd.f32 %v5482_v44, %v5478_v0 }
0x1010   :  { %v5507_v24 = vpop.permute.xlu1 %5506 }
0x1011   :  { %5513 = vrot.lane.b32.xlu0 %v11828_v63, %s10573_s6  ;;  %v5509_v61 = vmul.f32 %v5507_v24, %v5504_v17 }
0x1013   :  { %v11833_v19 = vadd.f32 %v5510_v50, %v5509_v61 }
0x1015   :  { %v5517_v22 = vrot.slane %v11833_v19, 6 }
0x1083   :  { %v5514_v32 = vpop.permute.xlu0 %5513 }
0x1084   :  { %v11837_v42 = vsel %vm2645_vm9, %v5514_v32, %v5517_v22 }
0x1085   :  { %v5521_v40 = vsel %vm1933_vm10, %v11837_v42, 0 }
0x1086   :  { %v5604_v25 = vand.u32 4294901760, %v5521_v40 }
0x1088   :  { %v5605_v8 = vsub.f32 %v5521_v40, %v5604_v25 }
0x108a   :  { %v5606_v21 = vand.u32 4294901760, %v5605_v8 }
0x108c   :  { %v5607_v41 = vsub.f32 %v5605_v8, %v5606_v21 }
0x108e   :  { %v5608_v44 = vand.u32 4294901760, %v5607_v41 }
0x1090   :  { %5609 = vmatmul.mubr.f32.vlgmr.msra.gmra.mrb[10].mxu1 %v5608_v44 }
0x1091   :  { %9665 = vmatpush1.bf16.msra.mxu1 %v10988_v47  ;;  %5759 = vmatprep.mubr.f32.mxu1 %v12297_v52 }
0x1092   :  { %9667 = vmatprep.subr.bf16.mxu1 %v12329_v20 }
0x1095   :  { %9669 = vmatpush1.bf16.msra.mxu1 %v11081_v48 }
0x1096   :  { %9671 = vmatprep.subr.bf16.mxu1 %v11106_v45 }
0x1099   :  { %9673 = vmatpush1.bf16.msra.mxu1 %v11121_v7 }
0x109a   :  { %9675 = vmatprep.subr.bf16.mxu1 %v11134_v29 }
0x109d   :  { %9677 = vmatpush1.bf16.msra.mxu1 %v11146_v39 }
0x109e   :  { %9679 = vmatprep.subr.bf16.mxu1 %v10819_v54 }
0x10a0   :  { %5761 = vmatmul.mubr.f32.vlgmr.msra.gmra.mrb[10].mxu1 %v5604_v25 }
0x10a1   :  { %9681 = vmatpush1.bf16.msra.mxu1 %v11164_v30  ;;  %5863 = vmatprep.mubr.f32.mxu1 %v12297_v52 }
0x10a2   :  { %9683 = vmatprep.subr.bf16.mxu1 %v11172_v38 }
0x10a5   :  { %9685 = vmatpush1.bf16.msra.mxu1 %v11179_v26 }
0x10a6   :  { %9687 = vmatprep.subr.bf16.mxu1 %v11184_v62 }
0x10a9   :  { %9689 = vmatpush1.bf16.msra.mxu1 %v11195_v10 }
0x10aa   :  { %9691 = vmatprep.subr.bf16.mxu1 %v11200_v3 }
0x10ad   :  { %9693 = vmatpush1.bf16.msra.mxu1 %v12330_v5 }
0x10ae   :  { %9695 = vmatprep.subr.bf16.mxu1 %v10810_v35 }
0x10b0   :  { %5866 = vmatmul.mubr.f32.vlgmr.msra.gmra.mrb[10].mxu1 %v5605_v8 }
0x10b1   :  { %9697 = vmatpush1.bf16.msra.mxu1 %v10862_v14  ;;  %5952 = vmatprep.mubr.f32.mxu1 %v12297_v52 }
0x10b2   :  { %9699 = vmatprep.subr.bf16.mxu1 %v10874_v23 }
0x10b5   :  { %9701 = vmatpush1.bf16.msra.mxu1 %v10892_v31 }
0x10b6   :  { %9703 = vmatprep.subr.bf16.mxu1 %v10913_v43 }
0x10b9   :  { %9705 = vmatpush1.bf16.msra.mxu1 %v10964_v33 }
0x10ba   :  { %9707 = vmatprep.subr.bf16.mxu1 %v10982_v2 }
0x10bd   :  { %9709 = vmatpush1.bf16.msra.mxu1 %v10984_v56 }
0x10be   :  { %9711 = vmatprep.subr.bf16.mxu1 %v10821_v55 }
0x10c0   :  { %5956 = vmatmul.mubr.f32.vlgmr.msra.gmra.mrb[10].mxu1 %v5606_v21 }
0x10c1   :  { %9713 = vmatpush1.bf16.msra.mxu1 %v11275_v4  ;;  %6074 = vmatprep.mubr.f32.mxu1 %v12297_v52 }
0x10c2   :  { %9715 = vmatprep.subr.bf16.mxu1 %v11299_v34 }
0x10c5   :  { %9717 = vmatpush1.bf16.msra.mxu1 %v11309_v58 }
0x10c6   :  { %9719 = vmatprep.subr.bf16.mxu1 %v11325_v57 }
0x10c9   :  { %9721 = vmatpush1.bf16.msra.mxu1 %v11339_v37 }
0x10ca   :  { %9723 = vmatprep.subr.bf16.mxu1 %v11358_v11 }
0x10cd   :  { %9725 = vmatpush1.bf16.msra.mxu1 %v11373_v15 }
0x10ce   :  { %9727 = vmatprep.subr.bf16.mxu1 %v10810_v35 }
0x10d0   :  { %6076 = vmatmul.mubr.f32.vlgmr.msra.gmra.mrb[10].mxu1 %v5604_v25 }
0x10d1   :  { %9729 = vmatpush1.bf16.msra.mxu1 %v10862_v14  ;;  %6162 = vmatprep.mubr.f32.mxu1 %v12297_v52 }
0x10d2   :  { %9731 = vmatprep.subr.bf16.mxu1 %v10874_v23 }
0x10d5   :  { %9733 = vmatpush1.bf16.msra.mxu1 %v10892_v31 }
0x10d6   :  { %9735 = vmatprep.subr.bf16.mxu1 %v10913_v43 }
0x10d9   :  { %9737 = vmatpush1.bf16.msra.mxu1 %v10964_v33 }
0x10da   :  { %9739 = vmatprep.subr.bf16.mxu1 %v10982_v2 }
0x10dd   :  { %9741 = vmatpush1.bf16.msra.mxu1 %v10984_v56 }
0x10de   :  { %9839 = vmatprep.subr.bf16.mxu1 %v10810_v35 }
0x10e0   :  { %6164 = vmatmul.mubr.f32.vlgmr.msra.gmra.mrb[10].mxu1 %v5604_v25 }
0x10e1   :  { %9841 = vmatpush1.bf16.msra.mxu1 %v10862_v14  ;;  %7043 = vmatprep.mubr.f32.mxu1 %v12297_v52 }
0x10e2   :  { %9843 = vmatprep.subr.bf16.mxu1 %v10874_v23 }
0x10e5   :  { %9845 = vmatpush1.bf16.msra.mxu1 %v10892_v31 }
0x10e6   :  { %9847 = vmatprep.subr.bf16.mxu1 %v10913_v43 }
0x10e9   :  { %9849 = vmatpush1.bf16.msra.mxu1 %v10964_v33 }
0x10ea   :  { %9851 = vmatprep.subr.bf16.mxu1 %v10982_v2 }
0x10ed   :  { %9853 = vmatpush1.bf16.msra.mxu1 %v10984_v56 }
0x10ee   :  { %9855 = vmatprep.subr.bf16.mxu1 %v10817_v53 }
0x11b3   :  { %v6165_v28 = vpop.f32.mrb[10].mxu1 }
0x11b4   :  { %v10040_v36 = vadd.f32 %v6165_v28, %v11465_v46  ;;  %v6167_v0 = vpop.f32.mrb[11].mxu1 }
0x11b5   :  { %v10041_v24 = vadd.f32 %v6167_v0, %v11468_v60 }
0x11b6   :  { %v6171_v17 = vrot.slane %v10040_v36, 6 }
0x11b7   :  { %v6203_v61 = vrot.slane %v10041_v24, 4 }
0x11b8   :  { %6180 = vrot.lane.b32.xlu1 %v6171_v17, %s10572_s8  ;;  %v6173_v50 = vadd.f32 %v6171_v17, %v11481_v6  ;;  %v6196_v17 = vrot.slane %v11837_v42, 6 }
0x11b9   :  { %6212 = vrot.lane.b32.xlu0 %v6203_v61, %s10572_s8  ;;  %v6205_v22 = vadd.f32 %v6203_v61, %v11478_v16 }
0x11ba   :  { %v8901_v32 = vmul.f32 -1.442695, %v6173_v50 }
0x11bb   :  { %v8902_v40 = vmul.f32 -1.442695, %v6205_v22 }
0x11bc   :  { %10296 = vpow2.f32 %v8901_v32 }
0x11bd   :  { %10298 = vpow2.f32 %v8902_v40 }
0x11c6   :  { %v10297_v53 = vpop.eup %10296 }
0x11c7   :  { %v10299_v25 = vpop.eup %10298  ;;  %v6177_v8 = vadd.f32 1.0, %v10297_v53 }
0x11c8   :  { %v6209_v21 = vadd.f32 1.0, %v10299_v25 }
0x11c9   :  { %10300 = vrcp.f32 %v6177_v8 }
0x11ca   :  { %10302 = vrcp.f32 %v6209_v21 }
0x11d3   :  { %v10301_v41 = vpop.eup %10300 }
0x11d4   :  { %v10303_v28 = vpop.eup %10302  ;;  %v6190_v8 = vsub.f32 1.0, %v10301_v41 }
0x122a   :  { %v6181_v44 = vpop.permute.xlu1 %6180 }
0x122b   :  { %v6183_v36 = vmul.f32 %v10301_v41, %v6181_v44  ;;  %v6213_v0 = vpop.permute.xlu0 %6212 }
0x122c   :  { %v6215_v24 = vmul.f32 %v10303_v28, %v6213_v0 }
0x122d   :  { %6185 = vrot.lane.b32.xlu1 %v6183_v36, %s10572_s8 }
0x122e   :  { %6217 = vrot.lane.b32.xlu0 %v6215_v24, %s10572_s8 }
0x1232   :  { %6197 = vrot.lane.b32.xlu0 %v6196_v17, %s10574_s20  ;;  %v6222_v17 = vsub.f32 1.0, %v10303_v28 }
0x129f   :  { %v6186_v61 = vpop.permute.xlu1 %6185 }
0x12a0   :  { %v6188_v50 = vadd.f32 %v6186_v61, %v11481_v6  ;;  %v6218_v22 = vpop.permute.xlu0 %6217  ;;  %v6228_v61 = vrot.slane %v11837_v42, 4 }
0x12a1   :  { %v6220_v32 = vadd.f32 %v6218_v22, %v11478_v16 }
0x12a2   :  { %10304 = vtanh.f32 %v6188_v50  ;;  %v6230_v22 = vmul.f32 %v10303_v28, %v6228_v61 }
0x12a3   :  { %10306 = vtanh.f32 %v6220_v32 }
0x12a4   :  { %v6198_v25 = vpop.permute.xlu0 %6197 }
0x12a5   :  { %v6200_v44 = vmul.f32 %v10301_v41, %v6198_v25 }
0x12ac   :  { %v10305_v40 = vpop.eup %10304 }
0x12ad   :  { %6192 = vrot.lane.b32.xlu1 %v10305_v40, %s10573_s6  ;;  %v10307_v53 = vpop.eup %10306 }
0x12b1   :  { %6224 = vrot.lane.b32.xlu1 %v10307_v53, %s10573_s6 }
0x131f   :  { %v6193_v21 = vpop.permute.xlu1 %6192 }
0x1320   :  { %v6195_v36 = vmul.f32 %v6193_v21, %v6190_v8 }
0x1322   :  { %v11909_v0 = vadd.f32 %v6200_v44, %v6195_v36 }
0x1323   :  { %v6225_v24 = vpop.permute.xlu1 %6224 }
0x1324   :  { %6233 = vrot.lane.b32.xlu0 %v11909_v0, %s10573_s6  ;;  %v6227_v50 = vmul.f32 %v6225_v24, %v6222_v17 }
0x1326   :  { %v11914_v32 = vadd.f32 %v6230_v22, %v6227_v50 }
0x1328   :  { %v6237_v40 = vrot.slane %v11914_v32, 2 }
0x1396   :  { %v6234_v53 = vpop.permute.xlu0 %6233 }
0x1397   :  { %v11918_v59 = vsel %vm2645_vm9, %v6234_v53, %v6237_v40 }
0x1398   :  { %v6241_v41 = vrot.slane %v11918_v59, 2 }
0x139a   :  { %v6242_v25 = vsel %vm1933_vm10, %v6241_v41, 0 }
0x139b   :  { %v6325_v8 = vand.u32 4294901760, %v6242_v25 }
0x139d   :  { %v6326_v21 = vsub.f32 %v6242_v25, %v6325_v8 }
0x139f   :  { %v6327_v44 = vand.u32 4294901760, %v6326_v21 }
0x13a1   :  { %v6328_v36 = vsub.f32 %v6326_v21, %v6327_v44 }
0x13a3   :  { %v6329_v1 = vand.u32 4294901760, %v6328_v36 }
0x13a5   :  { %6330 = vmatmul.mubr.f32.vlgmr.msra.gmra.mrb[8].mxu0 %v6329_v1 }
0x13a6   :  { %9761 = vmatpush1.bf16.msra.mxu0 %v10988_v47  ;;  %6480 = vmatprep.mubr.f32.mxu0 %v12297_v52 }
0x13a7   :  { %9763 = vmatprep.subr.bf16.mxu0 %v12329_v20 }
0x13aa   :  { %9765 = vmatpush1.bf16.msra.mxu0 %v11081_v48 }
0x13ab   :  { %9767 = vmatprep.subr.bf16.mxu0 %v11106_v45 }
0x13ae   :  { %9769 = vmatpush1.bf16.msra.mxu0 %v11121_v7 }
0x13af   :  { %9771 = vmatprep.subr.bf16.mxu0 %v11134_v29 }
0x13b2   :  { %9773 = vmatpush1.bf16.msra.mxu0 %v11146_v39 }
0x13b3   :  { %9775 = vmatprep.subr.bf16.mxu0 %v10819_v54 }
0x13b5   :  { %6482 = vmatmul.mubr.f32.vlgmr.msra.gmra.mrb[8].mxu0 %v6325_v8 }
0x13b6   :  { %9777 = vmatpush1.bf16.msra.mxu0 %v11164_v30  ;;  %6584 = vmatprep.mubr.f32.mxu0 %v12297_v52 }
0x13b7   :  { %9779 = vmatprep.subr.bf16.mxu0 %v11172_v38 }
0x13ba   :  { %9781 = vmatpush1.bf16.msra.mxu0 %v11179_v26 }
0x13bb   :  { %9783 = vmatprep.subr.bf16.mxu0 %v11184_v62 }
0x13be   :  { %9785 = vmatpush1.bf16.msra.mxu0 %v11195_v10 }
0x13bf   :  { %9787 = vmatprep.subr.bf16.mxu0 %v11200_v3 }
0x13c2   :  { %9789 = vmatpush1.bf16.msra.mxu0 %v12330_v5 }
0x13c3   :  { %9791 = vmatprep.subr.bf16.mxu0 %v10810_v35 }
0x13c5   :  { %6587 = vmatmul.mubr.f32.vlgmr.msra.gmra.mrb[8].mxu0 %v6326_v21 }
0x13c6   :  { %9793 = vmatpush1.bf16.msra.mxu0 %v10862_v14  ;;  %6673 = vmatprep.mubr.f32.mxu0 %v12297_v52 }
0x13c7   :  { %9795 = vmatprep.subr.bf16.mxu0 %v10874_v23 }
0x13ca   :  { %9797 = vmatpush1.bf16.msra.mxu0 %v10892_v31 }
0x13cb   :  { %9799 = vmatprep.subr.bf16.mxu0 %v10913_v43 }
0x13ce   :  { %9801 = vmatpush1.bf16.msra.mxu0 %v10964_v33 }
0x13cf   :  { %9803 = vmatprep.subr.bf16.mxu0 %v10982_v2 }
0x13d2   :  { %9805 = vmatpush1.bf16.msra.mxu0 %v10984_v56 }
0x13d3   :  { %9807 = vmatprep.subr.bf16.mxu0 %v10821_v55 }
0x13d5   :  { %6677 = vmatmul.mubr.f32.vlgmr.msra.gmra.mrb[8].mxu0 %v6327_v44 }
0x13d6   :  { %9809 = vmatpush1.bf16.msra.mxu0 %v11275_v4  ;;  %6795 = vmatprep.mubr.f32.mxu0 %v12297_v52 }
0x13d7   :  { %9811 = vmatprep.subr.bf16.mxu0 %v11299_v34 }
0x13da   :  { %9813 = vmatpush1.bf16.msra.mxu0 %v11309_v58 }
0x13db   :  { %9815 = vmatprep.subr.bf16.mxu0 %v11325_v57 }
0x13de   :  { %9817 = vmatpush1.bf16.msra.mxu0 %v11339_v37 }
0x13df   :  { %9819 = vmatprep.subr.bf16.mxu0 %v11358_v11 }
0x13e2   :  { %9821 = vmatpush1.bf16.msra.mxu0 %v11373_v15 }
0x13e3   :  { %9823 = vmatprep.subr.bf16.mxu0 %v10810_v35 }
0x13e5   :  { %6797 = vmatmul.mubr.f32.vlgmr.msra.gmra.mrb[8].mxu0 %v6325_v8 }
0x13e6   :  { %9825 = vmatpush1.bf16.msra.mxu0 %v10862_v14  ;;  %6883 = vmatprep.mubr.f32.mxu0 %v12297_v52 }
0x13e7   :  { %9827 = vmatprep.subr.bf16.mxu0 %v10874_v23 }
0x13ea   :  { %9829 = vmatpush1.bf16.msra.mxu0 %v10892_v31 }
0x13eb   :  { %9831 = vmatprep.subr.bf16.mxu0 %v10913_v43 }
0x13ee   :  { %9833 = vmatpush1.bf16.msra.mxu0 %v10964_v33 }
0x13ef   :  { %9835 = vmatprep.subr.bf16.mxu0 %v10982_v2 }
0x13f2   :  { %9837 = vmatpush1.bf16.msra.mxu0 %v10984_v56 }
0x13f5   :  { %6885 = vmatmul.mubr.f32.vlgmr.msra.gmra.mrb[8].mxu0 %v6325_v8 }
0x13f6   :  { %7791 = vmatprep.mubr.f32.mxu0 %v12297_v52 }
0x14c8   :  { %v6886_v1 = vpop.f32.mrb[8].mxu0 }
0x14c9   :  { %v10042_v42 = vadd.f32 %v6886_v1, %v11465_v46  ;;  %v6888_v28 = vpop.f32.mrb[9].mxu0 }
0x14ca   :  { %v10043_v24 = vadd.f32 %v6888_v28, %v11468_v60 }
0x14cb   :  { %v6892_v17 = vrot.slane %v10042_v42, 4 }
0x14cc   :  { %v6924_v61 = vrot.slane %v10043_v24, 6 }
0x14cd   :  { %6901 = vrot.lane.b32.xlu1 %v6892_v17, %s10572_s8  ;;  %v6894_v50 = vadd.f32 %v6892_v17, %v11481_v6  ;;  %v6917_v17 = vrot.slane %v11918_v59, 6 }
0x14ce   :  { %6933 = vrot.lane.b32.xlu0 %v6924_v61, %s10572_s8  ;;  %v6926_v22 = vadd.f32 %v6924_v61, %v11478_v16 }
0x14cf   :  { %v8903_v40 = vmul.f32 -1.442695, %v6894_v50 }
0x14d0   :  { %v8904_v53 = vmul.f32 -1.442695, %v6926_v22 }
0x14d1   :  { %10308 = vpow2.f32 %v8903_v40 }
0x14d2   :  { %10310 = vpow2.f32 %v8904_v53 }
0x14db   :  { %v10309_v41 = vpop.eup %10308 }
0x14dc   :  { %v10311_v25 = vpop.eup %10310  ;;  %v6898_v8 = vadd.f32 1.0, %v10309_v41 }
0x14dd   :  { %v6930_v21 = vadd.f32 1.0, %v10311_v25 }
0x14de   :  { %10312 = vrcp.f32 %v6898_v8 }
0x14df   :  { %10314 = vrcp.f32 %v6930_v21 }
0x14e8   :  { %v10313_v44 = vpop.eup %10312 }
0x14e9   :  { %v10315_v1 = vpop.eup %10314  ;;  %v6911_v8 = vsub.f32 1.0, %v10313_v44 }
0x153f   :  { %v6902_v36 = vpop.permute.xlu1 %6901 }
0x1540   :  { %v6904_v42 = vmul.f32 %v10313_v44, %v6902_v36  ;;  %v6934_v28 = vpop.permute.xlu0 %6933 }
0x1541   :  { %v6936_v24 = vmul.f32 %v10315_v1, %v6934_v28 }
0x1542   :  { %6906 = vrot.lane.b32.xlu1 %v6904_v42, %s10572_s8 }
0x1543   :  { %6938 = vrot.lane.b32.xlu0 %v6936_v24, %s10572_s8  ;;  %v7674_v24 = vsel %vm7669_vm11, %v11828_v63, %v11909_v0 }
0x1547   :  { %6918 = vrot.lane.b32.xlu0 %v6917_v17, %s10574_s20 }
0x15b4   :  { %v6907_v61 = vpop.permute.xlu1 %6906 }
0x15b5   :  { %v6909_v50 = vadd.f32 %v6907_v61, %v11481_v6  ;;  %v6939_v22 = vpop.permute.xlu0 %6938 }
0x15b6   :  { %v6941_v40 = vadd.f32 %v6939_v22, %v11478_v16 }
0x15b7   :  { %10316 = vtanh.f32 %v6909_v50  ;;  %v6943_v50 = vsub.f32 1.0, %v10315_v1 }
0x15b8   :  { %10318 = vtanh.f32 %v6941_v40  ;;  %v6949_v40 = vmul.f32 %v10315_v1, %v11918_v59  ;;  %v7680_v1 = vsel %vm7669_vm11, %v11749_v12, %v11664_v9  ;;  %v7684_v9 = vld [vmem:[%s12253_s9 + $0x8] sm:$0xff]  ;;  %v7686_v12 = vld [vmem:[%s12253_s9 + $0x18] sm:$0xff] }
0x15b9   :  { %v6919_v25 = vpop.permute.xlu0 %6918 }
0x15ba   :  { %v6921_v36 = vmul.f32 %v10313_v44, %v6919_v25 }
0x15c1   :  { %v10317_v53 = vpop.eup %10316 }
0x15c2   :  { %6913 = vrot.lane.b32.xlu1 %v10317_v53, %s10573_s6  ;;  %v10319_v41 = vpop.eup %10318 }
0x15c6   :  { %6945 = vrot.lane.b32.xlu1 %v10319_v41, %s10573_s6 }
0x1634   :  { %v6914_v21 = vpop.permute.xlu1 %6913 }
0x1635   :  { %v6916_v42 = vmul.f32 %v6914_v21, %v6911_v8 }
0x1637   :  { %v6922_v28 = vadd.f32 %v6921_v36, %v6916_v42 }
0x1638   :  { %v6946_v61 = vpop.permute.xlu1 %6945 }
0x1639   :  { %6952 = vrot.lane.b32.xlu0 %v6922_v28, %s10573_s6  ;;  %v11986_v17 = vsel %vm7671_vm12, %v7674_v24, %v6922_v28  ;;  %v6948_v22 = vmul.f32 %v6946_v61, %v6943_v50  ;;  %v7681_v50 = vsel %vm7671_vm12, %v7680_v1, %v11580_v51 }
0x163b   :  { %v11989_v53 = vadd.f32 %v6949_v40, %v6948_v22  ;;  %v7682_v22 = vsel %vm748_vm5, %v7681_v50, %v11499_v13  ;;  %v9942_v40 = vpack.c.bf16 %v7686_v12, %v7684_v9 }
0x163d   :  { %v6956_v44 = vrot.slane %v11989_v53, 6 }
0x16ab   :  { %v6953_v41 = vpop.permute.xlu0 %6952 }
0x16ac   :  { %v11993_v25 = vsel %vm2645_vm9, %v6953_v41, %v6956_v44 }
0x16ad   :  { %v6960_v63 = vrot.slane %v11993_v25, 4  ;;  %v7636_v24 = vrot.slane %v11993_v25, 6 }
0x16af   :  { %v6961_v0 = vsel %vm1933_vm10, %v6960_v63, 0 }
0x16b0   :  { %v7044_v8 = vand.u32 4294901760, %v6961_v0 }
0x16b2   :  { %v7045_v21 = vsub.f32 %v6961_v0, %v7044_v8 }
0x16b4   :  { %v7046_v36 = vand.u32 4294901760, %v7045_v21 }
0x16b6   :  { %v7047_v42 = vsub.f32 %v7045_v21, %v7046_v36 }
0x16b8   :  { %v7048_v28 = vand.u32 4294901760, %v7047_v42 }
0x16ba   :  { %7049 = vmatmul.mubr.f32.vlgmr.msra.gmra.mrb[12].mxu1 %v7048_v28 }
0x16bb   :  { %9857 = vmatpush1.bf16.msra.mxu1 %v10988_v47  ;;  %7199 = vmatprep.mubr.f32.mxu1 %v12297_v52 }
0x16bc   :  { %9859 = vmatprep.subr.bf16.mxu1 %v12329_v20  ;;  %v7695_v20 = vld [vmem:[%s12253_s9 + $0x60] sm:$0xff] }
0x16bf   :  { %9861 = vmatpush1.bf16.msra.mxu1 %v11081_v48 }
0x16c0   :  { %9863 = vmatprep.subr.bf16.mxu1 %v11106_v45 }
0x16c3   :  { %9865 = vmatpush1.bf16.msra.mxu1 %v11121_v7 }
0x16c4   :  { %9867 = vmatprep.subr.bf16.mxu1 %v11134_v29 }
0x16c7   :  { %9869 = vmatpush1.bf16.msra.mxu1 %v11146_v39 }
0x16c8   :  { %9871 = vmatprep.subr.bf16.mxu1 %v10819_v54 }
0x16ca   :  { %7201 = vmatmul.mubr.f32.vlgmr.msra.gmra.mrb[12].mxu1 %v7044_v8 }
0x16cb   :  { %9873 = vmatpush1.bf16.msra.mxu1 %v11164_v30  ;;  %7303 = vmatprep.mubr.f32.mxu1 %v12297_v52 }
0x16cc   :  { %9875 = vmatprep.subr.bf16.mxu1 %v11172_v38 }
0x16cf   :  { %9877 = vmatpush1.bf16.msra.mxu1 %v11179_v26 }
0x16d0   :  { %9879 = vmatprep.subr.bf16.mxu1 %v11184_v62 }
0x16d3   :  { %9881 = vmatpush1.bf16.msra.mxu1 %v11195_v10 }
0x16d4   :  { %9883 = vmatprep.subr.bf16.mxu1 %v11200_v3 }
0x16d7   :  { %9885 = vmatpush1.bf16.msra.mxu1 %v12330_v5  ;;  %v7697_v5 = vld [vmem:[%s12253_s9 + $0x70] sm:$0xff] }
0x16d8   :  { %9887 = vmatprep.subr.bf16.mxu1 %v10810_v35  ;;  %v9940_v61 = vpack.c.bf16 %v7697_v5, %v7695_v20  ;;  %v10575_v5 = vmov -1e+30  }
0x16da   :  { %7306 = vmatmul.mubr.f32.vlgmr.msra.gmra.mrb[12].mxu1 %v7045_v21 }
0x16db   :  { %9889 = vmatpush1.bf16.msra.mxu1 %v10862_v14  ;;  %7392 = vmatprep.mubr.f32.mxu1 %v12297_v52 }
0x16dc   :  { %9891 = vmatprep.subr.bf16.mxu1 %v10874_v23 }
0x16df   :  { %9893 = vmatpush1.bf16.msra.mxu1 %v10892_v31 }
0x16e0   :  { %9895 = vmatprep.subr.bf16.mxu1 %v10913_v43 }
0x16e3   :  { %9897 = vmatpush1.bf16.msra.mxu1 %v10964_v33 }
0x16e4   :  { %9899 = vmatprep.subr.bf16.mxu1 %v10982_v2 }
0x16e7   :  { %9901 = vmatpush1.bf16.msra.mxu1 %v10984_v56 }
0x16e8   :  { %9903 = vmatprep.subr.bf16.mxu1 %v10821_v55 }
0x16ea   :  { %7396 = vmatmul.mubr.f32.vlgmr.msra.gmra.mrb[12].mxu1 %v7046_v36 }
0x16eb   :  { %9905 = vmatpush1.bf16.msra.mxu1 %v11275_v4  ;;  %7514 = vmatprep.mubr.f32.mxu1 %v12297_v52  ;;  %v7692_v4 = vld [vmem:[%s12253_s9 + $0x48] sm:$0xff] }
0x16ec   :  { %9907 = vmatprep.subr.bf16.mxu1 %v11299_v34  ;;  %v7694_v34 = vld [vmem:[%s12253_s9 + $0x58] sm:$0xff] }
0x16ef   :  { %9909 = vmatpush1.bf16.msra.mxu1 %v11309_v58  ;;  %v7691_v58 = vld [vmem:[%s12253_s9 + $0x40] sm:$0xff] }
0x16f0   :  { %9911 = vmatprep.subr.bf16.mxu1 %v11325_v57 }
0x16f3   :  { %9913 = vmatpush1.bf16.msra.mxu1 %v11339_v37  ;;  %v9934_v37 = vpack.c.bf16 %v7694_v34, %v7692_v4 }
0x16f4   :  { %9915 = vmatprep.subr.bf16.mxu1 %v11358_v11  ;;  %v7693_v11 = vld [vmem:[%s12253_s9 + $0x50] sm:$0xff] }
0x16f5   :  { %9935 = vmatprep.subr.bf16.mxu0 %v9934_v37  ;;  %v12334_v37 = vld [vmem:[#allocation26_spill] sm:$0xff] }
0x16f7   :  { %9917 = vmatpush1.bf16.msra.mxu1 %v11373_v15  ;;  %v7696_v15 = vld [vmem:[%s12253_s9 + $0x68] sm:$0xff] }
0x16f8   :  { %9919 = vmatprep.subr.bf16.mxu1 %v10810_v35 }
0x16fa   :  { %7516 = vmatmul.mubr.f32.vlgmr.msra.gmra.mrb[12].mxu1 %v7044_v8 }
0x16fb   :  { %9921 = vmatpush1.bf16.msra.mxu1 %v10862_v14  ;;  %7602 = vmatprep.mubr.f32.mxu1 %v12297_v52 }
0x16fc   :  { %9923 = vmatprep.subr.bf16.mxu1 %v10874_v23 }
0x16ff   :  { %9925 = vmatpush1.bf16.msra.mxu1 %v10892_v31 }
0x1700   :  { %9927 = vmatprep.subr.bf16.mxu1 %v10913_v43 }
0x1703   :  { %9929 = vmatpush1.bf16.msra.mxu1 %v10964_v33 }
0x1704   :  { %9931 = vmatprep.subr.bf16.mxu1 %v10982_v2 }
0x1707   :  { %9933 = vmatpush1.bf16.msra.mxu1 %v10984_v56 }
0x170a   :  { %7604 = vmatmul.mubr.f32.vlgmr.msra.gmra.mrb[12].mxu1 %v7044_v8 }
0x17dd   :  { %v7605_v54 = vpop.f32.mrb[12].mxu1 }
0x17de   :  { %v10044_v35 = vadd.f32 %v7605_v54, %v11465_v46  ;;  %v7607_v55 = vpop.f32.mrb[13].mxu1  ;;  %v7698_v46 = vld [vmem:[%s12253_s9 + $0x78] sm:$0xff] }
0x17df   :  { %v10045_v59 = vadd.f32 %v7607_v55, %v11468_v60 }
0x17e0   :  { %v7611_v14 = vrot.slane %v10044_v35, 2 }
0x17e1   :  { %7650 = vrot.lane.b32.xlu1 %v10045_v59, %s10572_s8  ;;  %v7642_v23 = vadd.f32 %v10045_v59, %v11478_v16 }
0x17e2   :  { %7620 = vrot.lane.b32.xlu0 %v7611_v14, %s10572_s8  ;;  %v7613_v31 = vadd.f32 %v7611_v14, %v11481_v6 }
0x17e3   :  { %v8906_v43 = vmul.f32 -1.442695, %v7642_v23  ;;  %v7689_v23 = vld [vmem:[%s12253_s9 + $0x30] sm:$0xff] }
0x17e4   :  { %v8905_v33 = vmul.f32 -1.442695, %v7613_v31 }
0x17e5   :  { %10320 = vpow2.f32 %v8906_v43 }
0x17e6   :  { %10322 = vpow2.f32 %v8905_v33 }
0x17ef   :  { %v10321_v56 = vpop.eup %10320 }
0x17f0   :  { %v10323_v48 = vpop.eup %10322  ;;  %v7646_v2 = vadd.f32 1.0, %v10321_v56 }
0x17f1   :  { %v7617_v47 = vadd.f32 1.0, %v10323_v48 }
0x17f2   :  { %10324 = vrcp.f32 %v7646_v2  ;;  %v7699_v2 = vld [vmem:[#allocation10] sm:$0x3] }
0x17f3   :  { %10326 = vrcp.f32 %v7617_v47  ;;  %v7895_v47 = vrot.slane %v7699_v2, %v11459_v18 }
0x17fc   :  { %v10325_v45 = vpop.eup %10324 }
0x17fd   :  { %v10327_v29 = vpop.eup %10326  ;;  %v7660_v44 = vsub.f32 1.0, %v10325_v45  ;;  %v7667_v51 = vmul.f32 %v10325_v45, %v6960_v63 }
0x17fe   :  { %v7630_v21 = vsub.f32 1.0, %v10327_v29 }
0x1853   :  { %v7651_v7 = vpop.permute.xlu1 %7650 }
0x1854   :  { %v7653_v39 = vmul.f32 %v10325_v45, %v7651_v7  ;;  %v7621_v30 = vpop.permute.xlu0 %7620  ;;  %v7899_v45 = vrot.slane %v7699_v2, %v11462_v49 }
0x1855   :  { %v7623_v38 = vmul.f32 %v10327_v29, %v7621_v30 }
0x1856   :  { %7655 = vrot.lane.b32.xlu1 %v7653_v39, %s10572_s8 }
0x1857   :  { %7625 = vrot.lane.b32.xlu0 %v7623_v38, %s10572_s8 }
0x18c8   :  { %v7656_v26 = vpop.permute.xlu1 %7655 }
0x18c9   :  { %v7658_v62 = vadd.f32 %v7656_v26, %v11478_v16  ;;  %v7626_v10 = vpop.permute.xlu0 %7625  ;;  %v9936_v16 = vpack.c.bf16 %v7693_v11, %v7691_v58  ;;  %v7908_v11 = vadd.s32 8, %v12334_v37 }
0x18ca   :  { %v7628_v3 = vadd.f32 %v7626_v10, %v11481_v6  ;;  %v9938_v6 = vpack.c.bf16 %v7698_v46, %v7696_v15  ;;  %v12335_v15 = vld [vmem:[#allocation23_spill] sm:$0xff] }
0x18cb   :  { %10328 = vtanh.f32 %v7658_v62  ;;  %9937 = vmatpush1.bf16.msra.mxu0 %v9936_v16  ;;  %v7910_v46 = vxor.u32 %v7908_v11, %v12335_v15 }
0x18cc   :  { %10330 = vtanh.f32 %v7628_v3  ;;  %9939 = vmatprep.subr.bf16.mxu0 %v9938_v6 }
0x18cd   :  { %v7912_v16 = vand.u32 1, %v7910_v46 }
0x18cf   :  { %9941 = vmatpush1.bf16.msra.mxu0 %v9940_v61  ;;  %vm7914_vm14 = vcmp.eq.s32.totalorder %v7912_v16, 0 }
0x18d0   :  { %9943 = vmatprep.subr.bf16.mxu0 %v9942_v40  ;;  %v7916_v1 = vsel %vm7914_vm14, 0.0, %v10575_v5 }
0x18d5   :  { %v10329_v57 = vpop.eup %10328 }
0x18d6   :  { %v10331_v60 = vpop.eup %10330  ;;  %7662 = vrot.lane.b32.xlu1 %v10329_v57, %s10573_s6 }
0x18d7   :  { %7632 = vrot.lane.b32.xlu0 %v10331_v60, %s10573_s6  ;;  %v7909_v60 = vxor.u32 %v12334_v37, %v12335_v15 }
0x18d9   :  { %v7911_v6 = vand.u32 1, %v7909_v60 }
0x18da   :  { %7637 = vrot.lane.b32.xlu1 %v7636_v24, %s10574_s20 }
0x18db   :  { %vm7913_vm15 = vcmp.eq.s32.totalorder %v7911_v6, 0 }
0x18dc   :  { %v7915_v50 = vsel %vm7913_vm15, 0.0, %v10575_v5  ;;  %v7707_v5 = vld [vmem:[#allocation11 + $0x38] sm:$0xff] }
0x18de   :  { %7721 = vrot.lane.b32.xlu1 %v7682_v22, %s10573_s6 }
0x1948   :  { %v7663_v41 = vpop.permute.xlu1 %7662 }
0x1949   :  { %v7665_v0 = vmul.f32 %v7663_v41, %v7660_v44  ;;  %v7633_v8 = vpop.permute.xlu0 %7632 }
0x194a   :  { %v7635_v42 = vmul.f32 %v7633_v8, %v7630_v21 }
0x194b   :  { %v7668_v13 = vadd.f32 %v7667_v51, %v7665_v0 }
0x194c   :  { %v7638_v36 = vpop.permute.xlu1 %7637 }
0x194d   :  { %v7640_v28 = vmul.f32 %v10327_v29, %v7638_v36  ;;  %v7677_v54 = vsel %vm7669_vm11, %v7668_v13, %v11989_v53  ;;  %v7683_v53 = vld [vmem:[%s12253_s9] sm:$0xff] }
0x194e   :  { %v7678_v35 = vsel %vm7671_vm12, %v7677_v54, %v11914_v32  ;;  %v7685_v32 = vld [vmem:[%s12253_s9 + $0x10] sm:$0xff] }
0x194f   :  { %v7641_v55 = vadd.f32 %v7640_v28, %v7635_v42  ;;  %v7679_v59 = vsel %vm748_vm5, %v7678_v35, %v11833_v19  ;;  %v7688_v19 = vld [vmem:[%s12253_s9 + $0x28] sm:$0xff]  ;;  %v9944_v63 = vpack.c.bf16 %v7685_v32, %v7683_v53 }
0x1950   :  { %7719 = vrot.lane.b32.xlu0 %v7679_v59, %s10573_s6  ;;  %v7722_v33 = vpop.permute.xlu1 %7721 }
0x1951   :  { %v7676_v25 = vsel %vm748_vm5, %v11986_v17, %v7641_v55  ;;  %v7690_v17 = vld [vmem:[%s12253_s9 + $0x38] sm:$0xff] }
0x1952   :  { %7808 = vrot.lane.b32.xlu1 %v7676_v25, %s10573_s6  ;;  %v9946_v14 = vpack.c.bf16 %v7690_v17, %v7688_v19 }
0x1954   :  { %7806 = vrot.lane.b32.xlu0 %v11745_v27, %s10573_s6  ;;  %v7687_v27 = vld [vmem:[%s12253_s9 + $0x20] sm:$0xff] }
0x1955   :  { %v9948_v43 = vpack.c.bf16 %v7689_v23, %v7687_v27 }
0x19c2   :  { %v7720_v31 = vpop.permute.xlu0 %7719 }
0x19c3   :  { %8907 = vmatmul.mubr.msk.f32.vlgmr.msra.gmra.mrb[10].mxu0 %vm2645_vm9, %v7720_v31 }
0x19c4   :  { %9945 = vmatpush1.bf16.msra.mxu0 %v9944_v63  ;;  %7797 = vmatprep.mubr.f32.mxu0 %v12297_v52  ;;  %v7809_v48 = vpop.permute.xlu1 %7808 }
0x19c5   :  { %9947 = vmatprep.subr.bf16.mxu0 %v9946_v14 }
0x19c6   :  { %v7807_v56 = vpop.permute.xlu0 %7806 }
0x19c7   :  { %8908 = vmatmul.mubr.msk.f32.gmra.mrb[12].mxu0 %vm2645_vm9, %v7722_v33 }
0x19c8   :  { %9949 = vmatpush1.bf16.msra.mxu0 %v9948_v43  ;;  %7878 = vmatprep.mubr.f32.mxu0 %v12297_v52 }
0x19cb   :  { %8909 = vmatmul.mubr.msk.f32.vlgmr.msra.gmra.mrb[10].mxu0 %vm2645_vm9, %v7807_v56 }
0x19cc   :  { %7884 = vmatprep.mubr.f32.mxu0 %v12297_v52 }
0x19cf   :  { %8910 = vmatmul.mubr.msk.f32.gmra.mrb[12].mxu0 %vm2645_vm9, %v7809_v48 }
0x1a9e   :  { %v7880_v7 = vpop.f32.mrb[10].mxu0 }
0x1a9f   :  { %v7902_v29 = vadd.f32 %v7895_v47, %v7880_v7  ;;  %v7882_v39 = vpop.f32.mrb[11].mxu0 }
0x1aa0   :  { %v12136_v30 = vadd.f32 %v7899_v45, %v7882_v39 }
0x1aa1   :  { %8996 = vmatprep.mubr.msk.f32.mxu0 %vm2645_vm9, %v7902_v29 }
0x1aa2   :  { %v7886_v38 = vpop.f32.mrb[12].mxu0 }
0x1aa3   :  { %v7904_v26 = vadd.f32 %v7895_v47, %v7886_v38  ;;  %v7888_v62 = vpop.f32.mrb[13].mxu0 }
0x1aa4   :  { %v12139_v10 = vadd.f32 %v7899_v45, %v7888_v62 }
0x1aa5   :  { %v10221_v52 = vpack.i.bf16 %v7904_v26, %v7902_v29 }
0x1aa6   :  { %v10231_v3 = vpack.i.bf16 %v12139_v10, %v12136_v30  ;;  %v9956_v18 = vpack.c.bf16 %v12139_v10, %v12136_v30  ;;  %v7704_v10 = vld [vmem:[#allocation11 + $0x20] sm:$0xff] }
0x1aa7   :  { %10222 = vrot.lane.b32.xlu0 %v10221_v52, %s10572_s8 }
0x1b19   :  { %v10223_v49 = vpop.permute.xlu0 %10222 }
0x1b1a   :  { %v10225_v4 = vunpack.i.h.bf16 %v10223_v49  ;;  %v10224_v34 = vunpack.i.l.bf16 %v10223_v49 }
0x1b1c   :  { %v9950_v57 = vpack.c.bf16 %v10225_v4, %v10224_v34 }
0x1b1e   :  { %9952 = vmatprep.subr.msk.bf16.mxu0 %vm12148_vm13, %v9950_v57 }
0x1b1f   :  { %9955 = vmatpush3.bf16.xpose.msk.msra.mxu0 %vm12148_vm13, %v9950_v57 }
0x1b20   :  { %9957 = vmatprep.subr.bf16.mxu0 %v9956_v18 }
0x1b26   :  { %8997 = vmatmul.mubr.msk.f32.vlgmr.msra.gmra.mrb[14].mxu0 %vm2645_vm9, %v7904_v26 }
0x1b27   :  { %9959 = vmatpush3.bf16.msra.mxu0 %v9956_v18 }
0x1bf9   :  { %v8998_v20 = vpop.f32.mrb[14].mxu0 }
0x1bfa   :  { %v8007_v24 = vmul.f32 0.17677669, %v8998_v20  ;;  %v7997_v61 = vpop.f32.mrb[15].mxu0  ;;  %v7706_v20 = vld [vmem:[#allocation11 + $0x30] sm:$0xff] }
0x1bfb   :  { %v8006_v22 = vmul.f32 0.17677669, %v7997_v61  ;;  %v9974_v61 = vpack.c.bf16 %v7707_v5, %v7706_v20 }
0x1bfc   :  { %v8009_v9 = vadd.f32 %v8007_v24, %v7916_v1 }
0x1bfd   :  { %v8008_v12 = vadd.f32 %v8006_v22, %v7915_v50  ;;  %v7701_v22 = vld [vmem:[#allocation11 + $0x8] sm:$0xff] }
0x1bfe   :  { %v8013_v40 = vsel %vm194_vm0, %v8009_v9, -inf }
0x1bff   :  { %8014 = vmax.xlane.f32.xlu0 %v8013_v40  ;;  %v8010_v44 = vsel %vm194_vm0, %v8008_v12, -inf  ;;  %v7709_v40 = vld [vmem:[%s12256_s12 + $0x8] sm:$0xff] }
0x1c00   :  { %8011 = vmax.xlane.f32.xlu1 %v8010_v44  ;;  %v7710_v44 = vld [vmem:[%s12256_s12 + $0x10] sm:$0xff] }
0x1c8c   :  { %v8015_v41 = vpop.xlane.xlu0 %8014 }
0x1c8d   :  { %v8017_v51 = vsub.f32 %v8009_v9, %v8015_v41  ;;  %v8012_v0 = vpop.xlane.xlu1 %8011 }
0x1c8e   :  { %v8016_v8 = vsub.f32 %v8008_v12, %v8012_v0  ;;  %v7708_v12 = vld [vmem:[%s12256_s12] sm:$0xff] }
0x1c8f   :  { %v8020_v13 = vmul.f32 1.442695, %v8017_v51  ;;  %v9986_v41 = vpack.c.bf16 %v7709_v40, %v7708_v12  ;;  %v7711_v51 = vld [vmem:[%s12256_s12 + $0x18] sm:$0xff] }
0x1c90   :  { %v8018_v21 = vmul.f32 1.442695, %v8016_v8  ;;  %v9990_v0 = vpack.c.bf16 %v7711_v51, %v7710_v44  ;;  %v7712_v8 = vld [vmem:[%s12256_s12 + $0x20] sm:$0xff] }
0x1c91   :  { %10332 = vpow2.f32 %v8020_v13  ;;  %v7713_v13 = vld [vmem:[%s12256_s12 + $0x28] sm:$0xff]  ;;  %9987 = vmatprep.subr.bf16.mxu1 %v9986_v41 }
0x1c92   :  { %10334 = vpow2.f32 %v8018_v21  ;;  %9989 = vmatpush3.bf16.msra.mxu1 %v9986_v41  ;;  %v9994_v21 = vpack.c.bf16 %v7713_v13, %v7712_v8 }
0x1c93   :  { %9991 = vmatprep.subr.bf16.mxu1 %v9990_v0 }
0x1c96   :  { %9993 = vmatpush3.bf16.msra.mxu1 %v9990_v0 }
0x1c97   :  { %9995 = vmatprep.subr.bf16.mxu1 %v9994_v21 }
0x1c9a   :  { %9997 = vmatpush3.bf16.msra.mxu1 %v9994_v21 }
0x1c9b   :  { %v10333_v36 = vpop.eup %10332 }
0x1c9c   :  { %v10335_v42 = vpop.eup %10334  ;;  %v8025_v28 = vsel %vm194_vm0, %v10333_v36, 0.0 }
0x1c9d   :  { %8026 = vadd.xlane.f32.xlu1 %v8025_v28  ;;  %v8022_v54 = vsel %vm194_vm0, %v10335_v42, 0.0 }
0x1c9e   :  { %8023 = vadd.xlane.f32.xlu0 %v8022_v54  ;;  %v7702_v54 = vld [vmem:[#allocation11 + $0x10] sm:$0xff] }
0x1cae   :  { %8113 = vrot.lane.b32.xlu1 %v7902_v29, %s10573_s6 }
0x1cb2   :  { %8115 = vrot.lane.b32.xlu1 %v7904_v26, %s10573_s6 }
0x1cb4   :  { %10227 = vrot.lane.b32.xlu0 %v10221_v52, %s10574_s20 }
0x1d2a   :  { %v8027_v35 = vpop.xlane.xlu1 %8026 }
0x1d2b   :  { %10336 = vrcp.f32 %v8027_v35  ;;  %v8024_v55 = vpop.xlane.xlu0 %8023  ;;  %v7703_v35 = vld [vmem:[#allocation11 + $0x18] sm:$0xff] }
0x1d2c   :  { %10338 = vrcp.f32 %v8024_v55 }
0x1d2e   :  { %v8114_v27 = vpop.permute.xlu1 %8113 }
0x1d2f   :  { %v10228_v59 = vpop.permute.xlu0 %10227 }
0x1d30   :  { %v10230_v25 = vunpack.i.h.bf16 %v10228_v59  ;;  %v10229_v53 = vunpack.i.l.bf16 %v10228_v59 }
0x1d32   :  { %v9960_v32 = vpack.c.bf16 %v10230_v25, %v10229_v53  ;;  %v8116_v23 = vpop.permute.xlu1 %8115  ;;  %v9982_v25 = vpack.c.bf16 %v7703_v35, %v7702_v54  ;;  %v8573_v53 = vld [vmem:[#allocation14 + $0x20] sm:$0xff] }
0x1d34   :  { %9962 = vmatprep.subr.msk.bf16.mxu0 %vm12148_vm13, %v9960_v32 }
0x1d35   :  { %v10337_v19 = vpop.eup %10336 }
0x1d36   :  { %v10339_v17 = vpop.eup %10338  ;;  %v8031_v14 = vmul.f32 %v10337_v19, %v10333_v36  ;;  %v7714_v36 = vld [vmem:[%s12256_s12 + $0x30] sm:$0xff] }
0x1d37   :  { %v8030_v63 = vmul.f32 %v10339_v17, %v10335_v42  ;;  %v7715_v42 = vld [vmem:[%s12256_s12 + $0x38] sm:$0xff]  ;;  %s10576_s12 = smov [#allocation16]  }
0x1d38   :  { %v9998_v28 = vpack.c.bf16 %v7715_v42, %v7714_v36  ;;  %s8854_s23 = sshll.u32 %s10576_s12, 4  ;;  %s8855_s23 = int_to_ptr.vmem [resolvable:$true] %s8854_s23 }
0x1d39   :  { %9003 = vmatprep.mubr.msk.f32.mxu0 %vm194_vm0, %v8030_v63  ;;  %s10524_s24 = scalar_lea.vmem %s8855_s23, 32  ;;  %p10529_p9 = scmp.lt.s32.totalorder %s8855_s23, %s8855_s23 }
0x1d3a   :  { %9004 = vmatmul.mubr.msk.f32.vlgmr.msra.gmra.mrb[16].mxu0 %vm194_vm0, %v8031_v14  ;;  %9999 = vmatprep.subr.bf16.mxu1 %v9998_v28  ;;  %v8575_v14 = vld [vmem:[#allocation14 + $0x30] sm:$0xff]  ;;  %p10525_p8 = scmp.ne.s32.totalorder %s8855_s23, %s10524_s24  ;;  %p10530_p10 = scmp.lt.s32.totalorder %s10524_s24, %s10524_s24 }
0x1d3b   :  { %9965 = vmatpush3.bf16.xpose.msk.msra.mxu0 %vm12148_vm13, %v9960_v32  ;;  %9010 = vmatprep.mubr.msk.f32.mxu0 %vm2645_vm9, %v8114_v27  ;;  %v8574_v32 = vld [vmem:[#allocation14 + $0x28] sm:$0xff]  ;;  %v8576_v27 = vld [vmem:[#allocation14 + $0x38] sm:$0xff] }
0x1d3c   :  { %10001 = vmatpush3.bf16.msra.mxu1 %v9998_v28  ;;  %v10002_v19 = vpack.c.bf16 %v8574_v32, %v8573_v53  ;;  %p10531_p11 = por %p10530_p10, %p10529_p9 }
0x1d3e   :  { %p10532_p12 = pnand %p10531_p11, %p10525_p8 }
0x1d42   :  { %9011 = vmatmul.mubr.msk.f32.vlgmr.msra.gmra.mrb[18].mxu0 %vm2645_vm9, %v8116_v23  ;;  %v10006_v23 = vpack.c.bf16 %v8576_v27, %v8575_v14 }
0x1e0d   :  { %v12176_v31 = vpop.f32.mrb[16].mxu0 }
0x1e0e   :  { %v12178_v43 = vpop.f32.mrb[17].mxu0 }
0x1e15   :  { %v9012_v33 = vpop.f32.mrb[18].mxu0 }
0x1e16   :  { %v8205_v56 = vmul.f32 0.17677669, %v9012_v33  ;;  %v8195_v48 = vpop.f32.mrb[19].mxu0  ;;  %v8569_v33 = vld [vmem:[#allocation14 + $0x8] sm:$0xff] }
0x1e17   :  { %v8204_v2 = vmul.f32 0.17677669, %v8195_v48 }
0x1e18   :  { %v8207_v47 = vadd.f32 %v8205_v56, %v7916_v1 }
0x1e19   :  { %v8206_v45 = vadd.f32 %v8204_v2, %v7915_v50  ;;  %v7700_v50 = vld [vmem:[#allocation11] sm:$0xff]  ;;  %v8570_v2 = vld [vmem:[#allocation14 + $0x10] sm:$0xff] }
0x1e1a   :  { %v8211_v7 = vsel %vm194_vm0, %v8207_v47, -inf  ;;  %v9978_v9 = vpack.c.bf16 %v7701_v22, %v7700_v50 }
0x1e1b   :  { %8212 = vmax.xlane.f32.xlu1 %v8211_v7  ;;  %v8208_v29 = vsel %vm194_vm0, %v8206_v45, -inf }
0x1e1c   :  { %8209 = vmax.xlane.f32.xlu0 %v8208_v29 }
0x1e2c   :  { %10232 = vrot.lane.b32.xlu1 %v10231_v3, %s10573_s6  ;;  %v7705_v3 = vld [vmem:[#allocation11 + $0x28] sm:$0xff] }
0x1e2d   :  { %v9970_v15 = vpack.c.bf16 %v7705_v3, %v7704_v10 }
0x1ea8   :  { %v8213_v39 = vpop.xlane.xlu1 %8212 }
0x1ea9   :  { %v8215_v38 = vsub.f32 %v8207_v47, %v8213_v39  ;;  %v8210_v26 = vpop.xlane.xlu0 %8209  ;;  %v8571_v47 = vld [vmem:[#allocation14 + $0x18] sm:$0xff] }
0x1eaa   :  { %v8214_v62 = vsub.f32 %v8206_v45, %v8210_v26  ;;  %v10014_v26 = vpack.c.bf16 %v8571_v47, %v8570_v2 }
0x1eab   :  { %v8218_v52 = vmul.f32 1.442695, %v8215_v38 }
0x1eac   :  { %v8216_v18 = vmul.f32 1.442695, %v8214_v62  ;;  %v10233_v49 = vpop.permute.xlu1 %10232 }
0x1ead   :  { %v10235_v4 = vunpack.i.h.bf16 %v10233_v49  ;;  %v10234_v34 = vunpack.i.l.bf16 %v10233_v49  ;;  %v8579_v49 = vld [vmem:[#allocation14 + $0x48] sm:$0xff] }
0x1eae   :  { %10340 = vpow2.f32 %v8216_v18  ;;  %v8578_v18 = vld [vmem:[#allocation14 + $0x40] sm:$0xff] }
0x1eaf   :  { %v9966_v58 = vpack.c.bf16 %v10235_v4, %v10234_v34  ;;  %10342 = vpow2.f32 %v8218_v52 }
0x1eb1   :  { %9967 = vmatprep.subr.bf16.mxu0 %v9966_v58 }
0x1eb2   :  { %9969 = vmatpush3.bf16.msra.mxu0 %v9966_v58 }
0x1eb3   :  { %9971 = vmatprep.subr.bf16.mxu0 %v9970_v15 }
0x1eb8   :  { %v10341_v57 = vpop.eup %10340 }
0x1eb9   :  { %v8220_v37 = vsel %vm194_vm0, %v10341_v57, 0.0  ;;  %v10343_v11 = vpop.eup %10342 }
0x1eba   :  { %8221 = vadd.xlane.f32.xlu0 %v8220_v37  ;;  %v8223_v30 = vsel %vm194_vm0, %v10343_v11, 0.0  ;;  %v8580_v37 = vld [vmem:[#allocation14 + $0x50] sm:$0xff] }
0x1ebe   :  { %8224 = vadd.xlane.f32.xlu0 %v8223_v30 }
0x1f47   :  { %v8222_v46 = vpop.xlane.xlu0 %8221 }
0x1f48   :  { %10344 = vrcp.f32 %v8222_v46 }
0x1f4b   :  { %v8225_v60 = vpop.xlane.xlu0 %8224 }
0x1f4c   :  { %10346 = vrcp.f32 %v8225_v60 }
0x1f52   :  { %v10345_v16 = vpop.eup %10344 }
0x1f53   :  { %v8228_v6 = vmul.f32 %v10345_v16, %v10341_v57  ;;  %v10018_v57 = vpack.c.bf16 %v8579_v49, %v8578_v18 }
0x1f55   :  { %9017 = vmatprep.mubr.msk.f32.mxu0 %vm194_vm0, %v8228_v6 }
0x1f56   :  { %v10347_v1 = vpop.eup %10346 }
0x1f57   :  { %v8229_v24 = vmul.f32 %v10347_v1, %v10343_v11  ;;  %v8581_v11 = vld [vmem:[#allocation14 + $0x58] sm:$0xff] }
0x1f58   :  { %v10022_v30 = vpack.c.bf16 %v8581_v11, %v8580_v37 }
0x1f59   :  { %9018 = vmatmul.mubr.msk.f32.vlgmr.msra.gmra.mrb[20].mxu0 %vm194_vm0, %v8229_v24  ;;  %vm8846_vm0 = vcmask 254976  }
0x1f5a   :  { %9973 = vmatpush3.bf16.msra.mxu0 %v9970_v15 }
0x1f5b   :  { %9975 = vmatprep.subr.bf16.mxu0 %v9974_v61 }
0x1f5e   :  { %9977 = vmatpush3.bf16.msra.mxu0 %v9974_v61 }
0x1f5f   :  { %9979 = vmatprep.subr.bf16.mxu0 %v9978_v9 }
0x202c   :  { %v9019_v55 = vpop.f32.mrb[20].mxu0 }
0x202d   :  { %v8310_v59 = vpop.f32.mrb[21].mxu0 }
0x202e   :  { %9028 = vmatprep.mubr.msk.f32.mxu0 %vm2645_vm9, %v8310_v59 }
0x202f   :  { %9029 = vmatmul.mubr.msk.f32.vlgmr.msra.gmra.mrb[22].mxu0 %vm2645_vm9, %v9019_v55 }
0x2030   :  { %9981 = vmatpush3.bf16.msra.mxu0 %v9978_v9  ;;  %9039 = vmatprep.mubr.msk.f32.mxu0 %vm2645_vm9, %v12178_v43  ;;  %v8568_v43 = vld [vmem:[#allocation14] sm:$0xff] }
0x2031   :  { %9983 = vmatprep.subr.bf16.mxu0 %v9982_v25  ;;  %v10010_v56 = vpack.c.bf16 %v8569_v33, %v8568_v43 }
0x2034   :  { %9985 = vmatpush3.bf16.msra.mxu0 %v9982_v25 }
0x2035   :  { %10003 = vmatprep.subr.bf16.mxu0 %v10002_v19 }
0x2037   :  { %9040 = vmatmul.mubr.msk.f32.vlgmr.msra.gmra.mrb[22].mxu0 %vm2645_vm9, %v12176_v31  ;;  %v8927_v31 = vld [vmem:[#allocation13] ss:$0 sm:$0xff] }
0x2038   :  { %10005 = vmatpush3.bf16.msra.mxu0 %v10002_v19 }
0x2039   :  { %10007 = vmatprep.subr.bf16.mxu0 %v10006_v23 }
0x203c   :  { %10009 = vmatpush3.bf16.msra.mxu0 %v10006_v23 }
0x203d   :  { %10011 = vmatprep.subr.bf16.mxu0 %v10010_v56 }
0x210a   :  { %v9041_v17 = vpop.f32.mrb[22].mxu0 }
0x210b   :  { %v8472_v63 = vpop.f32.mrb[23].mxu0 }
0x210c   :  { %9058 = vmatprep.mubr.msk.f32.mxu1 %vm1933_vm10, %v8472_v63 }
0x210d   :  { %9059 = vmatmul.mubr.msk.f32.vlgmr.msra.gmra.mrb[14].mxu1 %vm1933_vm10, %v9041_v17 }
0x21e0   :  { %v9060_v48 = vpop.f32.mrb[14].mxu1 }
0x21e1   :  { %v8565_v45 = vadd.f32 %v9060_v48, %v8927_v31  ;;  %v8559_v7 = vpop.f32.mrb[15].mxu1 }
0x21e2   :  { %v8560_v29 = vadd.f32 %v8927_v31, %v8559_v7 }
0x21e3   :  { %v8585_v39 = vrot.slane %v8565_v45, 6  ;;  %v8590_v38 = vrot.slane %v8565_v45, 2 }
0x21e4   :  { %v8584_v62 = vrot.slane %v8560_v29, 6  ;;  %v8589_v52 = vrot.slane %v8560_v29, 2  ;;  %9069 = vmatprep.mubr.msk.f32.mxu0 %vm2645_vm9, %v8560_v29 }
0x21e5   :  { %9070 = vmatmul.mubr.msk.f32.vlgmr.msra.gmra.mrb[24].mxu0 %vm2645_vm9, %v8565_v45  ;;  %v8593_v10 = vsel %vm748_vm5, %v8590_v38, 0.0 }
0x21e6   :  { %10013 = vmatpush3.bf16.msra.mxu0 %v10010_v56  ;;  %v8588_v4 = vsel %vm7669_vm11, 0.0, %v8584_v62  ;;  %v8586_v34 = vsel %vm7669_vm11, %v8584_v62, %v8585_v39  ;;  %v8591_v58 = vsel %vm748_vm5, %v8589_v52, %v8590_v38 }
0x21e7   :  { %9080 = vmatprep.mubr.msk.f32.mxu0 %vm2645_vm9, %v8588_v4  ;;  %10015 = vmatprep.subr.bf16.mxu0 %v10014_v26 }
0x21ea   :  { %10017 = vmatpush3.bf16.msra.mxu0 %v10014_v26 }
0x21eb   :  { %10019 = vmatprep.subr.bf16.mxu0 %v10018_v57 }
0x21ed   :  { %9081 = vmatmul.mubr.msk.f32.vlgmr.msra.gmra.mrb[24].mxu0 %vm2645_vm9, %v8586_v34 }
0x21ee   :  { %10021 = vmatpush3.bf16.msra.mxu0 %v10018_v57  ;;  %9091 = vmatprep.mubr.msk.f32.mxu0 %vm2645_vm9, %v8591_v58 }
0x21ef   :  { %10023 = vmatprep.subr.bf16.mxu0 %v10022_v30 }
0x21f2   :  { %10025 = vmatpush3.bf16.msra.mxu0 %v10022_v30 }
0x21f5   :  { %9092 = vmatmul.mubr.msk.f32.vlgmr.msra.gmra.mrb[24].mxu0 %vm2645_vm9, %v8593_v10 }
0x22c8   :  { %v9093_v3 = vpop.f32.mrb[24].mxu0 }
0x22c9   :  { %v8836_v15 = vmax.f32 %v9093_v3, 0.0  ;;  %v8824_v46 = vpop.f32.mrb[25].mxu0 }
0x22ca   :  { %v8835_v60 = vmax.f32 %v8824_v46, 0.0 }
0x22cc   :  { %v8837_v16 = vmax.f32 %v8835_v60, %v8836_v15 }
0x22ce   :  { %v8839_v6 = vrot.slane %v8837_v16, 4 }
0x22d0   :  { %v8841_v20 = vmax.f32 %v8837_v16, %v8839_v6 }
0x22d2   :  { %v8843_v5 = vrot.slane %v8841_v20, 2 }
0x22d4   :  { %v8845_v1 = vmax.f32 %v8841_v20, %v8843_v5 }
0x22d6   :  { %8847 = vst.msk [vmem:[#allocation16] sm:$0x3] %vm8846_vm0, %v8845_v1 }
0x22d7   :  { %10535 = shalt.err (!%p10532_p12)
}
0x22d8   :  { %s10536_s5 = scalar_lea.hbm %s12259_s15, 32 }
0x22d9   :  { %p10537_p13 = scmp.ne.s32.totalorder %s12259_s15, %s10536_s5  ;;  %p10540_p0 = scmp.lt.u32.totalorder %s10536_s5, %s12259_s15 }
0x22db   :  { %p10542_p1 = pnand %p10540_p0, %p10537_p13 }
0x22dd   :  { %10545 = shalt.err (!%p10542_p1)
}
0x22de   :  { %8857 = dma.vmem_to_hbm [thread:$0]  %s8855_s23, 32, %s12259_s15, [#allocation4]  }
0x22df   :  { %10556 = dma.done.wait [#allocation4], 32  }
0x22e0   :  { %10557 = vsyncadd [#allocation4], 4294967264 }
0x22e1   :  { %8861 = vsyncpa [#allocation3], 1 }
0x22e2   :  { %8862 = vsyncpa [#allocation6], 1 }
0x22e3   :  { %8863 = vsyncpa [#allocation9], 1 }
0x22e4   :  { %8864 = vsyncpa [#allocation12], 1 }
0x22e5   :  { %8865 = vsyncpa [#allocation15], 1 }
0x22e6   :  { %8866 = vsyncpa [#allocation4], 1 }

</bundles_post_ra>
